<compile_context>
chip_gen: v5e
topology: v5e:2x2
jax: 0.10.0
libtpu: 0.0.40
codegen_flags: <defaults>
</compile_context>

<pallas_src>
import math

import jax
import jax.numpy as jnp
from jax.experimental import pallas as pl
from jax.experimental.pallas import tpu as pltpu

OUT_PAD = 128  # lane-padded feature width -> full-128-lane loads/stores


def _sigmoid(z):
    # Exact sigmoid (exp goes to the EUP); outputs stay inside [0, 1].
    return 1.0 / (1.0 + jnp.exp(-z))


def _plan_produces(layout, tgt_arity):
    """Which features each layer must produce so that the target arity of the
    final layer is exact (lets the trailing layers skip dead compute)."""
    n = len(layout)
    prod = [None] * n
    prod[n - 1] = {'f0': tgt_arity == 0, 'f1': tgt_arity == 1,
                   'f2': tgt_arity == 2, 'f2t': False}
    for l in range(n - 2, -1, -1):
        nxt = prod[l + 1]
        prod[l] = {
            'f0': nxt['f0'] or nxt['f1'],
            'f1': nxt['f0'] or nxt['f1'] or nxt['f2'] or nxt['f2t'],
            'f2': nxt['f1'] or nxt['f2'] or nxt['f2t'],
            'f2t': nxt['f2'] or nxt['f2t'],
        }
    return prod


# ---------------------------------------------------------------------------
# Fused kernel: the whole depth-D LogicMachine in one pallas_call.
# ---------------------------------------------------------------------------
def _make_fused_kernel(layout, produces, N, Bt, out_pad, tgt_arity):
    OP = out_pad
    n_layers = len(layout)

    def kernel(f1_ref, f2_ref, f2t_ref, w128_ref, w256_ref, o_ref):
        def dot(a, b):
            return jnp.dot(a, b, preferred_element_type=jnp.float32)

        def wk(entry):                       # (rows, 128) packed block
            off, rows = entry
            return w128_ref[off:off + rows, :]

        def wk2(entry):                      # (rows, 256) merged Wa|Wb block
            off, rows = entry
            return w256_ref[off:off + rows, :]

        def mvec(x, w):
            # matvec-style matmul with tiny M; keep the MXU M dimension >= 8.
            m, k = x.shape
            if m == 1:
                return dot(jnp.broadcast_to(x, (8, k)), w)[:1]
            if m < 8:
                pad = jnp.zeros((8 - m, k), x.dtype)
                return dot(jnp.concatenate([x, pad], axis=0), w)[:m]
            return dot(x, w)

        f0 = None
        f1 = f1_ref[...]                     # (Bt, N, q1)     bf16
        f2 = f2_ref[...]                     # (Bt, N, N, q2)  bf16
        f2t = f2t_ref[...]                   # (Bt, N, N, q2)  f2t[i,j]=f2[j,i]

        masks = {}                           # "exclude self" mask, hoisted

        def diag_mask(q):
            if q not in masks:
                ii = jax.lax.broadcasted_iota(jnp.int32, (1, N, N, q), 1)
                jj = jax.lax.broadcasted_iota(jnp.int32, (1, N, N, q), 2)
                masks[q] = ii == jj
            return masks[q]

        for l, (L, P) in enumerate(zip(layout, produces)):
            last = l == n_layers - 1
            has_f0 = L['has_f0']
            q1 = f1.shape[-1]
            f1_flat = f1.reshape(Bt * N, q1)

            new_f0 = new_f1 = new_f2 = new_f2t = None

            # -- arity 0: sigmoid([f0 | exists/forall(f1)] @ W0 + b0) --------
            if P['f0']:
                ex1 = jnp.max(f1, axis=1)                        # (Bt, q1)
                fa1 = jnp.min(f1, axis=1)
                z0 = (mvec(ex1, wk(L['w0_ex'])) + mvec(fa1, wk(L['w0_fa']))
                      + wk(L['b0']))
                if has_f0:
                    z0 = z0 + mvec(f0, wk(L['w0_f0']))
                new_f0 = _sigmoid(z0)                            # (Bt, OP) f32

            # -- arity 1: sigmoid([expand(f0) | f1 | ex/fa(f2)] @ W1 + b1) ---
            if P['f1']:
                q2 = f2.shape[-1]
                dm = diag_mask(q2)
                ex2 = jnp.max(jnp.where(dm, 0.0, f2), axis=2)    # (Bt, N, q2)
                fa2 = jnp.min(jnp.where(dm, 1.0, f2), axis=2)
                z1 = (dot(f1_flat, wk(L['w1_f1']))
                      + dot(ex2.reshape(Bt * N, q2), wk(L['w1_ex']))
                      + dot(fa2.reshape(Bt * N, q2), wk(L['w1_fa']))
                      + wk(L['b1'])).reshape(Bt, N, OP)
                if has_f0:
                    z1 = z1 + mvec(f0, wk(L['w1_f0']))[:, None, :]
                new_f1 = _sigmoid(z1)                            # (Bt, N, OP)

            # -- arity 2: sigmoid(perm_cat([expand(f1) | f2]) @ W2 + b2) -----
            # perm_cat is folded into the merged (Wa|Wb) blocks: Wa acts on the
            # untransposed copy, Wb on the transposed one; the transposed
            # output for the next layer reuses the same partial products so no
            # on-chip transpose is ever required.
            if P['f2'] or P['f2t']:
                q2 = f2.shape[-1]
                uab = dot(f1_flat, wk2(L['wab1']))               # (Bt*N, 2*OP)
                yab = dot(f2.reshape(Bt * N * N, q2), wk2(L['wab2']))
                yabt = dot(f2t.reshape(Bt * N * N, q2), wk2(L['wab2']))
                ua = uab[:, :OP].reshape(Bt, N, OP)
                ub = uab[:, OP:].reshape(Bt, N, OP)
                ya = yab[:, :OP].reshape(Bt, N, N, OP)
                yb = yab[:, OP:].reshape(Bt, N, N, OP)
                yat = yabt[:, :OP].reshape(Bt, N, N, OP)
                ybt = yabt[:, OP:].reshape(Bt, N, N, OP)
                b2 = wk(L['b2'])
                if P['f2']:
                    # z2[i,j] = f1[i]Wa1 + f2[i,j]Wa2 + f1[j]Wb1 + f2[j,i]Wb2
                    z2 = ua[:, :, None, :] + ya + ub[:, None, :, :] + ybt + b2
                    new_f2 = _sigmoid(z2)                        # (Bt,N,N,OP)
                if P['f2t']:
                    # z2t[i,j] = z2[j,i], from the same partial products.
                    z2t = ua[:, None, :, :] + yat + ub[:, :, None, :] + yb + b2
                    new_f2t = _sigmoid(z2t)

            if last:
                if tgt_arity == 0:
                    o_ref[...] = new_f0.reshape(Bt, 1, OP).astype(o_ref.dtype)
                elif tgt_arity == 1:
                    o_ref[...] = new_f1.astype(o_ref.dtype)
                else:
                    o_ref[...] = new_f2.astype(o_ref.dtype)
            else:
                to_bf16 = lambda a: None if a is None else a.astype(jnp.bfloat16)
                f0, f1 = to_bf16(new_f0), to_bf16(new_f1)
                f2, f2t = to_bf16(new_f2), to_bf16(new_f2t)

    return kernel


def nlm_forward(params, states, relations, tgt_arity=1, batch_tile=1):
    """Fused NLM forward pass: one pallas_call for the whole depth."""
    out_dim = params['out_dim']
    layout = params['layout']
    produces = _plan_produces(layout, tgt_arity)

    B, N = states.shape[0], states.shape[1]
    assert relations.shape[:3] == (B, N, N)
    Bt = batch_tile
    assert B % Bt == 0, (B, Bt)
    C1, C2 = states.shape[-1], relations.shape[-1]

    f1 = states.astype(jnp.bfloat16)
    f2 = relations.astype(jnp.bfloat16)
    f2t = jnp.transpose(f2, (0, 2, 1, 3))  # one-time transpose of raw relations

    w128, w256 = params['w128'], params['w256']

    if tgt_arity == 0:
        out_shape = jax.ShapeDtypeStruct((B, 1, OUT_PAD), jnp.float32)
        out_spec = pl.BlockSpec((Bt, 1, OUT_PAD), lambda b: (b, 0, 0))
    elif tgt_arity == 1:
        out_shape = jax.ShapeDtypeStruct((B, N, OUT_PAD), jnp.float32)
        out_spec = pl.BlockSpec((Bt, N, OUT_PAD), lambda b: (b, 0, 0))
    else:
        out_shape = jax.ShapeDtypeStruct((B, N, N, OUT_PAD), jnp.float32)
        out_spec = pl.BlockSpec((Bt, N, N, OUT_PAD), lambda b: (b, 0, 0, 0))

    kernel = _make_fused_kernel(layout, produces, N=N, Bt=Bt,
                                out_pad=OUT_PAD, tgt_arity=tgt_arity)

    out = pl.pallas_call(
        kernel,
        out_shape=out_shape,
        grid_spec=pltpu.PrefetchScalarGridSpec(
            num_scalar_prefetch=0,
            grid=(B // Bt,),          # batch tiles; >=2 keeps both v7x TCs busy
            in_specs=[
                pl.BlockSpec((Bt, N, C1), lambda b: (b, 0, 0)),
                pl.BlockSpec((Bt, N, N, C2), lambda b: (b, 0, 0, 0)),
                pl.BlockSpec((Bt, N, N, C2), lambda b: (b, 0, 0, 0)),
                pl.BlockSpec(w128.shape, lambda b: (0, 0)),   # resident weights
                pl.BlockSpec(w256.shape, lambda b: (0, 0)),
            ],
            out_specs=out_spec,
        ),
        compiler_params=pltpu.CompilerParams(
            dimension_semantics=("parallel",)),
    )(f1, f2, f2t, w128, w256)

    if tgt_arity == 0:
        out = out[:, 0, :]
    return out[..., :out_dim]              # drop the lane padding once


# ---------------------------------------------------------------------------
# Parameters: per-part weight blocks, bf16, row-packed into two operands.
# ---------------------------------------------------------------------------
def _init_linear_ref(key, in_dim, out_dim):
    """PyTorch nn.Linear default init; weight stored as (in_dim, out_dim)."""
    kw, kb = jax.random.split(key)
    bound = 1.0 / math.sqrt(in_dim)
    w = jax.random.uniform(kw, (in_dim, out_dim), jnp.float32, -bound, bound)
    b = jax.random.uniform(kb, (out_dim,), jnp.float32, -bound, bound)
    return w, b


def build_nlm_params(key, depth, breadth, input_dims, out_dim,
                     out_pad=OUT_PAD, dtype=jnp.bfloat16):
    """Builds the two packed bf16 weight operands + static slice layout.

    NOTE: rows beyond the logical input channels and columns beyond `out_dim`
    MUST stay zero -- that is exactly what makes the sigmoid(0)=0.5 padded
    lanes of the previous layer inert.  Do not change the zero fill."""
    assert breadth == 2, "only breadth=2 (nullary/unary/binary) implemented"
    assert out_dim <= out_pad

    blocks128, blocks256 = [], []
    off = {'w128': 0, 'w256': 0}

    def _round8(n):
        return -(-n // 8) * 8

    def add128(w, q):
        d, o = w.shape
        assert d <= q and o <= out_pad
        blk = jnp.zeros((_round8(q), out_pad), jnp.float32).at[:d, :o].set(w)
        blocks128.append(blk)
        start = off['w128']
        off['w128'] += blk.shape[0]
        return (start, q)

    def add256(wa, wb, q):
        d, o = wa.shape
        assert wb.shape == (d, o) and d <= q and o <= out_pad
        blk = jnp.zeros((_round8(q), 2 * out_pad), jnp.float32)
        blk = blk.at[:d, :o].set(wa).at[:d, out_pad:out_pad + o].set(wb)
        blocks256.append(blk)
        start = off['w256']
        off['w256'] += blk.shape[0]
        return (start, q)

    d0, d1, d2 = input_dims            # logical channel counts
    q0, q1, q2 = input_dims            # physical (lane-padded) channel counts
    layout, ref = [], []
    for _ in range(depth):
        assert d1 > 0 and d2 > 0
        has_f0 = d0 > 0
        key, k0, k1, k2 = jax.random.split(key, 4)
        entry = {'has_f0': has_f0}

        # arity 0: rows = [f0 | interleaved exists/forall of reduce(f1)]
        w0, b0 = _init_linear_ref(k0, d0 + 2 * d1, out_dim)
        red = w0[d0:]
        if has_f0:
            entry['w0_f0'] = add128(w0[:d0], q0)
        entry['w0_ex'] = add128(red[0::2], q1)
        entry['w0_fa'] = add128(red[1::2], q1)
        entry['b0'] = add128(b0[None, :], 1)

        # arity 1: rows = [expand(f0) | f1 | interleaved exists/forall of f2]
        w1, b1 = _init_linear_ref(k1, d0 + d1 + 2 * d2, out_dim)
        red = w1[d0 + d1:]
        if has_f0:
            entry['w1_f0'] = add128(w1[:d0], q0)
        entry['w1_f1'] = add128(w1[d0:d0 + d1], q1)
        entry['w1_ex'] = add128(red[0::2], q2)
        entry['w1_fa'] = add128(red[1::2], q2)
        entry['b1'] = add128(b1[None, :], 1)

        # arity 2: rows = [expand(f1) | f2 | expand(f1)^T | f2^T]
        w2, b2 = _init_linear_ref(k2, 2 * (d1 + d2), out_dim)
        wa1, wa2 = w2[:d1], w2[d1:d1 + d2]
        wb1, wb2 = w2[d1 + d2:2 * d1 + d2], w2[2 * d1 + d2:]
        entry['wab1'] = add256(wa1, wb1, q1)
        entry['wab2'] = add256(wa2, wb2, q2)
        entry['b2'] = add128(b2[None, :], 1)

        layout.append(entry)
        # bf16-rounded copy for the pure-JAX reference (the kernel stores its
        # parameters in bf16, so the reference must see the same values).
        rnd = lambda a: a.astype(dtype).astype(jnp.float32)
        ref.append(((rnd(w0), rnd(b0)), (rnd(w1), rnd(b1)), (rnd(w2), rnd(b2))))

        d0 = d1 = d2 = out_dim
        q0 = q1 = q2 = out_pad

    params = {
        'w128': jnp.concatenate(blocks128, axis=0).astype(dtype),
        'w256': jnp.concatenate(blocks256, axis=0).astype(dtype),
        'layout': layout,
        'ref': ref,
        'out_dim': out_dim,
    }
    return params, [out_dim, out_dim, out_dim]


# ---------------------------------------------------------------------------
# Pure-JAX transcription of the reference LogicMachine (validation only).
# ---------------------------------------------------------------------------
def nlm_reference(params, states, relations, tgt_arity=1):
    B, N = relations.shape[0], relations.shape[1]
    f = [None, states.astype(jnp.float32), relations.astype(jnp.float32)]
    dims = [0, f[1].shape[-1], f[2].shape[-1]]
    eye = jnp.eye(N, dtype=bool)[None, :, :, None]
    for refs in params['ref']:
        new_f = []
        for i in range(3):
            parts = []
            if i > 0 and dims[i - 1] > 0:
                x = f[i - 1]
                x = (jnp.broadcast_to(x[:, None, :], (B, N, x.shape[-1]))
                     if i == 1 else
                     jnp.broadcast_to(x[:, :, None, :], (B, N, N, x.shape[-1])))
                parts.append(x)
            if dims[i] > 0:
                parts.append(f[i])
            if i + 1 <= 2 and dims[i + 1] > 0:
                y = f[i + 1]
                if i + 1 == 1:
                    ex, fa = jnp.max(y, axis=1), jnp.min(y, axis=1)
                    red = jnp.stack([ex, fa], -1).reshape(B, 2 * y.shape[-1])
                else:
                    ex = jnp.max(jnp.where(eye, 0.0, y), axis=2)
                    fa = jnp.min(jnp.where(eye, 1.0, y), axis=2)
                    red = jnp.stack([ex, fa], -1).reshape(B, N, 2 * y.shape[-1])
                parts.append(red)
            x = jnp.concatenate(parts, axis=-1)
            if i == 2:
                x = jnp.concatenate([x, jnp.transpose(x, (0, 2, 1, 3))], -1)
            w, b = refs[i]
            z = jnp.dot(x.reshape(-1, x.shape[-1]), w, precision='highest') + b
            new_f.append(jax.nn.sigmoid(z).reshape(x.shape[:-1] + (w.shape[1],)))
        f = new_f
        dims = [r[0].shape[1] for r in refs]
    return f[tgt_arity]


if __name__ == "__main__":
    key = jax.random.PRNGKey(0)
    N = 8                     # number of objects (agents)
    C1, C2 = 4, 6             # unary / binary predicate channels
    DEPTH, BREADTH, OUT_DIM, TGT_ARITY = 3, 2, 8, 1

    kp, kd = jax.random.split(key)
    params, out_dims = build_nlm_params(
        kp, depth=DEPTH, breadth=BREADTH, input_dims=[0, C1, C2],
        out_dim=OUT_DIM)

    # (batch, batch_tile): grid = B // Bt steps.  >= 2 steps keeps both v7x
    # TensorCores busy; Bt > 1 exercises the batch-tiled (flattened-M) path.
    for B, Bt in ((2, 1), (4, 2)):
        k1, k2 = jax.random.split(jax.random.fold_in(kd, B))
        states = (jax.random.uniform(k1, (B, N, C1)) > 0.5).astype(jnp.float32)
        relations = (jax.random.uniform(k2, (B, N, N, C2)) > 0.5).astype(
            jnp.float32)

        fwd = jax.jit(lambda s, r, bt=Bt: nlm_forward(
            params, s, r, tgt_arity=TGT_ARITY, batch_tile=bt))
        feature = jax.block_until_ready(fwd(states, relations))

        assert feature.shape == (B, N, out_dims[TGT_ARITY]), feature.shape
        assert bool(jnp.all(jnp.isfinite(feature)))

        # Validate the fused kernel against the pure-JAX NLM transcription
        # (tolerance covers bf16 activation storage + MXU-vs-XLA rounding).
        ref = nlm_reference(params, states, relations, tgt_arity=TGT_ARITY)
        err = float(jnp.max(jnp.abs(feature - ref)))
        assert err < 5e-2, f"B={B} Bt={Bt}: max |kernel - reference| = {err:.3e}"

    print("KERNEL_OK")
</pallas_src>

<mosaic_0001>
module attributes {stable_mosaic.version = 11 : i64} {
  func.func @kernel(%arg0: i32, %arg1: memref<1x8x4xbf16, #tpu.memory_space<vmem>>, %arg2: memref<1x8x8x6xbf16, #tpu.memory_space<vmem>>, %arg3: memref<1x8x8x6xbf16, #tpu.memory_space<vmem>>, %arg4: memref<1904x128xbf16, #tpu.memory_space<vmem>>, %arg5: memref<528x256xbf16, #tpu.memory_space<vmem>>, %arg6: memref<1x8x128xf32, #tpu.memory_space<vmem>>) attributes {dimension_semantics = [#tpu.dimension_semantics<parallel>], iteration_bounds = array<i64: 2>, scalar_prefetch = 0 : i64, scratch_operands = 0 : i64, tpu.core_type = #tpu.core_type<tc>, window_params = [{transform_indices = @transform_0, window_bounds = array<i64: 1, 8, 4>}, {transform_indices = @transform_1, window_bounds = array<i64: 1, 8, 8, 6>}, {transform_indices = @transform_2, window_bounds = array<i64: 1, 8, 8, 6>}, {pipeline_mode = #tpu.pipeline_mode<synchronous>, transform_indices = @transform_3, window_bounds = array<i64: 1904, 128>}, {pipeline_mode = #tpu.pipeline_mode<synchronous>, transform_indices = @transform_4, window_bounds = array<i64: 528, 256>}, {transform_indices = @transform_5, window_bounds = array<i64: 1, 8, 128>}]} {
    %c0 = arith.constant 0 : index
    %c0_0 = arith.constant 0 : index
    %c0_1 = arith.constant 0 : index
    %0 = vector.load %arg1[%c0, %c0_0, %c0_1] : memref<1x8x4xbf16, #tpu.memory_space<vmem>>, vector<1x8x4xbf16>
    %c0_2 = arith.constant 0 : index
    %c0_3 = arith.constant 0 : index
    %c0_4 = arith.constant 0 : index
    %c0_5 = arith.constant 0 : index
    %1 = vector.load %arg2[%c0_2, %c0_3, %c0_4, %c0_5] : memref<1x8x8x6xbf16, #tpu.memory_space<vmem>>, vector<1x8x8x6xbf16>
    %c0_6 = arith.constant 0 : index
    %c0_7 = arith.constant 0 : index
    %c0_8 = arith.constant 0 : index
    %c0_9 = arith.constant 0 : index
    %2 = vector.load %arg3[%c0_6, %c0_7, %c0_8, %c0_9] : memref<1x8x8x6xbf16, #tpu.memory_space<vmem>>, vector<1x8x8x6xbf16>
    %3 = vector.shape_cast %0 : vector<1x8x4xbf16> to vector<8x4xbf16>
    %cst = arith.constant dense<0xFF80> : vector<1x4xbf16>
    %4 = vector.multi_reduction <maximumf>, %0, %cst [1] : vector<1x8x4xbf16> to vector<1x4xbf16>
    %cst_10 = arith.constant dense<0x7F80> : vector<1x4xbf16>
    %5 = vector.multi_reduction <minimumf>, %0, %cst_10 [1] : vector<1x8x4xbf16> to vector<1x4xbf16>
    %c0_11 = arith.constant 0 : index
    %c0_12 = arith.constant 0 : index
    %6 = vector.load %arg4[%c0_11, %c0_12] : memref<1904x128xbf16, #tpu.memory_space<vmem>>, vector<4x128xbf16>
    %7 = vector.shape_cast %4 : vector<1x4xbf16> to vector<1x4xbf16>
    %8 = vector.broadcast %7 : vector<1x4xbf16> to vector<8x4xbf16>
    %cst_13 = arith.constant dense<0.000000e+00> : vector<8x128xf32>
    %9 = tpu.matmul %8, %6, %cst_13 {dimension_numbers = #tpu.dot_dimension_numbers<[1], [0], [0], [1], [0, 0, 1, 1], [], []>} : vector<8x4xbf16>, vector<4x128xbf16>, vector<8x128xf32> -> vector<8x128xf32>
    %10 = vector.extract_strided_slice %9 {offsets = [0, 0], sizes = [1, 128], strides = [1, 1]} : vector<8x128xf32> to vector<1x128xf32>
    %c8 = arith.constant 8 : index
    %c0_14 = arith.constant 0 : index
    %11 = vector.load %arg4[%c8, %c0_14] : memref<1904x128xbf16, #tpu.memory_space<vmem>>, vector<4x128xbf16>
    %12 = vector.shape_cast %5 : vector<1x4xbf16> to vector<1x4xbf16>
    %13 = vector.broadcast %12 : vector<1x4xbf16> to vector<8x4xbf16>
    %cst_15 = arith.constant dense<0.000000e+00> : vector<8x128xf32>
    %14 = tpu.matmul %13, %11, %cst_15 {dimension_numbers = #tpu.dot_dimension_numbers<[1], [0], [0], [1], [0, 0, 1, 1], [], []>} : vector<8x4xbf16>, vector<4x128xbf16>, vector<8x128xf32> -> vector<8x128xf32>
    %15 = vector.extract_strided_slice %14 {offsets = [0, 0], sizes = [1, 128], strides = [1, 1]} : vector<8x128xf32> to vector<1x128xf32>
    %16 = arith.addf %10, %15 : vector<1x128xf32>
    %c16 = arith.constant 16 : index
    %c0_16 = arith.constant 0 : index
    %17 = vector.load %arg4[%c16, %c0_16] : memref<1904x128xbf16, #tpu.memory_space<vmem>>, vector<1x128xbf16>
    %18 = arith.extf %17 : vector<1x128xbf16> to vector<1x128xf32>
    %19 = arith.addf %16, %18 : vector<1x128xf32>
    %cst_17 = arith.constant 0.000000e+00 : f32
    %20 = vector.broadcast %cst_17 : f32 to vector<1x128xf32>
    %21 = arith.subf %20, %19 : vector<1x128xf32>
    %22 = math.exp %21 : vector<1x128xf32>
    %cst_18 = arith.constant 1.000000e+00 : f32
    %23 = vector.broadcast %cst_18 : f32 to vector<1x128xf32>
    %24 = arith.addf %23, %22 : vector<1x128xf32>
    %cst_19 = arith.constant 1.000000e+00 : f32
    %25 = vector.broadcast %cst_19 : f32 to vector<1x128xf32>
    %26 = arith.divf %25, %24 : vector<1x128xf32>
    %27 = tpu.iota {dimensions = array<i32: 1>} : vector<1x8x8x6xi32>
    %28 = tpu.iota {dimensions = array<i32: 2>} : vector<1x8x8x6xi32>
    %29 = arith.cmpi eq, %27, %28 : vector<1x8x8x6xi32>
    %cst_20 = arith.constant 0.000000e+00 : f32
    %30 = arith.truncf %cst_20 : f32 to bf16
    %31 = vector.broadcast %30 : bf16 to vector<1x8x8x6xbf16>
    %32 = arith.select %29, %31, %1 : vector<1x8x8x6xi1>, vector<1x8x8x6xbf16>
    %cst_21 = arith.constant dense<0xFF80> : vector<1x8x6xbf16>
    %33 = vector.multi_reduction <maximumf>, %32, %cst_21 [2] : vector<1x8x8x6xbf16> to vector<1x8x6xbf16>
    %cst_22 = arith.constant 1.000000e+00 : f32
    %34 = arith.truncf %cst_22 : f32 to bf16
    %35 = vector.broadcast %34 : bf16 to vector<1x8x8x6xbf16>
    %36 = arith.select %29, %35, %1 : vector<1x8x8x6xi1>, vector<1x8x8x6xbf16>
    %cst_23 = arith.constant dense<0x7F80> : vector<1x8x6xbf16>
    %37 = vector.multi_reduction <minimumf>, %36, %cst_23 [2] : vector<1x8x8x6xbf16> to vector<1x8x6xbf16>
    %c24 = arith.constant 24 : index
    %c0_24 = arith.constant 0 : index
    %38 = vector.load %arg4[%c24, %c0_24] : memref<1904x128xbf16, #tpu.memory_space<vmem>>, vector<4x128xbf16>
    %cst_25 = arith.constant dense<0.000000e+00> : vector<8x128xf32>
    %39 = tpu.matmul %3, %38, %cst_25 {dimension_numbers = #tpu.dot_dimension_numbers<[1], [0], [0], [1], [0, 0, 1, 1], [], []>} : vector<8x4xbf16>, vector<4x128xbf16>, vector<8x128xf32> -> vector<8x128xf32>
    %40 = vector.shape_cast %33 : vector<1x8x6xbf16> to vector<8x6xbf16>
    %c32 = arith.constant 32 : index
    %c0_26 = arith.constant 0 : index
    %41 = vector.load %arg4[%c32, %c0_26] : memref<1904x128xbf16, #tpu.memory_space<vmem>>, vector<6x128xbf16>
    %cst_27 = arith.constant dense<0.000000e+00> : vector<8x128xf32>
    %42 = tpu.matmul %40, %41, %cst_27 {dimension_numbers = #tpu.dot_dimension_numbers<[1], [0], [0], [1], [0, 0, 1, 1], [], []>} : vector<8x6xbf16>, vector<6x128xbf16>, vector<8x128xf32> -> vector<8x128xf32>
    %43 = arith.addf %39, %42 : vector<8x128xf32>
    %44 = vector.shape_cast %37 : vector<1x8x6xbf16> to vector<8x6xbf16>
    %c40 = arith.constant 40 : index
    %c0_28 = arith.constant 0 : index
    %45 = vector.load %arg4[%c40, %c0_28] : memref<1904x128xbf16, #tpu.memory_space<vmem>>, vector<6x128xbf16>
    %cst_29 = arith.constant dense<0.000000e+00> : vector<8x128xf32>
    %46 = tpu.matmul %44, %45, %cst_29 {dimension_numbers = #tpu.dot_dimension_numbers<[1], [0], [0], [1], [0, 0, 1, 1], [], []>} : vector<8x6xbf16>, vector<6x128xbf16>, vector<8x128xf32> -> vector<8x128xf32>
    %47 = arith.addf %43, %46 : vector<8x128xf32>
    %c48 = arith.constant 48 : index
    %c0_30 = arith.constant 0 : index
    %48 = vector.load %arg4[%c48, %c0_30] : memref<1904x128xbf16, #tpu.memory_space<vmem>>, vector<1x128xbf16>
    %49 = arith.extf %48 : vector<1x128xbf16> to vector<1x128xf32>
    %50 = vector.broadcast %49 : vector<1x128xf32> to vector<8x128xf32>
    %51 = arith.addf %47, %50 : vector<8x128xf32>
    %52 = vector.shape_cast %51 : vector<8x128xf32> to vector<1x8x128xf32>
    %cst_31 = arith.constant 0.000000e+00 : f32
    %53 = vector.broadcast %cst_31 : f32 to vector<1x8x128xf32>
    %54 = arith.subf %53, %52 : vector<1x8x128xf32>
    %55 = math.exp %54 : vector<1x8x128xf32>
    %cst_32 = arith.constant 1.000000e+00 : f32
    %56 = vector.broadcast %cst_32 : f32 to vector<1x8x128xf32>
    %57 = arith.addf %56, %55 : vector<1x8x128xf32>
    %cst_33 = arith.constant 1.000000e+00 : f32
    %58 = vector.broadcast %cst_33 : f32 to vector<1x8x128xf32>
    %59 = arith.divf %58, %57 : vector<1x8x128xf32>
    %c0_34 = arith.constant 0 : index
    %c0_35 = arith.constant 0 : index
    %60 = vector.load %arg5[%c0_34, %c0_35] : memref<528x256xbf16, #tpu.memory_space<vmem>>, vector<4x256xbf16>
    %cst_36 = arith.constant dense<0.000000e+00> : vector<8x256xf32>
    %61 = tpu.matmul %3, %60, %cst_36 {dimension_numbers = #tpu.dot_dimension_numbers<[1], [0], [0], [1], [0, 0, 1, 1], [], []>} : vector<8x4xbf16>, vector<4x256xbf16>, vector<8x256xf32> -> vector<8x256xf32>
    %62 = vector.shape_cast %1 : vector<1x8x8x6xbf16> to vector<64x6xbf16>
    %c8_37 = arith.constant 8 : index
    %c0_38 = arith.constant 0 : index
    %63 = vector.load %arg5[%c8_37, %c0_38] : memref<528x256xbf16, #tpu.memory_space<vmem>>, vector<6x256xbf16>
    %cst_39 = arith.constant dense<0.000000e+00> : vector<64x256xf32>
    %64 = tpu.matmul %62, %63, %cst_39 {dimension_numbers = #tpu.dot_dimension_numbers<[1], [0], [0], [1], [0, 0, 1, 1], [], []>} : vector<64x6xbf16>, vector<6x256xbf16>, vector<64x256xf32> -> vector<64x256xf32>
    %65 = vector.shape_cast %2 : vector<1x8x8x6xbf16> to vector<64x6xbf16>
    %c8_40 = arith.constant 8 : index
    %c0_41 = arith.constant 0 : index
    %66 = vector.load %arg5[%c8_40, %c0_41] : memref<528x256xbf16, #tpu.memory_space<vmem>>, vector<6x256xbf16>
    %cst_42 = arith.constant dense<0.000000e+00> : vector<64x256xf32>
    %67 = tpu.matmul %65, %66, %cst_42 {dimension_numbers = #tpu.dot_dimension_numbers<[1], [0], [0], [1], [0, 0, 1, 1], [], []>} : vector<64x6xbf16>, vector<6x256xbf16>, vector<64x256xf32> -> vector<64x256xf32>
    %68 = vector.extract_strided_slice %61 {offsets = [0, 0], sizes = [8, 128], strides = [1, 1]} : vector<8x256xf32> to vector<8x128xf32>
    %69 = vector.shape_cast %68 : vector<8x128xf32> to vector<1x8x128xf32>
    %70 = vector.extract_strided_slice %61 {offsets = [0, 128], sizes = [8, 128], strides = [1, 1]} : vector<8x256xf32> to vector<8x128xf32>
    %71 = vector.shape_cast %70 : vector<8x128xf32> to vector<1x8x128xf32>
    %72 = vector.extract_strided_slice %64 {offsets = [0, 0], sizes = [64, 128], strides = [1, 1]} : vector<64x256xf32> to vector<64x128xf32>
    %73 = vector.shape_cast %72 : vector<64x128xf32> to vector<1x8x8x128xf32>
    %74 = vector.extract_strided_slice %64 {offsets = [0, 128], sizes = [64, 128], strides = [1, 1]} : vector<64x256xf32> to vector<64x128xf32>
    %75 = vector.shape_cast %74 : vector<64x128xf32> to vector<1x8x8x128xf32>
    %76 = vector.extract_strided_slice %67 {offsets = [0, 0], sizes = [64, 128], strides = [1, 1]} : vector<64x256xf32> to vector<64x128xf32>
    %77 = vector.shape_cast %76 : vector<64x128xf32> to vector<1x8x8x128xf32>
    %78 = vector.extract_strided_slice %67 {offsets = [0, 128], sizes = [64, 128], strides = [1, 1]} : vector<64x256xf32> to vector<64x128xf32>
    %79 = vector.shape_cast %78 : vector<64x128xf32> to vector<1x8x8x128xf32>
    %c56 = arith.constant 56 : index
    %c0_43 = arith.constant 0 : index
    %80 = vector.load %arg4[%c56, %c0_43] : memref<1904x128xbf16, #tpu.memory_space<vmem>>, vector<1x128xbf16>
    %81 = vector.shape_cast %69 : vector<1x8x128xf32> to vector<1x8x1x128xf32>
    %82 = vector.broadcast %81 : vector<1x8x1x128xf32> to vector<1x8x8x128xf32>
    %83 = arith.addf %82, %73 : vector<1x8x8x128xf32>
    %84 = vector.shape_cast %71 : vector<1x8x128xf32> to vector<1x1x8x128xf32>
    %85 = vector.broadcast %84 : vector<1x1x8x128xf32> to vector<1x8x8x128xf32>
    %86 = arith.addf %83, %85 : vector<1x8x8x128xf32>
    %87 = arith.addf %86, %79 : vector<1x8x8x128xf32>
    %88 = arith.extf %80 : vector<1x128xbf16> to vector<1x128xf32>
    %89 = vector.shape_cast %88 : vector<1x128xf32> to vector<1x1x1x128xf32>
    %90 = vector.broadcast %89 : vector<1x1x1x128xf32> to vector<1x8x8x128xf32>
    %91 = arith.addf %87, %90 : vector<1x8x8x128xf32>
    %cst_44 = arith.constant 0.000000e+00 : f32
    %92 = vector.broadcast %cst_44 : f32 to vector<1x8x8x128xf32>
    %93 = arith.subf %92, %91 : vector<1x8x8x128xf32>
    %94 = math.exp %93 : vector<1x8x8x128xf32>
    %cst_45 = arith.constant 1.000000e+00 : f32
    %95 = vector.broadcast %cst_45 : f32 to vector<1x8x8x128xf32>
    %96 = arith.addf %95, %94 : vector<1x8x8x128xf32>
    %cst_46 = arith.constant 1.000000e+00 : f32
    %97 = vector.broadcast %cst_46 : f32 to vector<1x8x8x128xf32>
    %98 = arith.divf %97, %96 : vector<1x8x8x128xf32>
    %99 = vector.shape_cast %69 : vector<1x8x128xf32> to vector<1x1x8x128xf32>
    %100 = vector.broadcast %99 : vector<1x1x8x128xf32> to vector<1x8x8x128xf32>
    %101 = arith.addf %100, %77 : vector<1x8x8x128xf32>
    %102 = vector.shape_cast %71 : vector<1x8x128xf32> to vector<1x8x1x128xf32>
    %103 = vector.broadcast %102 : vector<1x8x1x128xf32> to vector<1x8x8x128xf32>
    %104 = arith.addf %101, %103 : vector<1x8x8x128xf32>
    %105 = arith.addf %104, %75 : vector<1x8x8x128xf32>
    %106 = arith.extf %80 : vector<1x128xbf16> to vector<1x128xf32>
    %107 = vector.shape_cast %106 : vector<1x128xf32> to vector<1x1x1x128xf32>
    %108 = vector.broadcast %107 : vector<1x1x1x128xf32> to vector<1x8x8x128xf32>
    %109 = arith.addf %105, %108 : vector<1x8x8x128xf32>
    %cst_47 = arith.constant 0.000000e+00 : f32
    %110 = vector.broadcast %cst_47 : f32 to vector<1x8x8x128xf32>
    %111 = arith.subf %110, %109 : vector<1x8x8x128xf32>
    %112 = math.exp %111 : vector<1x8x8x128xf32>
    %cst_48 = arith.constant 1.000000e+00 : f32
    %113 = vector.broadcast %cst_48 : f32 to vector<1x8x8x128xf32>
    %114 = arith.addf %113, %112 : vector<1x8x8x128xf32>
    %cst_49 = arith.constant 1.000000e+00 : f32
    %115 = vector.broadcast %cst_49 : f32 to vector<1x8x8x128xf32>
    %116 = arith.divf %115, %114 : vector<1x8x8x128xf32>
    %117 = arith.truncf %26 : vector<1x128xf32> to vector<1x128xbf16>
    %118 = arith.truncf %59 : vector<1x8x128xf32> to vector<1x8x128xbf16>
    %119 = arith.truncf %98 : vector<1x8x8x128xf32> to vector<1x8x8x128xbf16>
    %120 = arith.truncf %116 : vector<1x8x8x128xf32> to vector<1x8x8x128xbf16>
    %121 = vector.shape_cast %118 : vector<1x8x128xbf16> to vector<8x128xbf16>
    %cst_50 = arith.constant dense<0xFF80> : vector<1x128xbf16>
    %122 = vector.multi_reduction <maximumf>, %118, %cst_50 [1] : vector<1x8x128xbf16> to vector<1x128xbf16>
    %cst_51 = arith.constant dense<0x7F80> : vector<1x128xbf16>
    %123 = vector.multi_reduction <minimumf>, %118, %cst_51 [1] : vector<1x8x128xbf16> to vector<1x128xbf16>
    %c192 = arith.constant 192 : index
    %c0_52 = arith.constant 0 : index
    %124 = vector.load %arg4[%c192, %c0_52] : memref<1904x128xbf16, #tpu.memory_space<vmem>>, vector<128x128xbf16>
    %125 = vector.shape_cast %122 : vector<1x128xbf16> to vector<1x128xbf16>
    %126 = vector.broadcast %125 : vector<1x128xbf16> to vector<8x128xbf16>
    %cst_53 = arith.constant dense<0.000000e+00> : vector<8x128xf32>
    %127 = tpu.matmul %126, %124, %cst_53 {dimension_numbers = #tpu.dot_dimension_numbers<[1], [0], [0], [1], [0, 0, 1, 1], [], []>} : vector<8x128xbf16>, vector<128x128xbf16>, vector<8x128xf32> -> vector<8x128xf32>
    %128 = vector.extract_strided_slice %127 {offsets = [0, 0], sizes = [1, 128], strides = [1, 1]} : vector<8x128xf32> to vector<1x128xf32>
    %c320 = arith.constant 320 : index
    %c0_54 = arith.constant 0 : index
    %129 = vector.load %arg4[%c320, %c0_54] : memref<1904x128xbf16, #tpu.memory_space<vmem>>, vector<128x128xbf16>
    %130 = vector.shape_cast %123 : vector<1x128xbf16> to vector<1x128xbf16>
    %131 = vector.broadcast %130 : vector<1x128xbf16> to vector<8x128xbf16>
    %cst_55 = arith.constant dense<0.000000e+00> : vector<8x128xf32>
    %132 = tpu.matmul %131, %129, %cst_55 {dimension_numbers = #tpu.dot_dimension_numbers<[1], [0], [0], [1], [0, 0, 1, 1], [], []>} : vector<8x128xbf16>, vector<128x128xbf16>, vector<8x128xf32> -> vector<8x128xf32>
    %133 = vector.extract_strided_slice %132 {offsets = [0, 0], sizes = [1, 128], strides = [1, 1]} : vector<8x128xf32> to vector<1x128xf32>
    %134 = arith.addf %128, %133 : vector<1x128xf32>
    %c448 = arith.constant 448 : index
    %c0_56 = arith.constant 0 : index
    %135 = vector.load %arg4[%c448, %c0_56] : memref<1904x128xbf16, #tpu.memory_space<vmem>>, vector<1x128xbf16>
    %136 = arith.extf %135 : vector<1x128xbf16> to vector<1x128xf32>
    %137 = arith.addf %134, %136 : vector<1x128xf32>
    %c64 = arith.constant 64 : index
    %c0_57 = arith.constant 0 : index
    %138 = vector.load %arg4[%c64, %c0_57] : memref<1904x128xbf16, #tpu.memory_space<vmem>>, vector<128x128xbf16>
    %139 = vector.shape_cast %117 : vector<1x128xbf16> to vector<1x128xbf16>
    %140 = vector.broadcast %139 : vector<1x128xbf16> to vector<8x128xbf16>
    %cst_58 = arith.constant dense<0.000000e+00> : vector<8x128xf32>
    %141 = tpu.matmul %140, %138, %cst_58 {dimension_numbers = #tpu.dot_dimension_numbers<[1], [0], [0], [1], [0, 0, 1, 1], [], []>} : vector<8x128xbf16>, vector<128x128xbf16>, vector<8x128xf32> -> vector<8x128xf32>
    %142 = vector.extract_strided_slice %141 {offsets = [0, 0], sizes = [1, 128], strides = [1, 1]} : vector<8x128xf32> to vector<1x128xf32>
    %143 = arith.addf %137, %142 : vector<1x128xf32>
    %cst_59 = arith.constant 0.000000e+00 : f32
    %144 = vector.broadcast %cst_59 : f32 to vector<1x128xf32>
    %145 = arith.subf %144, %143 : vector<1x128xf32>
    %146 = math.exp %145 : vector<1x128xf32>
    %cst_60 = arith.constant 1.000000e+00 : f32
    %147 = vector.broadcast %cst_60 : f32 to vector<1x128xf32>
    %148 = arith.addf %147, %146 : vector<1x128xf32>
    %cst_61 = arith.constant 1.000000e+00 : f32
    %149 = vector.broadcast %cst_61 : f32 to vector<1x128xf32>
    %150 = arith.divf %149, %148 : vector<1x128xf32>
    %151 = tpu.iota {dimensions = array<i32: 1>} : vector<1x8x8x128xi32>
    %152 = tpu.iota {dimensions = array<i32: 2>} : vector<1x8x8x128xi32>
    %153 = arith.cmpi eq, %151, %152 : vector<1x8x8x128xi32>
    %cst_62 = arith.constant 0.000000e+00 : f32
    %154 = arith.truncf %cst_62 : f32 to bf16
    %155 = vector.broadcast %154 : bf16 to vector<1x8x8x128xbf16>
    %156 = arith.select %153, %155, %119 : vector<1x8x8x128xi1>, vector<1x8x8x128xbf16>
    %cst_63 = arith.constant dense<0xFF80> : vector<1x8x128xbf16>
    %157 = vector.multi_reduction <maximumf>, %156, %cst_63 [2] : vector<1x8x8x128xbf16> to vector<1x8x128xbf16>
    %cst_64 = arith.constant 1.000000e+00 : f32
    %158 = arith.truncf %cst_64 : f32 to bf16
    %159 = vector.broadcast %158 : bf16 to vector<1x8x8x128xbf16>
    %160 = arith.select %153, %159, %119 : vector<1x8x8x128xi1>, vector<1x8x8x128xbf16>
    %cst_65 = arith.constant dense<0x7F80> : vector<1x8x128xbf16>
    %161 = vector.multi_reduction <minimumf>, %160, %cst_65 [2] : vector<1x8x8x128xbf16> to vector<1x8x128xbf16>
    %c584 = arith.constant 584 : index
    %c0_66 = arith.constant 0 : index
    %162 = vector.load %arg4[%c584, %c0_66] : memref<1904x128xbf16, #tpu.memory_space<vmem>>, vector<128x128xbf16>
    %cst_67 = arith.constant dense<0.000000e+00> : vector<8x128xf32>
    %163 = tpu.matmul %121, %162, %cst_67 {dimension_numbers = #tpu.dot_dimension_numbers<[1], [0], [0], [1], [0, 0, 1, 1], [], []>} : vector<8x128xbf16>, vector<128x128xbf16>, vector<8x128xf32> -> vector<8x128xf32>
    %164 = vector.shape_cast %157 : vector<1x8x128xbf16> to vector<8x128xbf16>
    %c712 = arith.constant 712 : index
    %c0_68 = arith.constant 0 : index
    %165 = vector.load %arg4[%c712, %c0_68] : memref<1904x128xbf16, #tpu.memory_space<vmem>>, vector<128x128xbf16>
    %cst_69 = arith.constant dense<0.000000e+00> : vector<8x128xf32>
    %166 = tpu.matmul %164, %165, %cst_69 {dimension_numbers = #tpu.dot_dimension_numbers<[1], [0], [0], [1], [0, 0, 1, 1], [], []>} : vector<8x128xbf16>, vector<128x128xbf16>, vector<8x128xf32> -> vector<8x128xf32>
    %167 = arith.addf %163, %166 : vector<8x128xf32>
    %168 = vector.shape_cast %161 : vector<1x8x128xbf16> to vector<8x128xbf16>
    %c840 = arith.constant 840 : index
    %c0_70 = arith.constant 0 : index
    %169 = vector.load %arg4[%c840, %c0_70] : memref<1904x128xbf16, #tpu.memory_space<vmem>>, vector<128x128xbf16>
    %cst_71 = arith.constant dense<0.000000e+00> : vector<8x128xf32>
    %170 = tpu.matmul %168, %169, %cst_71 {dimension_numbers = #tpu.dot_dimension_numbers<[1], [0], [0], [1], [0, 0, 1, 1], [], []>} : vector<8x128xbf16>, vector<128x128xbf16>, vector<8x128xf32> -> vector<8x128xf32>
    %171 = arith.addf %167, %170 : vector<8x128xf32>
    %c968 = arith.constant 968 : index
    %c0_72 = arith.constant 0 : index
    %172 = vector.load %arg4[%c968, %c0_72] : memref<1904x128xbf16, #tpu.memory_space<vmem>>, vector<1x128xbf16>
    %173 = arith.extf %172 : vector<1x128xbf16> to vector<1x128xf32>
    %174 = vector.broadcast %173 : vector<1x128xf32> to vector<8x128xf32>
    %175 = arith.addf %171, %174 : vector<8x128xf32>
    %176 = vector.shape_cast %175 : vector<8x128xf32> to vector<1x8x128xf32>
    %c456 = arith.constant 456 : index
    %c0_73 = arith.constant 0 : index
    %177 = vector.load %arg4[%c456, %c0_73] : memref<1904x128xbf16, #tpu.memory_space<vmem>>, vector<128x128xbf16>
    %178 = vector.shape_cast %117 : vector<1x128xbf16> to vector<1x128xbf16>
    %179 = vector.broadcast %178 : vector<1x128xbf16> to vector<8x128xbf16>
    %cst_74 = arith.constant dense<0.000000e+00> : vector<8x128xf32>
    %180 = tpu.matmul %179, %177, %cst_74 {dimension_numbers = #tpu.dot_dimension_numbers<[1], [0], [0], [1], [0, 0, 1, 1], [], []>} : vector<8x128xbf16>, vector<128x128xbf16>, vector<8x128xf32> -> vector<8x128xf32>
    %181 = vector.extract_strided_slice %180 {offsets = [0, 0], sizes = [1, 128], strides = [1, 1]} : vector<8x128xf32> to vector<1x128xf32>
    %182 = vector.shape_cast %181 : vector<1x128xf32> to vector<1x1x128xf32>
    %183 = vector.broadcast %182 : vector<1x1x128xf32> to vector<1x8x128xf32>
    %184 = arith.addf %176, %183 : vector<1x8x128xf32>
    %cst_75 = arith.constant 0.000000e+00 : f32
    %185 = vector.broadcast %cst_75 : f32 to vector<1x8x128xf32>
    %186 = arith.subf %185, %184 : vector<1x8x128xf32>
    %187 = math.exp %186 : vector<1x8x128xf32>
    %cst_76 = arith.constant 1.000000e+00 : f32
    %188 = vector.broadcast %cst_76 : f32 to vector<1x8x128xf32>
    %189 = arith.addf %188, %187 : vector<1x8x128xf32>
    %cst_77 = arith.constant 1.000000e+00 : f32
    %190 = vector.broadcast %cst_77 : f32 to vector<1x8x128xf32>
    %191 = arith.divf %190, %189 : vector<1x8x128xf32>
    %c16_78 = arith.constant 16 : index
    %c0_79 = arith.constant 0 : index
    %192 = vector.load %arg5[%c16_78, %c0_79] : memref<528x256xbf16, #tpu.memory_space<vmem>>, vector<128x256xbf16>
    %cst_80 = arith.constant dense<0.000000e+00> : vector<8x256xf32>
    %193 = tpu.matmul %121, %192, %cst_80 {dimension_numbers = #tpu.dot_dimension_numbers<[1], [0], [0], [1], [0, 0, 1, 1], [], []>} : vector<8x128xbf16>, vector<128x256xbf16>, vector<8x256xf32> -> vector<8x256xf32>
    %194 = vector.shape_cast %119 : vector<1x8x8x128xbf16> to vector<64x128xbf16>
    %c144 = arith.constant 144 : index
    %c0_81 = arith.constant 0 : index
    %195 = vector.load %arg5[%c144, %c0_81] : memref<528x256xbf16, #tpu.memory_space<vmem>>, vector<128x256xbf16>
    %cst_82 = arith.constant dense<0.000000e+00> : vector<64x256xf32>
    %196 = tpu.matmul %194, %195, %cst_82 {dimension_numbers = #tpu.dot_dimension_numbers<[1], [0], [0], [1], [0, 0, 1, 1], [], []>} : vector<64x128xbf16>, vector<128x256xbf16>, vector<64x256xf32> -> vector<64x256xf32>
    %197 = vector.shape_cast %120 : vector<1x8x8x128xbf16> to vector<64x128xbf16>
    %c144_83 = arith.constant 144 : index
    %c0_84 = arith.constant 0 : index
    %198 = vector.load %arg5[%c144_83, %c0_84] : memref<528x256xbf16, #tpu.memory_space<vmem>>, vector<128x256xbf16>
    %cst_85 = arith.constant dense<0.000000e+00> : vector<64x256xf32>
    %199 = tpu.matmul %197, %198, %cst_85 {dimension_numbers = #tpu.dot_dimension_numbers<[1], [0], [0], [1], [0, 0, 1, 1], [], []>} : vector<64x128xbf16>, vector<128x256xbf16>, vector<64x256xf32> -> vector<64x256xf32>
    %200 = vector.extract_strided_slice %193 {offsets = [0, 0], sizes = [8, 128], strides = [1, 1]} : vector<8x256xf32> to vector<8x128xf32>
    %201 = vector.shape_cast %200 : vector<8x128xf32> to vector<1x8x128xf32>
    %202 = vector.extract_strided_slice %193 {offsets = [0, 128], sizes = [8, 128], strides = [1, 1]} : vector<8x256xf32> to vector<8x128xf32>
    %203 = vector.shape_cast %202 : vector<8x128xf32> to vector<1x8x128xf32>
    %204 = vector.extract_strided_slice %196 {offsets = [0, 0], sizes = [64, 128], strides = [1, 1]} : vector<64x256xf32> to vector<64x128xf32>
    %205 = vector.shape_cast %204 : vector<64x128xf32> to vector<1x8x8x128xf32>
    %206 = vector.extract_strided_slice %199 {offsets = [0, 128], sizes = [64, 128], strides = [1, 1]} : vector<64x256xf32> to vector<64x128xf32>
    %207 = vector.shape_cast %206 : vector<64x128xf32> to vector<1x8x8x128xf32>
    %c976 = arith.constant 976 : index
    %c0_86 = arith.constant 0 : index
    %208 = vector.load %arg4[%c976, %c0_86] : memref<1904x128xbf16, #tpu.memory_space<vmem>>, vector<1x128xbf16>
    %209 = vector.shape_cast %201 : vector<1x8x128xf32> to vector<1x8x1x128xf32>
    %210 = vector.broadcast %209 : vector<1x8x1x128xf32> to vector<1x8x8x128xf32>
    %211 = arith.addf %210, %205 : vector<1x8x8x128xf32>
    %212 = vector.shape_cast %203 : vector<1x8x128xf32> to vector<1x1x8x128xf32>
    %213 = vector.broadcast %212 : vector<1x1x8x128xf32> to vector<1x8x8x128xf32>
    %214 = arith.addf %211, %213 : vector<1x8x8x128xf32>
    %215 = arith.addf %214, %207 : vector<1x8x8x128xf32>
    %216 = arith.extf %208 : vector<1x128xbf16> to vector<1x128xf32>
    %217 = vector.shape_cast %216 : vector<1x128xf32> to vector<1x1x1x128xf32>
    %218 = vector.broadcast %217 : vector<1x1x1x128xf32> to vector<1x8x8x128xf32>
    %219 = arith.addf %215, %218 : vector<1x8x8x128xf32>
    %cst_87 = arith.constant 0.000000e+00 : f32
    %220 = vector.broadcast %cst_87 : f32 to vector<1x8x8x128xf32>
    %221 = arith.subf %220, %219 : vector<1x8x8x128xf32>
    %222 = math.exp %221 : vector<1x8x8x128xf32>
    %cst_88 = arith.constant 1.000000e+00 : f32
    %223 = vector.broadcast %cst_88 : f32 to vector<1x8x8x128xf32>
    %224 = arith.addf %223, %222 : vector<1x8x8x128xf32>
    %cst_89 = arith.constant 1.000000e+00 : f32
    %225 = vector.broadcast %cst_89 : f32 to vector<1x8x8x128xf32>
    %226 = arith.divf %225, %224 : vector<1x8x8x128xf32>
    %227 = arith.truncf %150 : vector<1x128xf32> to vector<1x128xbf16>
    %228 = arith.truncf %191 : vector<1x8x128xf32> to vector<1x8x128xbf16>
    %229 = arith.truncf %226 : vector<1x8x8x128xf32> to vector<1x8x8x128xbf16>
    %230 = vector.shape_cast %228 : vector<1x8x128xbf16> to vector<8x128xbf16>
    %cst_90 = arith.constant 0.000000e+00 : f32
    %231 = arith.truncf %cst_90 : f32 to bf16
    %232 = vector.broadcast %231 : bf16 to vector<1x8x8x128xbf16>
    %233 = arith.select %153, %232, %229 : vector<1x8x8x128xi1>, vector<1x8x8x128xbf16>
    %cst_91 = arith.constant dense<0xFF80> : vector<1x8x128xbf16>
    %234 = vector.multi_reduction <maximumf>, %233, %cst_91 [2] : vector<1x8x8x128xbf16> to vector<1x8x128xbf16>
    %cst_92 = arith.constant 1.000000e+00 : f32
    %235 = arith.truncf %cst_92 : f32 to bf16
    %236 = vector.broadcast %235 : bf16 to vector<1x8x8x128xbf16>
    %237 = arith.select %153, %236, %229 : vector<1x8x8x128xi1>, vector<1x8x8x128xbf16>
    %cst_93 = arith.constant dense<0x7F80> : vector<1x8x128xbf16>
    %238 = vector.multi_reduction <minimumf>, %237, %cst_93 [2] : vector<1x8x8x128xbf16> to vector<1x8x128xbf16>
    %c1504 = arith.constant 1504 : index
    %c0_94 = arith.constant 0 : index
    %239 = vector.load %arg4[%c1504, %c0_94] : memref<1904x128xbf16, #tpu.memory_space<vmem>>, vector<128x128xbf16>
    %cst_95 = arith.constant dense<0.000000e+00> : vector<8x128xf32>
    %240 = tpu.matmul %230, %239, %cst_95 {dimension_numbers = #tpu.dot_dimension_numbers<[1], [0], [0], [1], [0, 0, 1, 1], [], []>} : vector<8x128xbf16>, vector<128x128xbf16>, vector<8x128xf32> -> vector<8x128xf32>
    %241 = vector.shape_cast %234 : vector<1x8x128xbf16> to vector<8x128xbf16>
    %c1632 = arith.constant 1632 : index
    %c0_96 = arith.constant 0 : index
    %242 = vector.load %arg4[%c1632, %c0_96] : memref<1904x128xbf16, #tpu.memory_space<vmem>>, vector<128x128xbf16>
    %cst_97 = arith.constant dense<0.000000e+00> : vector<8x128xf32>
    %243 = tpu.matmul %241, %242, %cst_97 {dimension_numbers = #tpu.dot_dimension_numbers<[1], [0], [0], [1], [0, 0, 1, 1], [], []>} : vector<8x128xbf16>, vector<128x128xbf16>, vector<8x128xf32> -> vector<8x128xf32>
    %244 = arith.addf %240, %243 : vector<8x128xf32>
    %245 = vector.shape_cast %238 : vector<1x8x128xbf16> to vector<8x128xbf16>
    %c1760 = arith.constant 1760 : index
    %c0_98 = arith.constant 0 : index
    %246 = vector.load %arg4[%c1760, %c0_98] : memref<1904x128xbf16, #tpu.memory_space<vmem>>, vector<128x128xbf16>
    %cst_99 = arith.constant dense<0.000000e+00> : vector<8x128xf32>
    %247 = tpu.matmul %245, %246, %cst_99 {dimension_numbers = #tpu.dot_dimension_numbers<[1], [0], [0], [1], [0, 0, 1, 1], [], []>} : vector<8x128xbf16>, vector<128x128xbf16>, vector<8x128xf32> -> vector<8x128xf32>
    %248 = arith.addf %244, %247 : vector<8x128xf32>
    %c1888 = arith.constant 1888 : index
    %c0_100 = arith.constant 0 : index
    %249 = vector.load %arg4[%c1888, %c0_100] : memref<1904x128xbf16, #tpu.memory_space<vmem>>, vector<1x128xbf16>
    %250 = arith.extf %249 : vector<1x128xbf16> to vector<1x128xf32>
    %251 = vector.broadcast %250 : vector<1x128xf32> to vector<8x128xf32>
    %252 = arith.addf %248, %251 : vector<8x128xf32>
    %253 = vector.shape_cast %252 : vector<8x128xf32> to vector<1x8x128xf32>
    %c1376 = arith.constant 1376 : index
    %c0_101 = arith.constant 0 : index
    %254 = vector.load %arg4[%c1376, %c0_101] : memref<1904x128xbf16, #tpu.memory_space<vmem>>, vector<128x128xbf16>
    %255 = vector.shape_cast %227 : vector<1x128xbf16> to vector<1x128xbf16>
    %256 = vector.broadcast %255 : vector<1x128xbf16> to vector<8x128xbf16>
    %cst_102 = arith.constant dense<0.000000e+00> : vector<8x128xf32>
    %257 = tpu.matmul %256, %254, %cst_102 {dimension_numbers = #tpu.dot_dimension_numbers<[1], [0], [0], [1], [0, 0, 1, 1], [], []>} : vector<8x128xbf16>, vector<128x128xbf16>, vector<8x128xf32> -> vector<8x128xf32>
    %258 = vector.extract_strided_slice %257 {offsets = [0, 0], sizes = [1, 128], strides = [1, 1]} : vector<8x128xf32> to vector<1x128xf32>
    %259 = vector.shape_cast %258 : vector<1x128xf32> to vector<1x1x128xf32>
    %260 = vector.broadcast %259 : vector<1x1x128xf32> to vector<1x8x128xf32>
    %261 = arith.addf %253, %260 : vector<1x8x128xf32>
    %cst_103 = arith.constant 0.000000e+00 : f32
    %262 = vector.broadcast %cst_103 : f32 to vector<1x8x128xf32>
    %263 = arith.subf %262, %261 : vector<1x8x128xf32>
    %264 = math.exp %263 : vector<1x8x128xf32>
    %cst_104 = arith.constant 1.000000e+00 : f32
    %265 = vector.broadcast %cst_104 : f32 to vector<1x8x128xf32>
    %266 = arith.addf %265, %264 : vector<1x8x128xf32>
    %cst_105 = arith.constant 1.000000e+00 : f32
    %267 = vector.broadcast %cst_105 : f32 to vector<1x8x128xf32>
    %268 = arith.divf %267, %266 : vector<1x8x128xf32>
    %c0_106 = arith.constant 0 : index
    %c0_107 = arith.constant 0 : index
    %c0_108 = arith.constant 0 : index
    %269 = vector.load %arg6[%c0_106, %c0_107, %c0_108] : memref<1x8x128xf32, #tpu.memory_space<vmem>>, vector<1x8x128xf32>
    tpu.vector_store %arg6[%c0_106, %c0_107, %c0_108], %268 {strides = array<i32>} : memref<1x8x128xf32, #tpu.memory_space<vmem>>, vector<1x8x128xf32>,
    return
  }
  func.func @transform_0(%arg0: i32) -> (i32, i32, i32) {
    %c0_i32 = arith.constant 0 : i32
    %c0_i32_0 = arith.constant 0 : i32
    %c0_i32_1 = arith.constant 0 : i32
    return %arg0, %c0_i32, %c0_i32_0 : i32, i32, i32
  }
  func.func @transform_1(%arg0: i32) -> (i32, i32, i32, i32) {
    %c0_i32 = arith.constant 0 : i32
    %c0_i32_0 = arith.constant 0 : i32
    %c0_i32_1 = arith.constant 0 : i32
    %c0_i32_2 = arith.constant 0 : i32
    return %arg0, %c0_i32, %c0_i32_0, %c0_i32_1 : i32, i32, i32, i32
  }
  func.func @transform_2(%arg0: i32) -> (i32, i32, i32, i32) {
    %c0_i32 = arith.constant 0 : i32
    %c0_i32_0 = arith.constant 0 : i32
    %c0_i32_1 = arith.constant 0 : i32
    %c0_i32_2 = arith.constant 0 : i32
    return %arg0, %c0_i32, %c0_i32_0, %c0_i32_1 : i32, i32, i32, i32
  }
  func.func @transform_3(%arg0: i32) -> (i32, i32) {
    %c0_i32 = arith.constant 0 : i32
    %c0_i32_0 = arith.constant 0 : i32
    %c0_i32_1 = arith.constant 0 : i32
    return %c0_i32, %c0_i32_0 : i32, i32
  }
  func.func @transform_4(%arg0: i32) -> (i32, i32) {
    %c0_i32 = arith.constant 0 : i32
    %c0_i32_0 = arith.constant 0 : i32
    %c0_i32_1 = arith.constant 0 : i32
    return %c0_i32, %c0_i32_0 : i32, i32
  }
  func.func @transform_5(%arg0: i32) -> (i32, i32, i32) {
    %c0_i32 = arith.constant 0 : i32
    %c0_i32_0 = arith.constant 0 : i32
    %c0_i32_1 = arith.constant 0 : i32
    return %arg0, %c0_i32, %c0_i32_0 : i32, i32, i32
  }
}

</mosaic_0001>

<bundles_post_ra>
// kernel: _lambda_.1
= control target key start
LH: loop header
LB: loop body
LE: loop exit
PB: predicated region body
PF: predicated region fallthrough
CT: control target
= control target key end

     0   :  { %10 = vsyncpa [#allocation3], 0  ;;  %s5830_s0 = inlined_call_operand.vmem [shape: bf16[2,8,4], index: 0, kind: input, shape index: {}]   ;;  %s5831_s1 = inlined_call_operand.vmem [shape: bf16[2,8,8,6], index: 1, kind: input, shape index: {}]   ;;  %s5832_s2 = inlined_call_operand.vmem [shape: bf16[2,8,8,6], index: 2, kind: input, shape index: {}]   ;;  %s5833_s3 = inlined_call_operand.hbm [shape: bf16[1904,128], index: 3, kind: input, shape index: {}]   ;;  %s5834_s4 = inlined_call_operand.hbm [shape: bf16[528,256], index: 4, kind: input, shape index: {}]   ;;  %s5835_s5 = inlined_call_operand.hbm [shape: f32[2,8,128], index: 5, kind: output, shape index: {}]  }
   0x1   :  { %11 = vsyncpa [#allocation6], 0 }
   0x2   :  { %12 = vsyncpa [#allocation4], 0 }
   0x3   :  { %14 = vsyncpa [#allocation4 + $0x1], 0  ;;  %s4461_s18 = smov 0   ;;  %s4463_s19 = smov 0  }
   0x4   :  { %s4465_s20 = smov 0   ;;  %s4467_s21 = smov 0  }
   0x5 LB: > { %s4482_s22 = sadd.s32 4294967295, %s4423_s21   ;;  %s3430_s23 = sadd.s32 4294967294, %s4423_s21   ;;  %s4423_s21 = sphi %s4467_s21, %s5960_s21   ;;  %s4419_s20 = sphi %s4465_s20, %s5959_s20   ;;  %s4415_s19 = sphi %s4463_s19, %s5958_s19   ;;  %s4411_s18 = sphi %s4461_s18, %s5957_s18  }
   0x6   : > { %s4486_s24 = sadd.s32 1, %s4423_s21   ;;  %s147_s25 = sadd.s32 1, %s4419_s20 }
   0x7   : > { %s144_s26 = ssub.s32 %s4423_s21, %s4486_s24  ;;  %p157_p0 = scmp.ne.s32.totalorder %s4419_s20, %s4415_s19 }
   0x8   : > { %p145_p1 = scmp.eq.s32.totalorder %s144_s26, 0  ;;  %p158_p2 = scmp.eq.s32.totalorder %s4482_s22, 1 }
   0x9   : > { %p163_p3 = scmp.ne.s32.totalorder %s4415_s19, %s4411_s18  ;;  %p164_p4 = scmp.eq.s32.totalorder %s3430_s23, 1 }
   0xa   : > { %s4497_s27 = scalar_select %p145_p1, %s4419_s20, %s147_s25  }
   0xb   : > { %p4499_p5 = por %p158_p2, %p157_p0  ;;  %p4503_p6 = por %p164_p4, %p163_p3 }
   0xc   : > { %p3431_p7 = scmp.ge.s32.totalorder %s4423_s21, 1  ;;  %p171_p8 = scmp.lt.s32.totalorder %s4423_s21, 3 }
   0xd   : > { %p4134_p9 = scmp.eq.s32.totalorder %s4482_s22, 0  ;;  %s182_s8 = sshll.u32 %s5833_s3, 4  ;;  %s183_s8 = int_to_ptr.hbm [resolvable:$true] %s182_s8 }
   0xe   : > { %p4510_p10 = pnand %p3431_p7, %p171_p8  ;;  %s4425_s9 = smov [#allocation2]  }
   0xf   : > { %s184_s10 = sshll.u32 %s4425_s9, 4  ;;  %s196_s13 = sshll.u32 %s5834_s4, 4  ;;  %s185_s10 = int_to_ptr.vmem [resolvable:$true] %s184_s10  ;;  %s197_s13 = int_to_ptr.hbm [resolvable:$true] %s196_s13 }
  0x10   : > { %p4123_p11 = pneg %p4510_p10  ;;  %s4426_s14 = smov 64  }
  0x11   : > { %s4427_s15 = smov 4   ;;  %s4428_s16 = smov [#allocation5]  }
  0x12   : > { %p4124_p12 = pnand %p4134_p9, %p4123_p11  ;;  %s198_s17 = sshll.u32 %s4428_s16, 4  ;;  %s199_s17 = int_to_ptr.vmem [resolvable:$true] %s198_s17 }
  0x13   : > { %s4429_s23 = smov 128   ;;  %s4430_s25 = smov 8  }
  0x14   : > { %4126 = dma.hbm_to_vmem [thread:$0]  (!%p4124_p12), %s183_s8, 15232, %s185_s10, [#allocation3], %s4426_s14, %s4426_s14, %s4427_s15  }
  0x15   : > { %4129 = dma.hbm_to_vmem [thread:$0]  (!%p4124_p12), %s197_s13, 8448, %s199_s17, [#allocation6], %s4429_s23, %s4429_s23, %s4430_s25  }
  0x16   : > { %237 = sbr.rel (%p4510_p10) target bundleno = 861 (0x35d), region = 40 }
  0x1b   : > { %4398 = dma.done.wait (%p4134_p9), [#allocation3], 15232  }
  0x1c   : > { %4400 = vsyncadd (%p4134_p9), [#allocation3], 4294952064 }
  0x1d   : > { %4402 = dma.done.wait (%p4134_p9), [#allocation6], 8448  }
  0x1e   : > { %4404 = vsyncadd (%p4134_p9), [#allocation6], 4294958848  ;;  %p280_p13 = scmp.lt.s32.totalorder %s4482_s22, 1  ;;  %v395_v0 = vlaneseq  ;;  %vm5837_vm0 = vcmask 1041408   ;;  %vm5836_vm2 = vcmask 31744   ;;  %vm5838_vm3 = vcmask 1042432  }
  0x1f   : > { %v574_v3 = vld [vmem:[#allocation2 + $0xc] sm:$0x3]  ;;  %v352_v5 = vld [vmem:[#allocation2 + $0x4] sm:$0x3]  ;;  %v331_v10 = vld [vmem:[#allocation2] sm:$0x3] }
  0x20   : > { %s4536_s26 = scalar_select %p280_p13, %s4482_s22, 1  ;;  %v4538_v1 = vshrl.u32 %v395_v0, 7  ;;  %v639_v6 = vsel %vm5837_vm0, %v574_v3, 0  ;;  %v357_v8 = vsel %vm5837_vm0, %v352_v5, 0  ;;  %v4568_v9 = vld [vmem:[#allocation5 + $0x8] sm:$0x77] }
  0x21   : > { %vm429_vm11 = vcmask 48128   ;;  %648 = vmatpush.bf16.msra.mxu3 %v639_v6  ;;  %366 = vmatpush.bf16.msra.mxu1 %v357_v8  ;;  %v790_v12 = vunpack.c.l.b16 %v4568_v9  ;;  %v337_v13 = vsel %vm5837_vm0, %v331_v10, 0  ;;  %v575_v14 = vld [vmem:[#allocation2 + $0x10] sm:$0x7]  ;;  %v4579_v15 = vld [vmem:[#allocation5] sm:$0x33]  ;;  %v791_v29 = vunpack.c.h.b16 %v4568_v9 }
  0x22   : > { %s3439_s30 = sshll.u32 %s4536_s26, 2  ;;  %s3983_s6 = sshll.u32 %s4536_s26, 5  ;;  %vm397_vm1 = vcmp.eq.s32.totalorder %v4538_v1, 0  ;;  %vm398_vm4 = vcmp.eq.s32.totalorder %v4538_v1, 1  ;;  %vm399_vm5 = vcmp.eq.s32.totalorder %v4538_v1, 2  ;;  %vm400_vm6 = vcmp.eq.s32.totalorder %v4538_v1, 3  ;;  %346 = vmatpush.bf16.msra.mxu0 %v337_v13 }
  0x23   : > { %s283_s9 = scalar_lea.vmem %s5830_s0, %s3439_s30  ;;  %vm401_vm7 = vcmp.eq.s32.totalorder %v4538_v1, 4  ;;  %vm402_vm8 = vcmp.eq.s32.totalorder %v4538_v1, 5  ;;  %vm403_vm9 = vcmp.eq.s32.totalorder %v4538_v1, 6  ;;  %vm4552_vm10 = vmpackc.low %vm397_vm1, %vm397_vm1  ;;  %s4561_s12 = scalar_lea.vmem %s5831_s1, %s3983_s6  ;;  %vm404_vm13 = vcmp.eq.s32.totalorder %v4538_v1, 7 }
  0x24   : > { %v4563_v4 = vld [vmem:[%s283_s9] sm:$0xf]  ;;  %vm4573_vm12 = vmpackc.low %vm398_vm4, %vm398_vm4  ;;  %v620_v19 = vsel %vm5838_vm3, %v575_v14, 0  ;;  %v732_v20 = vunpack.c.l.b16 %v4579_v15  ;;  %v792_v24 = vpack.c.b16 %v790_v12, %v790_v12  ;;  %v4604_v26 = vld [vmem:[%s4561_s12 + $0x4] sm:$0xf]  ;;  %v5865_v48 = vmov 0  ;;  %s4752_s15 = scalar_lea.vmem %s5832_s2, %s3983_s6 }
  0x25   : > { %v313_v7 = vunpack.c.l.bf16 %v4563_v4  ;;  %vm4585_vm14 = vmpackc.low %vm399_vm5, %vm399_vm5  ;;  %v4594_v21 = vld [vmem:[%s4561_s12] sm:$0xf]  ;;  %629 = vmatpush.bf16.msra.mxu2 %v620_v19  ;;  %v4607_v27 = vld [vmem:[%s4561_s12 + $0x8] sm:$0xf]  ;;  %3447 = vmatmul.msk.bf16.vlgmr.msra.gmra.mxu3 %vm5836_vm2, %v4563_v4  ;;  %v414_v43 = vsel %vm4573_vm12, 0, %v4604_v26  ;;  %s277_s16 = sand.u32 1, %s4415_s19  }
  0x26   : > { %vm4599_vm15 = vmpackc.low %vm400_vm6, %vm400_vm6  ;;  %v734_v30 = vpack.c.b16 %v732_v20, %v732_v20  ;;  %v4620_v31 = vld [vmem:[%s4561_s12 + $0xc] sm:$0xf]  ;;  %v4623_v32 = vld [vmem:[%s4561_s12 + $0x10] sm:$0xf]  ;;  %v4629_v35 = vsel %vm5838_vm3, %v792_v24, 0  ;;  %v413_v40 = vsel %vm4552_vm10, 0, %v4594_v21  ;;  %v422_v54 = vunpack.c.l.bf16 %v414_v43 }
  0x27   : > { %v323_v17 = vsel %vm5836_vm2, %v313_v7, inf  ;;  %v315_v18 = vsel %vm5836_vm2, %v313_v7, -inf  ;;  %vm4612_vm1 = vmpackc.low %vm401_vm7, %vm401_vm7  ;;  %v4626_v33 = vld [vmem:[%s4561_s12 + $0x14] sm:$0xf]  ;;  %v4632_v37 = vld [vmem:[%s4561_s12 + $0x18] sm:$0xf]  ;;  %819 = vmatpush.bf16.msrb.mxu3 %v4629_v35  ;;  %v421_v53 = vunpack.c.l.bf16 %v413_v40 }
  0x28   : > { %v324_v23 = vrot.slane %v323_v17, 4  ;;  %v316_v25 = vrot.slane %v315_v18, 4  ;;  %v4635_v38 = vld [vmem:[%s4561_s12 + $0x1c] sm:$0xf]  ;;  %vm4640_vm4 = vmpackc.low %vm402_vm8, %vm402_vm8  ;;  %v737_v41 = vsel %vm5837_vm0, %v734_v30, 0  ;;  %v415_v44 = vsel %vm4585_vm14, 0, %v4607_v27 }
  0x29   : > { %vm4652_vm5 = vmpackc.low %vm403_vm9, %vm403_vm9  ;;  %v416_v45 = vsel %vm4599_vm15, 0, %v4620_v31  ;;  %749 = vmatpush.bf16.msrb.mxu1 %v737_v41  ;;  %v417_v49 = vsel %vm4612_vm1, 0, %v4623_v32  ;;  %v418_v50 = vsel %vm4640_vm4, 0, %v4626_v33  ;;  %v423_v57 = vunpack.c.l.bf16 %v415_v44  ;;  %s3438_s17 = sshll.u32 %s277_s16, 3  ;;  %s3980_s23 = sshll.u32 %s4482_s22, 3 }
  0x2a   : > { %v325_v34 = vmin.f32 %v323_v17, %v324_v23  ;;  %v317_v36 = vmax.f32 %v315_v18, %v316_v25  ;;  %vm4668_vm6 = vmpackc.low %vm404_vm13, %vm404_vm13  ;;  %v419_v51 = vsel %vm4652_vm5, 0, %v4632_v37  ;;  %v424_v58 = vunpack.c.l.bf16 %v416_v45  ;;  %s3320_s30 = scalar_lea.hbm %s5835_s5, %s3980_s23  ;;  %s279_s6 = scalar_lea.vmem [#allocation7], %s3438_s17 }
  0x2b   : > { %v5866_v48 = vsel %vm4668_vm6, 4294967295, %v5865_v48  ;;  %v420_v52 = vsel %vm4668_vm6, 0, %v4635_v38  ;;  %v425_v59 = vunpack.c.l.bf16 %v417_v49  ;;  %v426_v60 = vunpack.c.l.bf16 %v418_v50  ;;  %s3322_s7 = sshll.u32 %s279_s6, 4  ;;  %s3324_s8 = sshll.u32 %s3320_s30, 4  ;;  %s3323_s7 = int_to_ptr.vmem [resolvable:$true] %s3322_s7  ;;  %s3325_s8 = int_to_ptr.hbm [resolvable:$true] %s3324_s8 }
  0x2c   : > { %v326_v46 = vrot.slane %v325_v34, 2  ;;  %v318_v47 = vrot.slane %v317_v36, 2  ;;  %v427_v61 = vunpack.c.l.bf16 %v419_v51  ;;  %v428_v62 = vunpack.c.l.bf16 %v420_v52  ;;  %s3310_s22 = scalar_lea.sflag [#allocation4], %s277_s16  ;;  %s4367_s9 = sshra.s32 %s3325_s8, 4  ;;  %s4368_s9 = int_to_ptr.hbm [resolvable:$true] %s4367_s9 }
  0x2d   : > { %v430_v1 = vsel %vm429_vm11, %v421_v53, -inf  ;;  %v437_v3 = vsel %vm429_vm11, %v422_v54, -inf  ;;  %v444_v7 = vsel %vm429_vm11, %v423_v57, -inf  ;;  %v451_v8 = vsel %vm429_vm11, %v424_v58, -inf  ;;  %s4369_s10 = scalar_lea.hbm %s4368_s9, 8  ;;  %s4373_s13 = scalar_lea.hbm %s5835_s5, 16 }
  0x2e   : > { %v327_v55 = vmin.f32 %v325_v34, %v326_v46  ;;  %v319_v56 = vmax.f32 %v317_v36, %v318_v47  ;;  %v431_v5 = vrot.slane %v430_v1, 4  ;;  %v438_v6 = vrot.slane %v437_v3, 4  ;;  %v4691_v34 = vld [vmem:[%s4561_s12] sm:$0xff]  ;;  %p4370_p0 = scmp.ne.s32.totalorder %s4368_s9, %s4369_s10  ;;  %p4374_p3 = scmp.lt.s32.totalorder %s4368_s9, %s5835_s5 }
  0x2f   : > { %v445_v13 = vrot.slane %v444_v7, 4  ;;  %v452_v14 = vrot.slane %v451_v8, 4  ;;  %v458_v19 = vsel %vm429_vm11, %v425_v59, -inf  ;;  %v465_v20 = vsel %vm429_vm11, %v426_v60, -inf  ;;  %p4375_p4 = scmp.lt.s32.totalorder %s4373_s13, %s4369_s10 }
  0x30   : > { %v328_v63 = vrot.slane %v327_v55, 1  ;;  %v320_v0 = vrot.slane %v319_v56, 1  ;;  %v432_v17 = vmax.f32 %v430_v1, %v431_v5  ;;  %v439_v18 = vmax.f32 %v437_v3, %v438_v6  ;;  %p4371_p1 = pnand %p4370_p0, %p4499_p5 }
  0x31   : > { %v446_v25 = vmax.f32 %v444_v7, %v445_v13  ;;  %v453_v30 = vmax.f32 %v451_v8, %v452_v14  ;;  %v459_v41 = vrot.slane %v458_v19, 4  ;;  %v466_v43 = vrot.slane %v465_v20, 4  ;;  %p4376_p7 = por %p4375_p4, %p4374_p3 }
  0x32   : > { %v329_v10 = vmin.f32 %v327_v55, %v328_v63  ;;  %v321_v12 = vmax.f32 %v319_v56, %v320_v0  ;;  %v433_v36 = vrot.slane %v432_v17, 2  ;;  %v440_v40 = vrot.slane %v439_v18, 2  ;;  %p4372_p2 = pneg %p4371_p1 }
  0x33   : > { %v447_v44 = vrot.slane %v446_v25, 2  ;;  %v454_v45 = vrot.slane %v453_v30, 2  ;;  %v472_v46 = vsel %vm429_vm11, %v427_v61, -inf  ;;  %v479_v47 = vsel %vm429_vm11, %v428_v62, -inf }
  0x34   : > { %v330_v23 = vpack.c.bf16 %v329_v10, %v329_v10  ;;  %v322_v24 = vpack.c.bf16 %v321_v12, %v321_v12  ;;  %v434_v49 = vmax.f32 %v432_v17, %v433_v36  ;;  %v441_v50 = vmax.f32 %v439_v18, %v440_v40  ;;  %p4377_p8 = pnand %p4376_p7, %p4372_p2 }
  0x35   : > { %v460_v51 = vmax.f32 %v458_v19, %v459_v41  ;;  %v467_v52 = vmax.f32 %v465_v20, %v466_v43  ;;  %v448_v53 = vmax.f32 %v446_v25, %v447_v44  ;;  %v455_v54 = vmax.f32 %v453_v30, %v454_v45  ;;  %3467 = vmatmul.msk.bf16.vlgmr.msrb.gmra.mxu3 %vm429_vm11, %v4691_v34 }
  0x36   : > { %3445 = vmatmul.msk.bf16.vlgmr.msra.gmra.mxu1 %vm5836_vm2, %v330_v23  ;;  %3444 = vmatmul.msk.bf16.vlgmr.msra.gmra.mxu0 %vm5836_vm2, %v322_v24  ;;  %v473_v55 = vrot.slane %v472_v46, 4  ;;  %v480_v56 = vrot.slane %v479_v47, 4  ;;  %v435_v57 = vrot.slane %v434_v49, 1  ;;  %v442_v58 = vrot.slane %v441_v50, 1 }
  0x37   : > { %909 = vmatpush.bf16.msra.mxu1 %v4629_v35  ;;  %v461_v59 = vrot.slane %v460_v51, 2  ;;  %v468_v60 = vrot.slane %v467_v52, 2  ;;  %v449_v61 = vrot.slane %v448_v53, 1  ;;  %v456_v63 = vrot.slane %v455_v54, 1 }
  0x38   : > { %v474_v62 = vmax.f32 %v472_v46, %v473_v55  ;;  %v481_v0 = vmax.f32 %v479_v47, %v480_v56  ;;  %v436_v1 = vmax.f32 %v434_v49, %v435_v57  ;;  %v443_v3 = vmax.f32 %v441_v50, %v442_v58 }
  0x39   : > { %v462_v5 = vmax.f32 %v460_v51, %v461_v59  ;;  %v469_v6 = vmax.f32 %v467_v52, %v468_v60  ;;  %v450_v35 = vmax.f32 %v448_v53, %v449_v61  ;;  %v457_v7 = vmax.f32 %v455_v54, %v456_v63  ;;  %v4729_v60 = vld [vmem:[%s4561_s12 + $0x8] sm:$0xff] }
  0x3a   : > { %v475_v8 = vrot.slane %v474_v62, 2  ;;  %v482_v10 = vrot.slane %v481_v0, 2  ;;  %v486_v14 = vpack.c.bf16 %v436_v1, %v436_v1  ;;  %v487_v17 = vpack.c.bf16 %v443_v3, %v443_v3 }
  0x3b   : > { %v463_v12 = vrot.slane %v462_v5, 1  ;;  %v470_v13 = vrot.slane %v469_v6, 1  ;;  %v488_v20 = vpack.c.bf16 %v450_v35, %v450_v35  ;;  %v489_v23 = vpack.c.bf16 %v457_v7, %v457_v7 }
  0x3c   : > { %v476_v18 = vmax.f32 %v474_v62, %v475_v8  ;;  %v483_v19 = vmax.f32 %v481_v0, %v482_v10  ;;  %v494_v30 = vsel %vm4552_vm10, 1065369472, %v4594_v21  ;;  %v495_v36 = vsel %vm4573_vm12, 1065369472, %v4604_v26 }
  0x3d   : > { %v464_v24 = vmax.f32 %v462_v5, %v463_v12  ;;  %v471_v25 = vmax.f32 %v469_v6, %v470_v13  ;;  %v496_v43 = vsel %vm4585_vm14, 1065369472, %v4607_v27  ;;  %v497_v44 = vsel %vm4599_vm15, 1065369472, %v4620_v31  ;;  %v654_v12 = vld [vmem:[#allocation2 + $0x14] sm:$0x7] }
  0x3e   : > { %v477_v40 = vrot.slane %v476_v18, 1  ;;  %v484_v41 = vrot.slane %v483_v19, 1  ;;  %v498_v21 = vsel %vm4612_vm1, 1065369472, %v4623_v32  ;;  %v499_v26 = vsel %vm4640_vm4, 1065369472, %v4626_v33 }
  0x3f   : > { %v490_v45 = vpack.c.bf16 %v464_v24, %v464_v24  ;;  %v491_v46 = vpack.c.bf16 %v471_v25, %v471_v25  ;;  %v500_v27 = vsel %vm4652_vm5, 1065369472, %v4632_v37  ;;  %v501_v31 = vsel %vm4668_vm6, 1065369472, %v4635_v38 }
  0x40   : > { %v478_v47 = vmax.f32 %v476_v18, %v477_v40  ;;  %v485_v49 = vmax.f32 %v483_v19, %v484_v41  ;;  %v502_v50 = vunpack.c.l.bf16 %v494_v30  ;;  %v503_v51 = vunpack.c.l.bf16 %v495_v36 }
  0x41   : > { %v504_v52 = vunpack.c.l.bf16 %v496_v43  ;;  %v505_v53 = vunpack.c.l.bf16 %v497_v44  ;;  %v506_v55 = vunpack.c.l.bf16 %v498_v21  ;;  %v507_v56 = vunpack.c.l.bf16 %v499_v26 }
  0x42   : > { %v492_v32 = vpack.c.bf16 %v478_v47, %v478_v47  ;;  %v493_v54 = vpack.c.bf16 %v485_v49, %v485_v49  ;;  %v4724_v33 = vunpack.c.l.bf16 %v500_v27  ;;  %v4726_v57 = vunpack.c.l.bf16 %v501_v31 }
  0x43   : > { %v584_v58 = vperm.slane %v486_v14, 0  ;;  %v585_v59 = vperm.slane %v487_v17, 0  ;;  %v586_v37 = vperm.slane %v488_v20, 0  ;;  %v587_v61 = vperm.slane %v489_v23, 0 }
  0x44   : > { %v588_v63 = vperm.slane %v490_v45, 0  ;;  %v589_v38 = vperm.slane %v491_v46, 0  ;;  %v590_v62 = vperm.slane %v492_v32, 0  ;;  %v591_v0 = vperm.slane %v493_v54, 0 }
  0x45   : > { %v592_v1 = vunpack.c.l.b16 %v584_v58  ;;  %v593_v3 = vunpack.c.l.b16 %v585_v59  ;;  %v594_v5 = vunpack.c.l.b16 %v586_v37  ;;  %v595_v6 = vunpack.c.l.b16 %v587_v61  ;;  %3468 = vmatmul.msk.bf16.gmra.mxu3 %vm429_vm11, %v4729_v60  ;;  %v4759_v58 = vld [vmem:[%s4752_s15] sm:$0xff] }
  0x46   : > { %3449 = vmatmul.msk.bf16.vlgmr.msrb.gmra.mxu1 %vm5836_vm2, %v4563_v4  ;;  %v596_v35 = vunpack.c.l.b16 %v588_v63  ;;  %v597_v7 = vunpack.c.l.b16 %v589_v38  ;;  %v598_v8 = vunpack.c.l.b16 %v590_v62  ;;  %v599_v10 = vunpack.c.l.b16 %v591_v0 }
  0x47   : > { %vm5841_vm7 = vcmask 1041409   ;;  %vm5847_vm8 = vcmask 1042434   ;;  %vm5846_vm9 = vcmask 1043459   ;;  %vm5845_vm13 = vcmask 1044484  }
  0x48   : > { %v601_v13 = vsel %vm5841_vm7, %v593_v3, %v592_v1  ;;  %vm5844_vm2 = vcmask 1045509   ;;  %vm5843_vm0 = vcmask 1046534   ;;  %vm5842_vm3 = vcmask 1047559  }
  0x49   : > { %v603_v14 = vsel %vm5847_vm8, %v594_v5, %v601_v13  ;;  %v733_v17 = vunpack.c.h.b16 %v4579_v15  ;;  %vm5867_vm6 = vcmask 1042432   ;;  %v510_v20 = vsel %vm429_vm11, %v502_v50, inf }
  0x4a   : > { %v605_v18 = vsel %vm5846_vm9, %v595_v6, %v603_v14  ;;  %v691_v19 = vsel %vm5867_vm6, %v654_v12, 0  ;;  %v517_v23 = vsel %vm429_vm11, %v503_v51, inf  ;;  %v511_v30 = vrot.slane %v510_v20, 4 }
  0x4b   : > { %v607_v24 = vsel %vm5845_vm13, %v596_v35, %v605_v18  ;;  %v735_v25 = vpack.c.b16 %v733_v17, %v733_v17  ;;  %700 = vmatpush.bf16.msrb.mxu0 %v691_v19  ;;  %v518_v36 = vrot.slane %v517_v23, 4  ;;  %v524_v41 = vsel %vm429_vm11, %v504_v52, inf  ;;  %v4767_v35 = vld [vmem:[%s4561_s12 + $0x10] sm:$0xff] }
  0x4c   : > { %v609_v40 = vsel %vm5844_vm2, %v597_v7, %v607_v24  ;;  %v531_v15 = vsel %vm429_vm11, %v505_v53, inf  ;;  %v538_v43 = vsel %vm429_vm11, %v506_v55, inf  ;;  %vm5868_vm6 = vcmask 1041408  }
  0x4d   : > { %v611_v44 = vsel %vm5843_vm0, %v598_v8, %v609_v40  ;;  %v740_v45 = vsel %vm5868_vm6, %v735_v25, 0  ;;  %v512_v46 = vmin.f32 %v510_v20, %v511_v30  ;;  %v519_v21 = vmin.f32 %v517_v23, %v518_v36 }
  0x4e   : > { %v613_v26 = vsel %vm5842_vm3, %v599_v10, %v611_v44  ;;  %762 = vmatpush.bf16.msrb.mxu2 %v740_v45  ;;  %v525_v47 = vrot.slane %v524_v41, 4  ;;  %v532_v49 = vrot.slane %v531_v15, 4  ;;  %v539_v27 = vrot.slane %v538_v43, 4 }
  0x4f   : > { %v614_v31 = vpack.c.b16 %v613_v26, %v613_v26  ;;  %v513_v50 = vrot.slane %v512_v46, 2  ;;  %v520_v51 = vrot.slane %v519_v21, 2  ;;  %v545_v52 = vsel %vm429_vm11, %v507_v56, inf }
  0x50   : > { %v526_v53 = vmin.f32 %v524_v41, %v525_v47  ;;  %v533_v32 = vmin.f32 %v531_v15, %v532_v49  ;;  %v540_v54 = vmin.f32 %v538_v43, %v539_v27  ;;  %v546_v55 = vrot.slane %v545_v52, 4 }
  0x51   : > { %3446 = vmatmul.msk.bf16.vlgmr.msra.gmra.mxu2 %vm429_vm11, %v614_v31  ;;  %v514_v59 = vmin.f32 %v512_v46, %v513_v50  ;;  %v521_v37 = vmin.f32 %v519_v21, %v520_v51  ;;  %v552_v61 = vsel %vm429_vm11, %v4724_v33, inf  ;;  %v559_v63 = vsel %vm429_vm11, %v4726_v57, inf }
  0x52   : > { %v527_v38 = vrot.slane %v526_v53, 2  ;;  %v534_v62 = vrot.slane %v533_v32, 2  ;;  %v541_v56 = vrot.slane %v540_v54, 2  ;;  %v547_v0 = vmin.f32 %v545_v52, %v546_v55 }
  0x53   : > { %v515_v1 = vrot.slane %v514_v59, 1  ;;  %v522_v3 = vrot.slane %v521_v37, 1  ;;  %v553_v5 = vrot.slane %v552_v61, 4  ;;  %v560_v6 = vrot.slane %v559_v63, 4 }
  0x54   : > { %v528_v7 = vmin.f32 %v526_v53, %v527_v38  ;;  %v535_v8 = vmin.f32 %v533_v32, %v534_v62  ;;  %v542_v10 = vmin.f32 %v540_v54, %v541_v56  ;;  %v548_v12 = vrot.slane %v547_v0, 2 }
  0x55   : > { %v516_v33 = vmin.f32 %v514_v59, %v515_v1  ;;  %v523_v13 = vmin.f32 %v521_v37, %v522_v3  ;;  %v554_v57 = vmin.f32 %v552_v61, %v553_v5  ;;  %v561_v14 = vmin.f32 %v559_v63, %v560_v6  ;;  %3469 = vmatmul.msk.bf16.gmra.mxu3 %vm429_vm11, %v4767_v35 }
  0x56   : > { %3491 = vmatmul.msk.bf16.vlgmr.msra.gmra.mxu1 %vm429_vm11, %v4759_v58  ;;  %v529_v17 = vrot.slane %v528_v7, 1  ;;  %v536_v18 = vrot.slane %v535_v8, 1  ;;  %v543_v19 = vrot.slane %v542_v10, 1  ;;  %v549_v20 = vmin.f32 %v547_v0, %v548_v12 }
  0x57   : > { %v555_v23 = vrot.slane %v554_v57, 2  ;;  %v562_v24 = vrot.slane %v561_v14, 2  ;;  %v566_v25 = vpack.c.bf16 %v516_v33, %v516_v33  ;;  %v567_v30 = vpack.c.bf16 %v523_v13, %v523_v13 }
  0x58   : > { %v530_v36 = vmin.f32 %v528_v7, %v529_v17  ;;  %v537_v40 = vmin.f32 %v535_v8, %v536_v18  ;;  %v544_v41 = vmin.f32 %v542_v10, %v543_v19  ;;  %v550_v15 = vrot.slane %v549_v20, 1  ;;  %v3990_v7 = vld [vmem:[%s4752_s15 + $0x8] sm:$0xff]  ;;  %v3992_v19 = vld [vmem:[%s4752_s15 + $0x18] sm:$0xff] }
  0x59   : > { %v556_v43 = vmin.f32 %v554_v57, %v555_v23  ;;  %v563_v44 = vmin.f32 %v561_v14, %v562_v24  ;;  %v663_v45 = vperm.slane %v566_v25, 0  ;;  %v664_v46 = vperm.slane %v567_v30, 0  ;;  %v3988_v57 = vld [vmem:[%s4561_s12 + $0x18] sm:$0xff]  ;;  %v4015_v23 = vld [vmem:[#allocation2 + $0x50] sm:$0xff]  ;;  %v373_v24 = vld [vmem:[#allocation2 + $0x8] sm:$0x1] }
  0x5a   : > { %v551_v21 = vmin.f32 %v549_v20, %v550_v15  ;;  %v568_v26 = vpack.c.bf16 %v530_v36, %v530_v36  ;;  %v569_v47 = vpack.c.bf16 %v537_v40, %v537_v40  ;;  %v570_v49 = vpack.c.bf16 %v544_v41, %v544_v41  ;;  %v4016_v20 = vld [vmem:[#allocation2 + $0x58] sm:$0xff] }
  0x5b   : > { %v557_v27 = vrot.slane %v556_v43, 1  ;;  %v564_v31 = vrot.slane %v563_v44, 1  ;;  %v671_v50 = vunpack.c.l.b16 %v663_v45  ;;  %v672_v51 = vunpack.c.l.b16 %v664_v46  ;;  %1638 = vmatpush.bf16.msrb.mxu1 %v4016_v20  ;;  %v4000_v25 = vld [vmem:[#allocation2 + $0x98] sm:$0xff]  ;;  %v4011_v45 = vld [vmem:[#allocation2 + $0x30] sm:$0xff] }
  0x5c   : > { %v571_v52 = vpack.c.bf16 %v551_v21, %v551_v21  ;;  %v665_v53 = vperm.slane %v568_v26, 0  ;;  %v666_v32 = vperm.slane %v569_v47, 0  ;;  %v667_v54 = vperm.slane %v570_v49, 0  ;;  %1476 = vmatpush.bf16.msra.mxu3 %v4000_v25 }
  0x5d   : > { %v558_v55 = vmin.f32 %v556_v43, %v557_v27  ;;  %v565_v59 = vmin.f32 %v563_v44, %v564_v31  ;;  %v679_v37 = vsel %vm5841_vm7, %v672_v51, %v671_v50  ;;  %v793_v61 = vpack.c.b16 %v791_v29, %v791_v29  ;;  %v4012_v43 = vld [vmem:[#allocation2 + $0x38] sm:$0xff]  ;;  %v4010_v31 = vld [vmem:[#allocation2 + $0x28] sm:$0xff]  ;;  %v3999_v51 = vld [vmem:[#allocation2 + $0x90] sm:$0xff] }
  0x5e   : > { %v668_v63 = vperm.slane %v571_v52, 0  ;;  %v673_v38 = vunpack.c.l.b16 %v665_v53  ;;  %v674_v62 = vunpack.c.l.b16 %v666_v32  ;;  %v675_v56 = vunpack.c.l.b16 %v667_v54  ;;  %v4009_v52 = vld [vmem:[#allocation2 + $0x20] sm:$0xff]  ;;  %v3998_v54 = vld [vmem:[#allocation2 + $0x88] sm:$0xff] }
  0x5f   : > { %v572_v0 = vpack.c.bf16 %v558_v55, %v558_v55  ;;  %v573_v1 = vpack.c.bf16 %v565_v59, %v565_v59  ;;  %vm5869_vm6 = vcmask 1042432   ;;  %vm5870_vm7 = vcmask 31744   ;;  %1639 = vmatpush.bf16.msrb.mxu1 %v4015_v23  ;;  %v4048_v32 = vld [vmem:[#allocation2 + $0x11c] sm:$0xff]  ;;  %v4047_v59 = vld [vmem:[#allocation2 + $0x114] sm:$0xff] }
  0x60   : > { %v810_v3 = vsel %vm5869_vm6, %v793_v61, 0  ;;  %v676_v5 = vunpack.c.l.b16 %v668_v63  ;;  %v680_v6 = vsel %vm5847_vm8, %v673_v38, %v679_v37  ;;  %v374_v30 = vunpack.c.l.bf16 %v373_v24  ;;  %1477 = vmatpush.bf16.msra.mxu3 %v3999_v51  ;;  %v3997_v37 = vld [vmem:[#allocation2 + $0x80] sm:$0xff]  ;;  %v4046_v63 = vld [vmem:[#allocation2 + $0x10c] sm:$0xff] }
  0x61   : > { %938 = vmatpush.bf16.msra.mxu2 %v810_v3  ;;  %848 = vmatpush.bf16.msra.mxu0 %v810_v3  ;;  %v669_v8 = vperm.slane %v572_v0, 0  ;;  %v670_v9 = vperm.slane %v573_v1, 0  ;;  %v681_v29 = vsel %vm5846_vm9, %v674_v62, %v680_v6  ;;  %v3996_v62 = vld [vmem:[#allocation2 + $0x78] sm:$0xff]  ;;  %v4045_v1 = vld [vmem:[#allocation2 + $0x104] sm:$0xff] }
  0x62   : > { %3450 = vmatmul.msk.bf16.vlgmr.msrb.gmra.mxu2 %vm5870_vm7, %v4563_v4  ;;  %v682_v10 = vsel %vm5845_vm13, %v675_v56, %v681_v29  ;;  %v3991_v4 = vld [vmem:[%s4752_s15 + $0x10] sm:$0xff]  ;;  %v4005_v51 = vld [vmem:[#allocation2 + $0xc0] sm:$0xff] }
  0x63   : > { %v677_v12 = vunpack.c.l.b16 %v669_v8  ;;  %v678_v33 = vunpack.c.l.b16 %v670_v9  ;;  %v683_v13 = vsel %vm5844_vm2, %v676_v5, %v682_v10  ;;  %v3995_v5 = vld [vmem:[#allocation2 + $0x70] sm:$0xff]  ;;  %v3994_v9 = vld [vmem:[#allocation2 + $0x68] sm:$0xff] }
  0x64   : > { %1478 = vmatpush.bf16.msra.mxu3 %v3998_v54 }
  0x65   : > { %v684_v14 = vsel %vm5843_vm0, %v677_v12, %v683_v13  ;;  %3470 = vmatmul.msk.bf16.gmra.mxu3 %vm429_vm11, %v3988_v57  ;;  %v4008_v12 = vld [vmem:[#allocation2 + $0xd8] sm:$0xff] }
  0x66   : > { %3492 = vmatmul.msk.bf16.gmra.mxu1 %vm429_vm11, %v3990_v7  ;;  %v685_v17 = vsel %vm5842_vm3, %v678_v33, %v684_v14  ;;  %v4043_v13 = vld [vmem:[#allocation2 + $0xf4] sm:$0xff] }
  0x67   : > { %v686_v18 = vpack.c.b16 %v685_v17, %v685_v17  ;;  %v707_v17 = vld [vmem:[#allocation2 + $0x18] sm:$0x1] }
  0x68   : > { %1479 = vmatpush.bf16.msra.mxu3 %v3997_v37  ;;  %v708_v25 = vunpack.c.l.bf16 %v707_v17 }
  0x69   : > { %3448 = vmatmul.msk.bf16.vlgmr.msrb.gmra.mxu0 %vm429_vm11, %v686_v18  ;;  %v3993_v18 = vld [vmem:[#allocation2 + $0x60] sm:$0xff] }
  0x6a   : > { %1553 = vmatpush.bf16.msrb.mxu0 %v4008_v12 }
  0x6c   : > { %1480 = vmatpush.bf16.msra.mxu3 %v3996_v62 }
  0x70   : > { %1481 = vmatpush.bf16.msra.mxu3 %v3995_v5  ;;  %v4075_v5 = vld [vmem:[#allocation5 + $0xe4] sm:$0xf] }
  0x72   : > { %3495 = vmatmul.msk.bf16.vlgmr.msra.gmra.mxu2 %vm429_vm11, %v4759_v58  ;;  %v4014_v58 = vld [vmem:[#allocation2 + $0x48] sm:$0xff] }
  0x73   : > { %1640 = vmatpush.bf16.msrb.mxu1 %v4014_v58  ;;  %v4007_v58 = vld [vmem:[#allocation2 + $0xd0] sm:$0xff] }
  0x74   : > { %1482 = vmatpush.bf16.msra.mxu3 %v3994_v9  ;;  %1554 = vmatpush.bf16.msrb.mxu0 %v4007_v58  ;;  %v960_v9 = vld [vmem:[#allocation2 + $0x1c] sm:$0x1] }
  0x76   : > { %3493 = vmatmul.msk.bf16.gmra.mxu1 %vm429_vm11, %v3991_v4 }
  0x78   : > { %1483 = vmatpush.bf16.msra.mxu3 %v3993_v18  ;;  %v1009_v18 = vunpack.c.l.bf16 %v960_v9 }
  0x79   : > { %3471 = vmatmul.msk.bf16.vlgmr.msra.gmra.mxu0 %vm429_vm11, %v4691_v34 }
  0x82   : > { %3496 = vmatmul.msk.bf16.gmra.mxu2 %vm429_vm11, %v3990_v7  ;;  %v4044_v7 = vld [vmem:[#allocation2 + $0xfc] sm:$0xff] }
  0x86   : > { %3494 = vmatmul.msk.bf16.gmra.mxu1 %vm429_vm11, %v3992_v19 }
  0x89   : > { %3472 = vmatmul.msk.bf16.gmra.mxu0 %vm429_vm11, %v4729_v60  ;;  %v4013_v60 = vld [vmem:[#allocation2 + $0x40] sm:$0xff] }
  0x8a   : > { %1641 = vmatpush.bf16.msrb.mxu1 %v4013_v60  ;;  %v4042_v60 = vld [vmem:[#allocation2 + $0xec] sm:$0xff] }
  0x8e   : > { %1642 = vmatpush.bf16.msrb.mxu1 %v4012_v43 }
  0x92   : > { %3497 = vmatmul.msk.bf16.gmra.mxu2 %vm429_vm11, %v3991_v4  ;;  %1643 = vmatpush.bf16.msrb.mxu1 %v4011_v45  ;;  %v4041_v45 = vld [vmem:[#allocation2 + $0xe4] sm:$0xff] }
  0x96   : > { %1644 = vmatpush.bf16.msrb.mxu1 %v4010_v31 }
  0x99   : > { %3473 = vmatmul.msk.bf16.gmra.mxu0 %vm429_vm11, %v4767_v35 }
  0x9a   : > { %1645 = vmatpush.bf16.msrb.mxu1 %v4009_v52 }
  0x9e   : > { %2181 = vmatpush.bf16.msra.mxu1 %v4048_v32  ;;  %v3843_v32 = vld [vmem:[#allocation5 + $0xf8] sm:$0xf0] }
  0xa2   : > { %3498 = vmatmul.msk.bf16.gmra.mxu2 %vm429_vm11, %v3992_v19  ;;  %2182 = vmatpush.bf16.msra.mxu1 %v4047_v59  ;;  %v4024_v19 = vld [vmem:[#allocation2 + $0x15c] sm:$0xff] }
  0xa3   : > { %1989 = vmatpush.bf16.msrb.mxu3 %v4024_v19  ;;  %v3835_v19 = vld [vmem:[#allocation5 + $0xd8] sm:$0xf0] }
  0xa6   : > { %2183 = vmatpush.bf16.msra.mxu1 %v4046_v63  ;;  %v4021_v63 = vld [vmem:[#allocation2 + $0x144] sm:$0xff] }
  0xa8   : > { %v4807_v34 = vpop.f32.mrf.mxu3 }
  0xa9   : > { %3474 = vmatmul.msk.bf16.gmra.mxu0 %vm429_vm11, %v3988_v57 }
  0xaa   : > { %2184 = vmatpush.bf16.msra.mxu1 %v4045_v1 }
  0xae   : > { %2185 = vmatpush.bf16.msra.mxu1 %v4044_v7 }
  0xb0   : > { %v652_v41 = vpop.f32.mrf.mxu3 }
  0xb2   : > { %2186 = vmatpush.bf16.msra.mxu1 %v4043_v13 }
  0xb3   : > { %v368_v36 = vpop.f32.mrf.mxu1  ;;  %v348_v40 = vpop.f32.mrf.mxu0 }
  0xb4   : > { %v372_v15 = vadd.f32 %v368_v36, %v348_v40  ;;  %v4023_v40 = vld [vmem:[#allocation2 + $0x154] sm:$0xff] }
  0xb5   : > { %1990 = vmatpush.bf16.msrb.mxu3 %v4023_v40 }
  0xb6   : > { %v375_v35 = vadd.f32 %v374_v30, %v372_v15  ;;  %2187 = vmatpush.bf16.msra.mxu1 %v4042_v60 }
  0xb8   : > { %v376_v44 = vsub.f32 0.0, %v375_v35  ;;  %v4811_v49 = vpop.f32.mrf.mxu3  ;;  %v4006_v35 = vld [vmem:[#allocation2 + $0xc8] sm:$0xff] }
  0xb9   : > { %1555 = vmatpush.bf16.msrb.mxu0 %v4006_v35 }
  0xba   : > { %v377_v46 = vmul.f32 1.442695, %v376_v44  ;;  %v709_v44 = vperm.slane %v708_v25, 0  ;;  %2188 = vmatpush.bf16.msra.mxu1 %v4041_v45 }
  0xbb   : > { %v370_v21 = vpop.f32.mrf.mxu1  ;;  %v350_v26 = vpop.f32.mrf.mxu0 }
  0xbc   : > { %4177 = vpow2.f32 %v377_v46  ;;  %v4079_v46 = vld [vmem:[#allocation5 + $0x104] sm:$0xf] }
  0xbd   : > { %1556 = vmatpush.bf16.msrb.mxu0 %v4005_v51  ;;  %v4002_v51 = vld [vmem:[#allocation2 + $0xa8] sm:$0xff] }
  0xc0   : > { %v4813_v55 = vpop.f32.mrf.mxu3 }
  0xc2   : > { %v4178_v27 = vpop.eup %4177 }
  0xc3   : > { %v4809_v47 = vpop.f32.mrf.mxu1  ;;  %v379_v50 = vadd.f32 1.0, %v4178_v27  ;;  %v3847_v27 = vld [vmem:[#allocation5 + $0x108] sm:$0xf0] }
  0xc4   : > { %v962_v62 = vrot.slane %v4809_v47, 1  ;;  %v964_v58 = vrot.slane %v4809_v47, 3  ;;  %v966_v60 = vrot.slane %v4809_v47, 5 }
  0xc5   : > { %4179 = vrcp.f32 %v379_v50  ;;  %v391_v33 = vand.u32 2147483648, %v379_v50  ;;  %vm385_vm11 = vweird.f32 %v379_v50  ;;  %v389_v14 = vand.u32 2147483647, %v379_v50 }
  0xc6   : > { %v970_v17 = vperm.slane %v962_v62, 0 }
  0xc7   : > { %v392_v4 = vor.u32 1.1754944e-38, %v391_v33  ;;  %vm390_vm3 = vcmp.eq.f32.partialorder %v389_v14, 8.507059e+37  ;;  %v4003_v14 = vld [vmem:[#allocation2 + $0xb0] sm:$0xff] }
  0xc8   : > { %v4817_v3 = vpop.f32.mrf.mxu3  ;;  %v986_v35 = vadd.f32 %v970_v17, %v4813_v55  ;;  %v4069_v17 = vld [vmem:[#allocation5 + $0xb4] sm:$0xf] }
  0xcb   : > { %v753_v53 = vpop.f32.mrf.mxu1  ;;  %v4180_v61 = vpop.eup %4179 }
  0xcc   : > { %v381_v56 = vmul.f32 %v4180_v61, %v379_v50  ;;  %vm386_vm7 = vweird.f32 %v4180_v61  ;;  %v3850_v50 = vor.u32 %v4079_v46, %v3847_v27  ;;  %v4077_v53 = vld [vmem:[#allocation5 + $0xf4] sm:$0xf] }
  0xcd   : > { %vm387_vm6 = vmor %vm385_vm11, %vm386_vm7  ;;  %v3846_v59 = vor.u32 %v4077_v53, %v3843_v32  ;;  %v974_v32 = vperm.slane %v966_v60, 0 }
  0xce   : > { %v382_v6 = vsub.f32 1.0, %v381_v56 }
  0xd0   : > { %v383_v29 = vmul.f32 %v4180_v61, %v382_v6  ;;  %v4821_v23 = vpop.f32.mrf.mxu3  ;;  %v3839_v6 = vld [vmem:[#allocation5 + $0xe8] sm:$0xf0] }
  0xd2   : > { %v384_v57 = vadd.f32 %v4180_v61, %v383_v29 }
  0xd3   : > { %v4815_v38 = vpop.f32.mrf.mxu1 }
  0xd4   : > { %v631_v0 = vpop.f32.mrf.mxu2  ;;  %v388_v20 = vsel %vm387_vm6, %v4180_v61, %v384_v57  ;;  %v969_v61 = vperm.slane %v4809_v47, 0  ;;  %v1171_v12 = vadd.f32 %v4815_v38, %v4809_v47  ;;  %v4020_v57 = vld [vmem:[#allocation2 + $0x13c] sm:$0xff] }
  0xd5   : > { %v393_v24 = vsel %vm390_vm3, %v392_v4, %v388_v20  ;;  %v651_v36 = vadd.f32 %v4807_v34, %v631_v0  ;;  %v4022_v34 = vld [vmem:[#allocation2 + $0x14c] sm:$0xff]  ;;  %v4004_v0 = vld [vmem:[#allocation2 + $0xb8] sm:$0xff]  ;;  %v963_v20 = vrot.slane %v4809_v47, 2 }
  0xd6   : > { %v1379_v30 = vpack.c.bf16 %v393_v24, %v393_v24  ;;  %1991 = vmatpush.bf16.msrb.mxu3 %v4022_v34  ;;  %1557 = vmatpush.bf16.msrb.mxu0 %v4004_v0  ;;  %v985_v13 = vadd.f32 %v969_v61, %v4811_v49  ;;  %v4073_v4 = vld [vmem:[#allocation5 + $0xd4] sm:$0xf]  ;;  %v965_v24 = vrot.slane %v4809_v47, 4 }
  0xd7   : > { %v3838_v38 = vor.u32 %v4073_v4, %v3835_v19  ;;  %v971_v27 = vperm.slane %v963_v20, 0 }
  0xd8   : > { %v1587_v41 = vpack.i.b16 %v1379_v30, %v1379_v30  ;;  %v4831_v54 = vpop.f32.mrf.mxu3  ;;  %v4019_v30 = vld [vmem:[#allocation2 + $0x134] sm:$0xff] }
  0xda   : > { %v4828_v26 = vperm.slane %v1587_v41, 0  ;;  %1992 = vmatpush.bf16.msrb.mxu3 %v4021_v63  ;;  %1558 = vmatpush.bf16.msrb.mxu0 %v4003_v14 }
  0xdb   : > { %v4819_v8 = vpop.f32.mrf.mxu1 }
  0xdc   : > { %v633_v10 = vpop.f32.mrf.mxu2  ;;  %1646 = vmatmul.bf16.vlgmr.msrb.gmra.mxu1 %v4828_v26  ;;  %v1172_v53 = vadd.f32 %v4819_v8, %v4809_v47 }
  0xdd   : > { %2510 = vmatpush.bf16.msrb.mxu1 %v3850_v50  ;;  %v3842_v10 = vor.u32 %v4075_v5, %v3839_v6  ;;  %v973_v50 = vperm.slane %v965_v24, 0  ;;  %v4018_v6 = vld [vmem:[#allocation2 + $0x12c] sm:$0xff] }
  0xde   : > { %1993 = vmatpush.bf16.msrb.mxu3 %v4020_v57  ;;  %1559 = vmatpush.bf16.msrb.mxu0 %v4002_v51  ;;  %v4017_v51 = vld [vmem:[#allocation2 + $0x124] sm:$0xff] }
  0xe1   : > { %2511 = vmatpush.bf16.msrb.mxu1 %v3846_v59  ;;  %v4071_v59 = vld [vmem:[#allocation5 + $0xc4] sm:$0xf] }
  0xe2   : > { %1994 = vmatpush.bf16.msrb.mxu3 %v4019_v30 }
  0xe3   : > { %v4826_v43 = vpop.f32.mrf.mxu1 }
  0xe5   : > { %v4824_v15 = vpop.f32.mrf.mxu2  ;;  %2512 = vmatpush.bf16.msrb.mxu1 %v3842_v10  ;;  %v1173_v10 = vadd.f32 %v4826_v43, %v4809_v47  ;;  %v3827_v43 = vld [vmem:[#allocation5 + $0xb8] sm:$0xf0] }
  0xe6   : > { %v702_v21 = vpop.f32.mrf.mxu0  ;;  %v1187_v33 = vperm.slane %v4824_v15, 0  ;;  %v993_v49 = vadd.f32 %v985_v13, %v4824_v15  ;;  %v1180_v45 = vrot.slane %v4824_v15, 1  ;;  %v1181_v61 = vrot.slane %v4824_v15, 2  ;;  %1995 = vmatpush.bf16.msrb.mxu3 %v4018_v6 }
  0xe7   : > { %v706_v31 = vadd.f32 %v702_v21, %v651_v36  ;;  %v833_v36 = vpop.f32.mrf.mxu3  ;;  %v1182_v63 = vrot.slane %v4824_v15, 3 }
  0xe8   : > { %v1203_v25 = vadd.f32 %v1187_v33, %v1171_v12  ;;  %v1188_v0 = vperm.slane %v1180_v45, 0  ;;  %v967_v12 = vrot.slane %v4809_v47, 6  ;;  %v4001_v33 = vld [vmem:[#allocation2 + $0xa0] sm:$0xff]  ;;  %v4870_v4 = vadd.f32 %v974_v32, %v833_v36 }
  0xe9   : > { %v710_v52 = vadd.f32 %v709_v44, %v706_v31  ;;  %v4847_v44 = vperm.slane %v1009_v18, 0  ;;  %v972_v31 = vperm.slane %v964_v58, 0  ;;  %2513 = vmatpush.bf16.msrb.mxu1 %v3838_v38  ;;  %v989_v18 = vadd.f32 %v973_v50, %v4831_v54  ;;  %1560 = vmatpush.bf16.msrb.mxu0 %v4001_v33 }
  0xea   : > { %v1204_v57 = vadd.f32 %v1188_v0, %v1172_v53  ;;  %v975_v30 = vperm.slane %v967_v12, 0  ;;  %v3830_v36 = vor.u32 %v4069_v17, %v3827_v43  ;;  %1996 = vmatpush.bf16.msrb.mxu3 %v4017_v51  ;;  %v4067_v0 = vld [vmem:[#allocation5 + $0xa4] sm:$0xf]  ;;  %v3819_v43 = vld [vmem:[#allocation5 + $0x98] sm:$0xf0] }
  0xeb   : > { %v711_v37 = vsub.f32 0.0, %v710_v52  ;;  %v4835_v29 = vpop.f32.mrf.mxu1  ;;  %v988_v9 = vadd.f32 %v972_v31, %v4821_v23  ;;  %v4872_v23 = vperm.slane %v1182_v63, 0  ;;  %v4889_v53 = vadd.f32 %v989_v18, %v4824_v15 }
  0xec   : > { %2189 = vmatmul.bf16.vlgmr.msra.gmra.mxu1 %v4828_v26  ;;  %v994_v26 = vadd.f32 %v986_v35, %v4824_v15  ;;  %v1184_v35 = vrot.slane %v4824_v15, 5  ;;  %v1174_v45 = vadd.f32 %v4835_v29, %v4809_v47 }
  0xed   : > { %v766_v56 = vpop.f32.mrf.mxu2  ;;  %v712_v1 = vmul.f32 1.442695, %v711_v37  ;;  %v3831_v37 = vld [vmem:[#allocation5 + $0xc8] sm:$0xf0]  ;;  %v4884_v31 = vadd.f32 %v988_v9, %v4824_v15 }
  0xee   : > { %v704_v7 = vpop.f32.mrf.mxu0  ;;  %v1183_v56 = vrot.slane %v4824_v15, 4  ;;  %v3834_v5 = vor.u32 %v4071_v59, %v3831_v37 }
  0xef   : > { %4181 = vpow2.f32 %v712_v1  ;;  %v987_v7 = vadd.f32 %v971_v27, %v4817_v3  ;;  %v1189_v3 = vperm.slane %v1181_v61, 0  ;;  %v968_v27 = vrot.slane %v4809_v47, 7 }
  0xf0   : > { %2514 = vmatpush.bf16.msrb.mxu1 %v3834_v5  ;;  %v4874_v24 = vperm.slane %v1183_v56, 0 }
  0xf1   : > { %v1205_v60 = vadd.f32 %v1189_v3, %v1173_v10  ;;  %v995_v54 = vadd.f32 %v987_v7, %v4824_v15  ;;  %v976_v6 = vperm.slane %v968_v27, 0 }
  0xf3   : > { %v4858_v62 = vpop.f32.mrf.mxu1 }
  0xf4   : > { %2515 = vmatpush.bf16.msrb.mxu1 %v3830_v36 }
  0xf5   : > { %v940_v40 = vpop.f32.mrf.mxu2  ;;  %v4182_v41 = vpop.eup %4181 }
  0xf6   : > { %v1001_v46 = vadd.f32 %v993_v49, %v940_v40  ;;  %v4850_v21 = vadd.f32 1.0, %v4182_v41  ;;  %v850_v34 = vpop.f32.mrf.mxu0  ;;  %v836_v49 = vpop.f32.mrf.mxu3 }
  0xf7   : > { %v1211_v52 = vadd.f32 %v1203_v25, %v850_v34 }
  0xf8   : > { %v1011_v55 = vadd.f32 %v4847_v44, %v1001_v46  ;;  %4183 = vrcp.f32 %v4850_v21  ;;  %v724_v32 = vand.u32 2147483647, %v4850_v21  ;;  %v726_v29 = vand.u32 2147483648, %v4850_v21 }
  0xf9   : > { %v1219_v8 = vadd.f32 %v1211_v52, %v4847_v44  ;;  %v1185_v52 = vrot.slane %v4824_v15, 6  ;;  %vm720_vm11 = vweird.f32 %v4850_v21 }
  0xfa   : > { %v1019_v1 = vsub.f32 0.0, %v1011_v55  ;;  %v4893_v55 = vadd.f32 %v975_v30, %v836_v49  ;;  %vm725_vm6 = vcmp.eq.f32.partialorder %v724_v32, 8.507059e+37  ;;  %v1186_v30 = vrot.slane %v4824_v15, 7 }
  0xfb   : > { %v1227_v13 = vsub.f32 0.0, %v1219_v8  ;;  %v923_v37 = vpop.f32.mrf.mxu1  ;;  %v1192_v8 = vperm.slane %v1184_v35, 0  ;;  %v1193_v35 = vperm.slane %v1185_v52, 0 }
  0xfc   : > { %v1027_v14 = vmul.f32 1.442695, %v1019_v1  ;;  %v3823_v1 = vld [vmem:[#allocation5 + $0xa8] sm:$0xf0]  ;;  %v1176_v49 = vadd.f32 %v923_v37, %v4809_v47  ;;  %v4926_v37 = vperm.slane %v1186_v30, 0 }
  0xfd   : > { %v942_v19 = vpop.f32.mrf.mxu2  ;;  %v1235_v20 = vmul.f32 1.442695, %v1227_v13  ;;  %v3826_v9 = vor.u32 %v4067_v0, %v3823_v1 }
  0xfe   : > { %4185 = vpow2.f32 %v1027_v14  ;;  %v1002_v58 = vadd.f32 %v994_v26, %v942_v19  ;;  %v4184_v38 = vpop.eup %4183  ;;  %v852_v25 = vpop.f32.mrf.mxu0  ;;  %v727_v14 = vor.u32 1.1754944e-38, %v726_v29  ;;  %v4065_v19 = vld [vmem:[#allocation5 + $0x94] sm:$0xf] }
  0xff   : > { %v716_v40 = vmul.f32 %v4184_v38, %v4850_v21  ;;  %4187 = vpow2.f32 %v1235_v20  ;;  %v1212_v41 = vadd.f32 %v1204_v57, %v852_v25  ;;  %vm721_vm3 = vweird.f32 %v4184_v38  ;;  %2516 = vmatpush.bf16.msrb.mxu1 %v3826_v9 }
 0x100   : > { %v1012_v46 = vadd.f32 %v4847_v44, %v1002_v58  ;;  %vm722_vm7 = vmor %vm720_vm11, %vm721_vm3  ;;  %v1175_v21 = vadd.f32 %v4858_v62, %v4809_v47  ;;  %v838_v58 = vpop.f32.mrf.mxu3  ;;  %v1206_v62 = vadd.f32 %v4872_v23, %v1174_v45  ;;  %v4922_v45 = vadd.f32 %v1192_v8, %v1176_v49 }
 0x101   : > { %v717_v34 = vsub.f32 1.0, %v716_v40  ;;  %v1220_v50 = vadd.f32 %v1212_v41, %v4847_v44  ;;  %v3822_v41 = vor.u32 %v4065_v19, %v3819_v43  ;;  %v4916_v27 = vadd.f32 %v976_v6, %v838_v58  ;;  %v4946_v19 = vld [vmem:[#allocation5 + $0x64] sm:$0xf]  ;;  %v4948_v43 = vld [vmem:[#allocation5 + $0x68] sm:$0xf0] }
 0x102   : > { %v1020_v59 = vsub.f32 0.0, %v1012_v46 }
 0x103   : > { %v718_v63 = vmul.f32 %v4184_v38, %v717_v34  ;;  %v1228_v56 = vsub.f32 0.0, %v1220_v50  ;;  %v4919_v34 = vadd.f32 %v4874_v24, %v1175_v21  ;;  %2517 = vmatpush.bf16.msrb.mxu1 %v3822_v41 }
 0x104   : > { %v4186_v61 = vpop.eup %4185  ;;  %v1029_v13 = vmul.f32 1.442695, %v1020_v59  ;;  %v926_v59 = vpop.f32.mrf.mxu1 }
 0x105   : > { %v4896_v5 = vadd.f32 1.0, %v4186_v61  ;;  %v945_v7 = vpop.f32.mrf.mxu2  ;;  %v4188_v10 = vpop.eup %4187  ;;  %v719_v12 = vadd.f32 %v4184_v38, %v718_v63  ;;  %v1237_v33 = vmul.f32 1.442695, %v1228_v56 }
 0x106   : > { %v1003_v57 = vadd.f32 %v995_v54, %v945_v7  ;;  %v4899_v26 = vadd.f32 1.0, %v4188_v10  ;;  %v855_v17 = vpop.f32.mrf.mxu0 }
 0x107   : > { %4189 = vrcp.f32 %v4896_v5  ;;  %v723_v18 = vsel %vm722_vm7, %v4184_v38, %v719_v12  ;;  %v1213_v3 = vadd.f32 %v1205_v60, %v855_v17  ;;  %v4911_v38 = vld [vmem:[#allocation5 + $0x84] sm:$0xf]  ;;  %v4913_v60 = vld [vmem:[#allocation5 + $0x88] sm:$0xf0]  ;;  %vm1056_vm3 = vweird.f32 %v4896_v5 }
 0x108   : > { %4191 = vpow2.f32 %v1237_v33  ;;  %v728_v20 = vsel %vm725_vm6, %v727_v14, %v723_v18  ;;  %v1013_v25 = vadd.f32 %v4847_v44, %v1003_v57  ;;  %v3786_v29 = vor.u32 %v4911_v38, %v4913_v60  ;;  %v4936_v33 = vld [vmem:[#allocation5 + $0x74] sm:$0xf] }
 0x109   : > { %v4907_v54 = vpack.c.bf16 %v728_v20, %v728_v20  ;;  %v1221_v36 = vadd.f32 %v1213_v3, %v4847_v44  ;;  %4193 = vpow2.f32 %v1029_v13  ;;  %v1060_v56 = vand.u32 2147483647, %v4896_v5  ;;  %v4938_v13 = vld [vmem:[#allocation5 + $0x78] sm:$0xf0] }
 0x10a   : > { %4195 = vrcp.f32 %v4899_v26  ;;  %v1021_v40 = vsub.f32 0.0, %v1013_v25  ;;  %v1062_v8 = vand.u32 2147483648, %v4896_v5  ;;  %v1177_v12 = vadd.f32 %v926_v59, %v4809_v47 }
 0x10b   : > { %v1229_v46 = vsub.f32 0.0, %v1221_v36  ;;  %v1397_v50 = vunpack.c.l.bf16 %v4907_v54  ;;  %vm4950_vm7 = vcmp.eq.f32.partialorder %v1060_v56, 8.507059e+37  ;;  %v3778_v25 = vor.u32 %v4936_v33, %v4938_v13 }
 0x10c   : > { %v1031_v23 = vmul.f32 1.442695, %v1021_v40  ;;  %v1063_v58 = vor.u32 1.1754944e-38, %v1062_v8  ;;  %v5879_v13 = vand.u32 2147483648, %v4899_v26 }
 0x10d   : > { %v4190_v51 = vpop.eup %4189  ;;  %v947_v32 = vpop.f32.mrf.mxu2  ;;  %v1239_v61 = vmul.f32 1.442695, %v1229_v46  ;;  %v1398_v24 = vrot.slane %v1397_v50, 4 }
 0x10e   : > { %v4192_v52 = vpop.eup %4191  ;;  %v1052_v63 = vmul.f32 %v4190_v51, %v4896_v5  ;;  %v857_v0 = vpop.f32.mrf.mxu0  ;;  %4197 = vpow2.f32 %v1031_v23  ;;  %v1004_v1 = vadd.f32 %v4884_v31, %v947_v32  ;;  %vm1057_vm11 = vweird.f32 %v4190_v51 }
 0x10f   : > { %v4194_v6 = vpop.eup %4193  ;;  %v4933_v7 = vadd.f32 1.0, %v4192_v52  ;;  %v1214_v10 = vadd.f32 %v1206_v62, %v857_v0  ;;  %v1399_v17 = vmax.f32 %v1397_v50, %v1398_v24  ;;  %v1406_v21 = vmin.f32 %v1397_v50, %v1398_v24  ;;  %vm1058_vm6 = vmor %vm1056_vm3, %vm1057_vm11 }
 0x110   : > { %v1053_v9 = vsub.f32 1.0, %v1052_v63  ;;  %v4940_v57 = vpop.eup %4195  ;;  %v4942_v14 = vadd.f32 1.0, %v4194_v6  ;;  %4199 = vpow2.f32 %v1239_v61  ;;  %v1014_v3 = vadd.f32 %v4847_v44, %v1004_v1 }
 0x111   : > { %v1222_v18 = vadd.f32 %v1214_v10, %v4847_v44  ;;  %v1260_v49 = vmul.f32 %v4940_v57, %v4899_v26  ;;  %v1400_v41 = vrot.slane %v1399_v17, 2  ;;  %v1407_v46 = vrot.slane %v1406_v21, 2 }
 0x112   : > { %v1054_v31 = vmul.f32 %v4190_v51, %v1053_v9  ;;  %4201 = vrcp.f32 %v4942_v14  ;;  %v1077_v40 = vand.u32 2147483648, %v4942_v14  ;;  %v1075_v32 = vand.u32 2147483647, %v4942_v14 }
 0x113   : > { %4203 = vrcp.f32 %v4933_v7  ;;  %v1230_v36 = vsub.f32 0.0, %v1222_v18  ;;  %v1022_v59 = vsub.f32 0.0, %v1014_v3  ;;  %v4967_v52 = vadd.f32 %v1193_v35, %v1177_v12 }
 0x114   : > { %v1055_v30 = vadd.f32 %v4190_v51, %v1054_v31  ;;  %v4198_v62 = vpop.eup %4197  ;;  %v1268_v5 = vand.u32 2147483647, %v4899_v26  ;;  %v1261_v0 = vsub.f32 1.0, %v1260_v49  ;;  %vm1071_vm3 = vweird.f32 %v4942_v14 }
 0x115   : > { %v1241_v63 = vmul.f32 1.442695, %v1230_v36  ;;  %v4976_v6 = vadd.f32 1.0, %v4198_v62  ;;  %v1078_v35 = vor.u32 1.1754944e-38, %v1077_v40  ;;  %v1401_v10 = vmax.f32 %v1399_v17, %v1400_v41 }
 0x116   : > { %v1059_v23 = vsel %vm1058_vm6, %v4190_v51, %v1055_v30  ;;  %v860_v24 = vpop.f32.mrf.mxu0  ;;  %v4200_v8 = vpop.eup %4199  ;;  %v1408_v12 = vmin.f32 %v1406_v21, %v1407_v46  ;;  %vm4988_vm11 = vcmp.eq.f32.partialorder %v1075_v32, 8.507059e+37  ;;  %v4997_v40 = vmul.f32 %v4940_v57, %v1261_v0 }
 0x117   : > { %v1064_v61 = vsel %vm4950_vm7, %v1063_v58, %v1059_v23  ;;  %v1215_v51 = vadd.f32 %v4919_v34, %v860_v24  ;;  %v1033_v58 = vmul.f32 1.442695, %v1022_v59  ;;  %4205 = vpow2.f32 %v1241_v63  ;;  %v950_v30 = vpop.f32.mrf.mxu2 }
 0x118   : > { %v4973_v1 = vpack.c.bf16 %v1064_v61, %v1064_v61  ;;  %v4202_v9 = vpop.eup %4201  ;;  %v4993_v36 = vadd.f32 1.0, %v4200_v8  ;;  %4207 = vrcp.f32 %v4976_v6  ;;  %v1402_v23 = vrot.slane %v1401_v10, 1 }
 0x119   : > { %v4979_v31 = vpop.eup %4203  ;;  %v1067_v34 = vmul.f32 %v4202_v9, %v4942_v14  ;;  %v1223_v21 = vadd.f32 %v1215_v51, %v4847_v44  ;;  %vm1072_vm7 = vweird.f32 %v4202_v9  ;;  %v1409_v59 = vrot.slane %v1408_v12, 1 }
 0x11a   : > { %v1671_v18 = vsel %vm4552_vm10, 0, %v4973_v1  ;;  %v1743_v3 = vsel %vm4552_vm10, 1065369472, %v4973_v1  ;;  %v5001_v41 = vmul.f32 %v4979_v31, %v4933_v7  ;;  %4209 = vpow2.f32 %v1033_v58  ;;  %vm1073_vm6 = vmor %vm1071_vm3, %vm1072_vm7 }
 0x11b   : > { %v1679_v49 = vunpack.c.l.bf16 %v1671_v18  ;;  %v1751_v17 = vunpack.c.l.bf16 %v1743_v3  ;;  %v1068_v62 = vsub.f32 1.0, %v1067_v34  ;;  %v1231_v46 = vsub.f32 0.0, %v1223_v21 }
 0x11c   : > { %v1005_v61 = vadd.f32 %v4889_v53, %v950_v30  ;;  %v1090_v51 = vand.u32 2147483647, %v4976_v6  ;;  %v1403_v3 = vmax.f32 %v1401_v10, %v1402_v23  ;;  %v1410_v34 = vmin.f32 %v1408_v12, %v1409_v59 }
 0x11d   : > { %v1069_v32 = vmul.f32 %v4202_v9, %v1068_v62  ;;  %v1687_v63 = vrot.slane %v1679_v49, 4  ;;  %v1759_v24 = vrot.slane %v1751_v17, 4  ;;  %v1243_v8 = vmul.f32 1.442695, %v1231_v46  ;;  %v4206_v56 = vpop.eup %4205 }
 0x11e   : > { %v862_v18 = vpop.f32.mrf.mxu0  ;;  %4211 = vrcp.f32 %v4993_v36  ;;  %vm1086_vm0 = vweird.f32 %v4976_v6  ;;  %v1092_v53 = vand.u32 2147483648, %v4976_v6  ;;  %v1015_v58 = vadd.f32 %v4847_v44, %v1005_v61  ;;  %v4208_v21 = vpop.eup %4207 }
 0x11f   : > { %v1070_v0 = vadd.f32 %v4202_v9, %v1069_v32  ;;  %v1216_v50 = vadd.f32 %v4922_v45, %v862_v18  ;;  %v1276_v30 = vsub.f32 1.0, %v5001_v41  ;;  %v1404_v12 = vpack.c.bf16 %v1403_v3, %v1403_v3 }
 0x120   : > { %v1411_v62 = vpack.c.bf16 %v1410_v34, %v1410_v34  ;;  %4213 = vpow2.f32 %v1243_v8  ;;  %v1082_v46 = vmul.f32 %v4208_v21, %v4976_v6  ;;  %vm5017_vm2 = vcmp.eq.f32.partialorder %v1090_v51, 8.507059e+37  ;;  %v4210_v32 = vpop.eup %4209 }
 0x121   : > { %v1074_v10 = vsel %vm1073_vm6, %v4202_v9, %v1070_v0  ;;  %v1224_v23 = vadd.f32 %v1216_v50, %v4847_v44  ;;  %vm1264_vm3 = vweird.f32 %v4899_v26  ;;  %v5023_v59 = vmax.f32 %v1679_v49, %v1687_v63  ;;  %1484 = vmatmul.bf16.vlgmr.msra.gmra.mxu3 %v1404_v12 }
 0x122   : > { %v1079_v45 = vsel %vm4988_vm11, %v1078_v35, %v1074_v10  ;;  %v5025_v9 = vmin.f32 %v1751_v17, %v1759_v24  ;;  %1561 = vmatmul.bf16.vlgmr.msrb.gmra.mxu0 %v1411_v62  ;;  %v1023_v35 = vsub.f32 0.0, %v1015_v58  ;;  %v5029_v20 = vadd.f32 1.0, %v4206_v56  ;;  %2324 = vmatpush.bf16.msra.mxu3 %v3786_v29 }
 0x123   : > { %v5027_v41 = vpack.c.bf16 %v1079_v45, %v1079_v45  ;;  %v1083_v61 = vsub.f32 1.0, %v1082_v46  ;;  %v1232_v8 = vsub.f32 0.0, %v1224_v23  ;;  %v5031_v51 = vadd.f32 1.0, %v4210_v32 }
 0x124   : > { %vm1087_vm11 = vweird.f32 %v4208_v21  ;;  %v1093_v17 = vor.u32 1.1754944e-38, %v1092_v53  ;;  %v5042_v56 = vpop.eup %4211  ;;  %vm5046_vm7 = vcmp.eq.f32.partialorder %v1268_v5, 8.507059e+37  ;;  %v1689_v60 = vrot.slane %v5023_v59, 2 }
 0x125   : > { %v1672_v50 = vsel %vm4573_vm12, 0, %v5027_v41  ;;  %v1744_v49 = vsel %vm4573_vm12, 1065369472, %v5027_v41  ;;  %v1084_v18 = vmul.f32 %v4208_v21, %v1083_v61  ;;  %v1245_v0 = vmul.f32 1.442695, %v1232_v8  ;;  %vm1088_vm13 = vmor %vm1086_vm0, %vm1087_vm11 }
 0x126   : > { %v1680_v63 = vunpack.c.l.bf16 %v1672_v50  ;;  %v1752_v24 = vunpack.c.l.bf16 %v1744_v49  ;;  %v865_v3 = vpop.f32.mrf.mxu0  ;;  %4215 = vrcp.f32 %v5031_v51  ;;  %v1035_v34 = vmul.f32 1.442695, %v1023_v35  ;;  %v4214_v53 = vpop.eup %4213  ;;  %2325 = vmatpush.bf16.msra.mxu3 %v3778_v25 }
 0x127   : > { %4217 = vrcp.f32 %v5029_v20  ;;  %v1085_v58 = vadd.f32 %v4208_v21, %v1084_v18  ;;  %v1263_v5 = vadd.f32 %v4940_v57, %v4997_v40  ;;  %vm1265_vm6 = vweird.f32 %v4940_v57 }
 0x128   : > { %v1693_v10 = vrot.slane %v1680_v63, 4  ;;  %v1765_v12 = vrot.slane %v1752_v24, 4  ;;  %v1107_v62 = vand.u32 2147483648, %v5031_v51  ;;  %v1217_v45 = vadd.f32 %v4967_v52, %v865_v3  ;;  %vm5075_vm0 = vmor %vm1264_vm3, %vm1265_vm6 }
 0x129   : > { %v1089_v46 = vsel %vm1088_vm13, %v4208_v21, %v1085_v58  ;;  %4219 = vpow2.f32 %v1245_v0  ;;  %v1105_v33 = vand.u32 2147483647, %v5031_v51  ;;  %v1271_v25 = vor.u32 1.1754944e-38, %v5879_v13  ;;  %v928_v58 = vpop.f32.mrf.mxu1  ;;  %v3759_v13 = vld [vmem:[#allocation5 + $0x58] sm:$0xf0] }
 0x12a   : > { %v5068_v40 = vadd.f32 1.0, %v4214_v53  ;;  %v1094_v23 = vsel %vm5017_vm2, %v1093_v17, %v1089_v46  ;;  %v1225_v32 = vadd.f32 %v1217_v45, %v4847_v44  ;;  %4221 = vpow2.f32 %v1035_v34 }
 0x12b   : > { %v5079_v52 = vpack.c.bf16 %v1094_v23, %v1094_v23  ;;  %vm1101_vm13 = vweird.f32 %v5031_v51  ;;  %v5882_v21 = vor.u32 %v4946_v19, %v4948_v43  ;;  %v1267_v14 = vsel %vm5075_vm0, %v4940_v57, %v1263_v5 }
 0x12c   : > { %v1277_v35 = vmul.f32 %v4979_v31, %v1276_v30  ;;  %v4216_v61 = vpop.eup %4215  ;;  %v5089_v26 = vmax.f32 %v1680_v63, %v1693_v10  ;;  %v5091_v8 = vmin.f32 %v1752_v24, %v1765_v12  ;;  %v1108_v50 = vor.u32 1.1754944e-38, %v1107_v62 }
 0x12d   : > { %2326 = vmatpush.bf16.msra.mxu3 %v5882_v21  ;;  %v1233_v49 = vsub.f32 0.0, %v1225_v32  ;;  %v5093_v17 = vpop.eup %4217  ;;  %v1673_v19 = vsel %vm4585_vm14, 0, %v5079_v52  ;;  %v1745_v43 = vsel %vm4585_vm14, 1065369472, %v5079_v52  ;;  %v1097_v57 = vmul.f32 %v4216_v61, %v5031_v51  ;;  %v952_v21 = vpop.f32.mrf.mxu2 }
 0x12e   : > { %vm5102_vm2 = vcmp.eq.f32.partialorder %v1105_v33, 8.507059e+37  ;;  %vm1280_vm3 = vweird.f32 %v4979_v31  ;;  %4223 = vrcp.f32 %v5068_v40  ;;  %v1272_v24 = vsel %vm5046_vm7, %v1271_v25, %v1267_v14  ;;  %v4057_v33 = vld [vmem:[#allocation5 + $0x54] sm:$0xf] }
 0x12f   : > { %v1247_v63 = vmul.f32 1.442695, %v1233_v49  ;;  %v1278_v18 = vadd.f32 %v4979_v31, %v1277_v35  ;;  %v4220_v0 = vpop.eup %4219  ;;  %v1098_v3 = vsub.f32 1.0, %v1097_v57  ;;  %vm1279_vm11 = vweird.f32 %v4933_v7 }
 0x130   : > { %v1283_v34 = vand.u32 2147483647, %v4933_v7  ;;  %v1285_v53 = vand.u32 2147483648, %v4933_v7  ;;  %v4222_v5 = vpop.eup %4221  ;;  %v1695_v10 = vrot.slane %v5089_v26, 2  ;;  %v1681_v12 = vunpack.c.l.bf16 %v1673_v19  ;;  %vm5119_vm7 = vmor %vm1279_vm11, %vm1280_vm3 }
 0x131   : > { %v5115_v62 = vunpack.c.l.bf16 %v1745_v43  ;;  %4225 = vpow2.f32 %v1247_v63  ;;  %v1099_v45 = vmul.f32 %v4216_v61, %v1098_v3  ;;  %vm1102_vm6 = vweird.f32 %v4216_v61  ;;  %1997 = vmatmul.bf16.vlgmr.msrb.gmra.mxu3 %v4907_v54 }
 0x132   : > { %v5123_v46 = vadd.f32 1.0, %v4222_v5  ;;  %v1282_v7 = vsel %vm5119_vm7, %v4979_v31, %v1278_v18  ;;  %v5129_v23 = vadd.f32 1.0, %v4220_v0  ;;  %v1286_v32 = vor.u32 1.1754944e-38, %v1285_v53  ;;  %vm1103_vm3 = vmor %vm1101_vm13, %vm1102_vm6 }
 0x133   : > { %v1178_v6 = vadd.f32 %v928_v58, %v4809_v47  ;;  %v1100_v14 = vadd.f32 %v4216_v61, %v1099_v45  ;;  %vm1284_vm0 = vcmp.eq.f32.partialorder %v1283_v34, 8.507059e+37  ;;  %v1389_v35 = vpack.c.bf16 %v1272_v24, %v1272_v24  ;;  %v867_v47 = vpop.f32.mrf.mxu0 }
 0x134   : > { %4227 = vrcp.f32 %v5123_v46  ;;  %v5134_v49 = vpop.eup %4223  ;;  %v1699_v31 = vrot.slane %v1681_v12, 4  ;;  %v1771_v19 = vrot.slane %v5115_v62, 4  ;;  %v1287_v43 = vsel %vm1284_vm0, %v1286_v32, %v1282_v7 }
 0x135   : > { %v3762_v57 = vor.u32 %v4057_v33, %v3759_v13  ;;  %v1104_v63 = vsel %vm1103_vm3, %v4216_v61, %v1100_v14  ;;  %v1122_v18 = vand.u32 2147483648, %v5123_v46  ;;  %v1390_v0 = vpack.c.bf16 %v1287_v43, %v1287_v43 }
 0x136   : > { %v1210_v3 = vadd.f32 %v4926_v37, %v1178_v6  ;;  %4229 = vrcp.f32 %v5129_v23  ;;  %v1109_v24 = vsel %vm5102_vm2, %v1108_v50, %v1104_v63  ;;  %v1120_v53 = vand.u32 2147483647, %v5123_v46 }
 0x137   : > { %v4226_v34 = vpop.eup %4225  ;;  %2327 = vmatpush.bf16.msra.mxu3 %v3762_v57  ;;  %v998_v51 = vadd.f32 %v4870_v4, %v4824_v15  ;;  %v5148_v58 = vpack.c.bf16 %v1109_v24, %v1109_v24  ;;  %v2462_v61 = vunpack.c.l.b16 %v1389_v35  ;;  %v2463_v5 = vunpack.c.l.b16 %v1390_v0  ;;  %v4055_v35 = vld [vmem:[#allocation5 + $0x44] sm:$0xf]  ;;  %v955_v0 = vpop.f32.mrf.mxu2 }
 0x138   : > { %v1218_v38 = vadd.f32 %v1210_v3, %v867_v47  ;;  %v5150_v45 = vmax.f32 %v1681_v12, %v1699_v31  ;;  %v5152_v37 = vadd.f32 1.0, %v4226_v34  ;;  %v1290_v30 = vmul.f32 %v5042_v56, %v4993_v36  ;;  %v3751_v31 = vld [vmem:[#allocation5 + $0x48] sm:$0xf0] }
 0x139   : > { %v1006_v7 = vadd.f32 %v998_v51, %v952_v21  ;;  %vm1116_vm13 = vweird.f32 %v5123_v46  ;;  %v1123_v33 = vor.u32 1.1754944e-38, %v1122_v18  ;;  %v2470_v13 = vpack.c.b16 %v2463_v5, %v2462_v61  ;;  %v4053_v18 = vld [vmem:[#allocation5 + $0x34] sm:$0xf] }
 0x13a   : > { %v4228_v50 = vpop.eup %4227  ;;  %v999_v4 = vadd.f32 %v4893_v55, %v4824_v15  ;;  %v1746_v32 = vsel %vm4599_vm15, 1065369472, %v5148_v58  ;;  %vm5163_vm2 = vcmp.eq.f32.partialorder %v1120_v53, 8.507059e+37  ;;  %vm1294_vm11 = vweird.f32 %v4993_v36  ;;  %v3743_v53 = vld [vmem:[#allocation5 + $0x38] sm:$0xf0] }
 0x13b   : > { %v1112_v12 = vmul.f32 %v4228_v50, %v5123_v46  ;;  %vm1295_vm7 = vweird.f32 %v5042_v56  ;;  %v1674_v21 = vsel %vm4599_vm15, 0, %v5148_v58  ;;  %2518 = vmatmul.bf16.vlgmr.msrb.gmra.mxu1 %v2470_v13  ;;  %v1226_v55 = vadd.f32 %v1218_v38, %v4847_v44 }
 0x13c   : > { %v1016_v14 = vadd.f32 %v4847_v44, %v1006_v7  ;;  %v1291_v43 = vsub.f32 1.0, %v1290_v30  ;;  %v5174_v57 = vpop.eup %4229  ;;  %4231 = vrcp.f32 %v5152_v37  ;;  %v3754_v63 = vor.u32 %v4055_v35, %v3751_v31  ;;  %v4051_v35 = vld [vmem:[#allocation5 + $0x24] sm:$0xf]  ;;  %vm5188_vm0 = vmor %vm1294_vm11, %vm1295_vm7 }
 0x13d   : > { %v1113_v47 = vsub.f32 1.0, %v1112_v12  ;;  %v1300_v3 = vand.u32 2147483648, %v4993_v36  ;;  %v1234_v34 = vsub.f32 0.0, %v1226_v55  ;;  %v1007_v51 = vadd.f32 %v999_v4, %v955_v0 }
 0x13e   : > { %v1024_v24 = vsub.f32 0.0, %v1016_v14  ;;  %v1292_v61 = vmul.f32 %v5042_v56, %v1291_v43  ;;  %vm1117_vm6 = vweird.f32 %v4228_v50  ;;  %2328 = vmatpush.bf16.msra.mxu3 %v3754_v63  ;;  %v3746_v38 = vor.u32 %v4053_v18, %v3743_v53  ;;  %v3735_v14 = vld [vmem:[#allocation5 + $0x28] sm:$0xf0]  ;;  %v4049_v53 = vld [vmem:[#allocation5 + $0x14] sm:$0xf] }
 0x13f   : > { %v1114_v5 = vmul.f32 %v4228_v50, %v1113_v47  ;;  %v1298_v7 = vand.u32 2147483647, %v4993_v36  ;;  %v1249_v30 = vmul.f32 1.442695, %v1234_v34  ;;  %v1017_v12 = vadd.f32 %v4847_v44, %v1007_v51  ;;  %vm1118_vm3 = vmor %vm1116_vm13, %vm1117_vm6  ;;  %v3727_v51 = vld [vmem:[#allocation5 + $0x18] sm:$0xf0] }
 0x140   : > { %v1037_v13 = vmul.f32 1.442695, %v1024_v24  ;;  %v1293_v31 = vadd.f32 %v5042_v56, %v1292_v61  ;;  %v5182_v25 = vunpack.c.l.bf16 %v1674_v21  ;;  %v1301_v43 = vor.u32 1.1754944e-38, %v1300_v3 }
 0x141   : > { %v1115_v55 = vadd.f32 %v4228_v50, %v1114_v5  ;;  %v1305_v47 = vmul.f32 %v5093_v17, %v5029_v20  ;;  %4233 = vpow2.f32 %v1249_v30  ;;  %v1025_v21 = vsub.f32 0.0, %v1017_v12 }
 0x142   : > { %v1297_v63 = vsel %vm5188_vm0, %v5042_v56, %v1293_v31  ;;  %vm1299_vm9 = vcmp.eq.f32.partialorder %v1298_v7, 8.507059e+37  ;;  %v5200_v36 = vpop.eup %4231  ;;  %4235 = vpow2.f32 %v1037_v13  ;;  %2329 = vmatpush.bf16.msra.mxu3 %v3746_v38  ;;  %v3738_v0 = vor.u32 %v4051_v35, %v3735_v14  ;;  %v957_v38 = vpop.f32.mrf.mxu2 }
 0x143   : > { %v1119_v18 = vsel %vm1118_vm3, %v4228_v50, %v1115_v55  ;;  %v1306_v3 = vsub.f32 1.0, %v1305_v47  ;;  %v1039_v24 = vmul.f32 1.442695, %v1025_v21  ;;  %v1302_v46 = vsel %vm1299_vm9, %v1301_v43, %v1297_v63 }
 0x144   : > { %v1124_v34 = vsel %vm5163_vm2, %v1123_v33, %v1119_v18  ;;  %vm1310_vm13 = vweird.f32 %v5093_v17  ;;  %v1313_v5 = vand.u32 2147483647, %v5029_v20  ;;  %v1315_v50 = vand.u32 2147483648, %v5029_v20 }
 0x145   : > { %v5205_v61 = vpack.c.bf16 %v1124_v34, %v1124_v34  ;;  %v1307_v56 = vmul.f32 %v5093_v17, %v1306_v3  ;;  %v5213_v6 = vmin.f32 %v5115_v62, %v1771_v19  ;;  %v5219_v33 = vunpack.c.l.bf16 %v1746_v32 }
 0x146   : > { %4237 = vpow2.f32 %v1039_v24  ;;  %v1000_v7 = vadd.f32 %v4916_v27, %v4824_v15  ;;  %v1705_v30 = vrot.slane %v5182_v25, 4  ;;  %2330 = vmatpush.bf16.msra.mxu3 %v3738_v0  ;;  %vm1309_vm9 = vweird.f32 %v5029_v20 }
 0x147   : > { %v1308_v13 = vadd.f32 %v5093_v17, %v1307_v56  ;;  %v3730_v12 = vor.u32 %v4049_v53, %v3727_v51  ;;  %v4234_v62 = vpop.eup %4233  ;;  %v1675_v19 = vsel %vm4612_vm1, 0, %v5205_v61  ;;  %vm1311_vm2 = vmor %vm1309_vm9, %vm1310_vm13  ;;  %v1316_v32 = vor.u32 1.1754944e-38, %v1315_v50  ;;  %v4040_v53 = vld [vmem:[#allocation2 + $0x1dc] sm:$0xff] }
 0x148   : > { %v1391_v35 = vpack.c.bf16 %v1302_v46, %v1302_v46  ;;  %v1008_v31 = vadd.f32 %v1000_v7, %v957_v38  ;;  %v4236_v15 = vpop.eup %4235  ;;  %v1747_v27 = vsel %vm4612_vm1, 1065369472, %v5205_v61  ;;  %vm1314_vm11 = vcmp.eq.f32.partialorder %v1313_v5, 8.507059e+37  ;;  %v4032_v46 = vld [vmem:[#allocation2 + $0x19c] sm:$0xff]  ;;  %v4031_v7 = vld [vmem:[#allocation2 + $0x194] sm:$0xff]  ;;  %2099 = vmatpush.bf16.msra.mxu0 %v4040_v53 }
 0x149   : > { %v1312_v55 = vsel %vm1311_vm2, %v5093_v17, %v1308_v13  ;;  %v1320_v20 = vmul.f32 %v5134_v49, %v5068_v40  ;;  %v5237_v14 = vadd.f32 1.0, %v4234_v62  ;;  %v5239_v4 = vadd.f32 1.0, %v4236_v15  ;;  %1928 = vmatpush.bf16.msrb.mxu2 %v4032_v46  ;;  %v4039_v62 = vld [vmem:[#allocation2 + $0x1d4] sm:$0xff]  ;;  %v4038_v46 = vld [vmem:[#allocation2 + $0x1cc] sm:$0xff] }
 0x14a   : > { %v1317_v43 = vsel %vm1314_vm11, %v1316_v32, %v1312_v55  ;;  %v1018_v47 = vadd.f32 %v4847_v44, %v1008_v31  ;;  %v5243_v63 = vunpack.c.l.bf16 %v1675_v19  ;;  %2331 = vmatpush.bf16.msra.mxu3 %v3730_v12  ;;  %v5245_v17 = vunpack.c.l.bf16 %v1747_v27 }
 0x14b   : > { %v1392_v18 = vpack.c.bf16 %v1317_v43, %v1317_v43  ;;  %v1321_v0 = vsub.f32 1.0, %v1320_v20  ;;  %4239 = vrcp.f32 %v5239_v4  ;;  %v1137_v34 = vand.u32 2147483648, %v5239_v4 }
 0x14c   : > { %v4238_v3 = vpop.eup %4237  ;;  %v1328_v24 = vand.u32 2147483647, %v5068_v40  ;;  %v1026_v56 = vsub.f32 0.0, %v1018_v47  ;;  %4241 = vrcp.f32 %v5237_v14  ;;  %v2464_v50 = vunpack.c.l.b16 %v1391_v35  ;;  %2100 = vmatpush.bf16.msra.mxu0 %v4039_v62  ;;  %v4029_v62 = vld [vmem:[#allocation2 + $0x184] sm:$0xff] }
 0x14d   : > { %v5250_v51 = vadd.f32 1.0, %v4238_v3  ;;  %v2465_v44 = vunpack.c.l.b16 %v1392_v18  ;;  %v1322_v5 = vmul.f32 %v5134_v49, %v1321_v0  ;;  %2332 = vmatmul.bf16.vlgmr.msra.gmra.mxu3 %v4907_v54  ;;  %vm1325_vm7 = vweird.f32 %v5134_v49  ;;  %1929 = vmatpush.bf16.msrb.mxu2 %v4031_v7  ;;  %v4030_v18 = vld [vmem:[#allocation2 + $0x18c] sm:$0xff] }
 0x14e   : > { %v1330_v38 = vand.u32 2147483648, %v5068_v40  ;;  %v1135_v13 = vand.u32 2147483647, %v5239_v4  ;;  %vm1324_vm6 = vweird.f32 %v5068_v40  ;;  %v5261_v19 = vor.u32 1.1754944e-38, %v1137_v34 }
 0x14f   : > { %4243 = vrcp.f32 %v5250_v51  ;;  %v1152_v12 = vand.u32 2147483648, %v5250_v51  ;;  %v2471_v32 = vpack.c.b16 %v2465_v44, %v2464_v50  ;;  %v1041_v35 = vmul.f32 1.442695, %v1026_v56  ;;  %vm1326_vm3 = vmor %vm1324_vm6, %vm1325_vm7 }
 0x150   : > { %v1323_v31 = vadd.f32 %v5134_v49, %v1322_v5  ;;  %v1150_v15 = vand.u32 2147483647, %v5250_v51  ;;  %vm1329_vm13 = vcmp.eq.f32.partialorder %v1328_v24, 8.507059e+37  ;;  %v1331_v27 = vor.u32 1.1754944e-38, %v1330_v38  ;;  %2101 = vmatpush.bf16.msra.mxu0 %v4038_v46 }
 0x151   : > { %v1335_v40 = vmul.f32 %v5174_v57, %v5129_v23  ;;  %v5270_v55 = vpop.eup %4239  ;;  %v5272_v20 = vor.u32 1.1754944e-38, %v1152_v12  ;;  %2523 = vmatmul.bf16.gmra.mxu1 %v2471_v32  ;;  %4245 = vpow2.f32 %v1041_v35  ;;  %v1343_v47 = vand.u32 2147483647, %v5129_v23  ;;  %1930 = vmatpush.bf16.msrb.mxu2 %v4030_v18 }
 0x152   : > { %v1327_v43 = vsel %vm1326_vm3, %v5134_v49, %v1323_v31  ;;  %v1127_v0 = vmul.f32 %v5270_v55, %v5239_v4  ;;  %vm5278_vm9 = vcmp.eq.f32.partialorder %v1135_v13, 8.507059e+37  ;;  %vm1339_vm2 = vweird.f32 %v5129_v23  ;;  %v5283_v53 = vpop.eup %4241 }
 0x153   : > { %v1332_v34 = vsel %vm1329_vm13, %v1331_v27, %v1327_v43  ;;  %v1336_v24 = vsub.f32 1.0, %v1335_v40  ;;  %vm1132_vm11 = vweird.f32 %v5270_v55  ;;  %vm1340_vm6 = vweird.f32 %v5174_v57  ;;  %v4037_v40 = vld [vmem:[#allocation2 + $0x1c4] sm:$0xff] }
 0x154   : > { %v1345_v49 = vand.u32 2147483648, %v5129_v23  ;;  %v1350_v44 = vmul.f32 %v5200_v36, %v5152_v37  ;;  %v1128_v5 = vsub.f32 1.0, %v1127_v0  ;;  %vm5294_vm3 = vcmp.eq.f32.partialorder %v1343_v47, 8.507059e+37  ;;  %vm1341_vm13 = vmor %vm1339_vm2, %vm1340_vm6  ;;  %2102 = vmatpush.bf16.msra.mxu0 %v4037_v40 }
 0x155   : > { %v5291_v56 = vpop.eup %4243  ;;  %v1337_v50 = vmul.f32 %v5174_v57, %v1336_v24  ;;  %v1393_v7 = vpack.c.bf16 %v1332_v34, %v1332_v34  ;;  %vm5301_vm8 = vcmp.eq.f32.partialorder %v1150_v15, 8.507059e+37  ;;  %v1358_v27 = vand.u32 2147483647, %v5152_v37  ;;  %1931 = vmatpush.bf16.msrb.mxu2 %v4029_v62 }
 0x156   : > { %v1142_v13 = vmul.f32 %v5291_v56, %v5250_v51  ;;  %v1129_v32 = vmul.f32 %v5270_v55, %v1128_v5  ;;  %v1351_v31 = vsub.f32 1.0, %v1350_v44  ;;  %v1346_v47 = vor.u32 1.1754944e-38, %v1345_v49 }
 0x157   : > { %v1338_v35 = vadd.f32 %v5174_v57, %v1337_v50  ;;  %v4246_v43 = vpop.eup %4245  ;;  %v1360_v18 = vand.u32 2147483648, %v5152_v37  ;;  %v1365_v0 = vmul.f32 %v5283_v53, %v5237_v14  ;;  %vm5897_vm7 = vweird.f32 %v5239_v4  ;;  %v4028_v50 = vld [vmem:[#allocation2 + $0x17c] sm:$0xff] }
 0x158   : > { %v1143_v15 = vsub.f32 1.0, %v1142_v13  ;;  %v1130_v34 = vadd.f32 %v5270_v55, %v1129_v32  ;;  %v5318_v24 = vadd.f32 1.0, %v4246_v43  ;;  %v1352_v44 = vmul.f32 %v5200_v36, %v1351_v31  ;;  %vm1133_vm0 = vmor %vm5897_vm7, %vm1132_vm11  ;;  %v4036_v32 = vld [vmem:[#allocation2 + $0x1bc] sm:$0xff]  ;;  %v4027_v31 = vld [vmem:[#allocation2 + $0x174] sm:$0xff] }
 0x159   : > { %v1342_v46 = vsel %vm1341_vm13, %v5174_v57, %v1338_v35  ;;  %v2466_v5 = vunpack.c.l.b16 %v1393_v7  ;;  %vm1369_vm2 = vweird.f32 %v5237_v14  ;;  %vm5332_vm6 = vcmp.eq.f32.partialorder %v1358_v27, 8.507059e+37  ;;  %v5343_v43 = vld [vmem:[#allocation5 + $0x84] sm:$0xf0]  ;;  %1932 = vmatpush.bf16.msrb.mxu2 %v4028_v50  ;;  %2103 = vmatpush.bf16.msra.mxu0 %v4036_v32  ;;  %v5412_v57 = vld [vmem:[#allocation5 + $0x50] sm:$0xf] }
 0x15a   : > { %v1144_v23 = vmul.f32 %v5291_v56, %v1143_v15  ;;  %v1347_v49 = vsel %vm5294_vm3, %v1346_v47, %v1342_v46  ;;  %v1134_v13 = vsel %vm1133_vm0, %v5270_v55, %v1130_v34  ;;  %4247 = vrcp.f32 %v5318_v24  ;;  %v5341_v55 = vld [vmem:[#allocation5 + $0x80] sm:$0xf]  ;;  %v5359_v34 = vld [vmem:[#allocation5 + $0x104] sm:$0xf0] }
 0x15b   : > { %v1361_v4 = vor.u32 1.1754944e-38, %v1360_v18  ;;  %v1139_v38 = vsel %vm5278_vm9, %v5261_v19, %v1134_v13  ;;  %v1167_v62 = vand.u32 2147483648, %v5318_v24  ;;  %v1394_v35 = vpack.c.bf16 %v1347_v49, %v1347_v49  ;;  %v4035_v47 = vld [vmem:[#allocation2 + $0x1b4] sm:$0xff]  ;;  %v5379_v13 = vld [vmem:[#allocation5 + $0xf0] sm:$0xf] }
 0x15c   : > { %v1145_v7 = vadd.f32 %v5291_v56, %v1144_v23  ;;  %v5345_v27 = vpack.c.bf16 %v1139_v38, %v1139_v38  ;;  %vm5900_vm0 = vweird.f32 %v5291_v56  ;;  %vm5901_vm11 = vweird.f32 %v5250_v51  ;;  %v5357_v18 = vld [vmem:[#allocation5 + $0x100] sm:$0xf] }
 0x15d   : > { %vm5351_vm7 = vmor %vm5901_vm11, %vm5900_vm0  ;;  %v1165_v19 = vand.u32 2147483647, %v5318_v24  ;;  %v1353_v3 = vadd.f32 %v5200_v36, %v1352_v44  ;;  %v1366_v15 = vsub.f32 1.0, %v1365_v0  ;;  %v5364_v23 = vor.u32 1.1754944e-38, %v1167_v62  ;;  %v5375_v0 = vld [vmem:[#allocation5 + $0x70] sm:$0xf]  ;;  %1933 = vmatpush.bf16.msrb.mxu2 %v4027_v31  ;;  %2104 = vmatpush.bf16.msra.mxu0 %v4035_v47 }
 0x15e   : > { %v1149_v46 = vsel %vm5351_vm7, %v5291_v56, %v1145_v7  ;;  %v2467_v51 = vunpack.c.l.b16 %v1394_v35  ;;  %vm5904_vm9 = vweird.f32 %v5200_v36  ;;  %vm5905_vm3 = vweird.f32 %v5152_v37  ;;  %v5377_v44 = vld [vmem:[#allocation5 + $0x74] sm:$0xf0]  ;;  %v5391_v62 = vld [vmem:[#allocation5 + $0x60] sm:$0xf]  ;;  %v5393_v35 = vld [vmem:[#allocation5 + $0x64] sm:$0xf0] }
 0x15f   : > { %vm5370_vm13 = vmor %vm5905_vm3, %vm5904_vm9  ;;  %vm1370_vm0 = vweird.f32 %v5283_v53  ;;  %v5381_v56 = vld [vmem:[#allocation5 + $0xf4] sm:$0xf0]  ;;  %v1154_v38 = vsel %vm5301_vm8, %v5272_v20, %v1149_v46  ;;  %v1367_v7 = vmul.f32 %v5283_v53, %v1366_v15  ;;  %v1373_v50 = vand.u32 2147483647, %v5237_v14 }
 0x160   : > { %v1357_v37 = vsel %vm5370_vm13, %v5200_v36, %v1353_v3  ;;  %v5395_v40 = vpack.c.bf16 %v1154_v38, %v1154_v38  ;;  %vm1161_vm11 = vweird.f32 %v5318_v24  ;;  %v2472_v21 = vpack.c.b16 %v2467_v51, %v2466_v5  ;;  %v5401_v36 = vld [vmem:[#allocation5 + $0xe0] sm:$0xf]  ;;  %v5403_v3 = vld [vmem:[#allocation5 + $0xe4] sm:$0xf0]  ;;  %v4248_v15 = vpop.eup %4247  ;;  %v4026_v38 = vld [vmem:[#allocation2 + $0x16c] sm:$0xff] }
 0x161   : > { %v1362_v20 = vsel %vm5332_vm6, %v1361_v4, %v1357_v37  ;;  %v1375_v12 = vand.u32 2147483648, %v5237_v14  ;;  %v1368_v32 = vadd.f32 %v5283_v53, %v1367_v7  ;;  %vm5406_vm8 = vcmp.eq.f32.partialorder %v1373_v50, 8.507059e+37  ;;  %v5414_v4 = vld [vmem:[#allocation5 + $0x54] sm:$0xf0]  ;;  %vm1371_vm9 = vmor %vm1369_vm2, %vm1370_vm0  ;;  %1934 = vmatpush.bf16.msrb.mxu2 %v4026_v38 }
 0x162   : > { %v1395_v49 = vpack.c.bf16 %v1362_v20, %v1362_v20  ;;  %v3782_v5 = vor.u32 %v5343_v43, %v5341_v55  ;;  %v1157_v51 = vmul.f32 %v4248_v15, %v5318_v24  ;;  %vm1162_vm6 = vweird.f32 %v4248_v15  ;;  %2528 = vmatmul.bf16.gmra.mxu1 %v2472_v21  ;;  %v5427_v43 = vld [vmem:[#allocation5 + $0xd0] sm:$0xf]  ;;  %v5429_v50 = vld [vmem:[#allocation5 + $0xd4] sm:$0xf0] }
 0x163   : > { %vm5417_vm7 = vcmp.eq.f32.partialorder %v1165_v19, 8.507059e+37  ;;  %v1376_v7 = vor.u32 1.1754944e-38, %v1375_v12  ;;  %v3818_v55 = vor.u32 %v5359_v34, %v5357_v18  ;;  %v1372_v19 = vsel %vm1371_vm9, %v5283_v53, %v1368_v32  ;;  %v4034_v21 = vld [vmem:[#allocation2 + $0x1ac] sm:$0xff]  ;;  %vm1163_vm2 = vmor %vm1161_vm11, %vm1162_vm6 }
 0x164   : > { %v5432_v20 = vunpack.c.l.b16 %v1395_v49  ;;  %v3774_v29 = vor.u32 %v5377_v44, %v5375_v0  ;;  %v3814_v14 = vor.u32 %v5381_v56, %v5379_v13  ;;  %v1158_v31 = vsub.f32 1.0, %v1157_v51  ;;  %v4025_v56 = vld [vmem:[#allocation2 + $0x164] sm:$0xff]  ;;  %2105 = vmatpush.bf16.msra.mxu0 %v4034_v21 }
 0x165   : > { %v1377_v18 = vsel %vm5406_vm8, %v1376_v7, %v1372_v19  ;;  %v3766_v34 = vor.u32 %v5393_v35, %v5391_v62  ;;  %v1676_v44 = vsel %vm4640_vm4, 0, %v5345_v27  ;;  %v1677_v32 = vsel %vm4652_vm5, 0, %v5395_v40  ;;  %v4033_v7 = vld [vmem:[#allocation2 + $0x1a4] sm:$0xff]  ;;  %1935 = vmatpush.bf16.msrb.mxu2 %v4025_v56 }
 0x166   : > { %v1396_v12 = vpack.c.bf16 %v1377_v18, %v1377_v18  ;;  %v1159_v13 = vmul.f32 %v4248_v15, %v1158_v31  ;;  %v1684_v46 = vunpack.c.l.bf16 %v1676_v44  ;;  %v1690_v49 = vmax.f32 %v5023_v59, %v1689_v60 }
 0x167   : > { %v1685_v19 = vunpack.c.l.bf16 %v1677_v32  ;;  %v1696_v18 = vmax.f32 %v5089_v26, %v1695_v10  ;;  %v1701_v38 = vrot.slane %v5150_v45, 2  ;;  %v1706_v44 = vmax.f32 %v5182_v25, %v1705_v30 }
 0x168   : > { %v2469_v51 = vunpack.c.l.b16 %v1396_v12  ;;  %v1160_v31 = vadd.f32 %v4248_v15, %v1159_v13  ;;  %v1691_v0 = vrot.slane %v1690_v49, 1  ;;  %v1711_v47 = vrot.slane %v5243_v63, 4  ;;  %2106 = vmatpush.bf16.msra.mxu0 %v4033_v7 }
 0x169   : > { %v1697_v60 = vrot.slane %v1696_v18, 1  ;;  %v1702_v21 = vmax.f32 %v5150_v45, %v1701_v38  ;;  %v1717_v26 = vrot.slane %v1684_v46, 4  ;;  %v1707_v13 = vrot.slane %v1706_v44, 2  ;;  %2311 = vmatpush.bf16.msra.mxu2 %v3782_v5 }
 0x16a   : > { %v2473_v59 = vpack.c.b16 %v2469_v51, %v5432_v20  ;;  %v1164_v10 = vsel %vm1163_vm2, %v4248_v15, %v1160_v31  ;;  %v1692_v12 = vmax.f32 %v1690_v49, %v1691_v0  ;;  %v1712_v32 = vmax.f32 %v5243_v63, %v1711_v47 }
 0x16b   : > { %v1169_v25 = vsel %vm5417_vm7, %v5364_v23, %v1164_v10  ;;  %v1698_v30 = vmax.f32 %v1696_v18, %v1697_v60  ;;  %v1703_v24 = vrot.slane %v1702_v21, 1  ;;  %v1718_v53 = vmax.f32 %v1684_v46, %v1717_v26 }
 0x16c   : > { %v5474_v20 = vpack.c.bf16 %v1169_v25, %v1169_v25  ;;  %2425 = vmatpush.bf16.msrb.mxu0 %v3818_v55  ;;  %v1708_v45 = vmax.f32 %v1706_v44, %v1707_v13  ;;  %v1713_v51 = vrot.slane %v1712_v32, 2  ;;  %v1723_v15 = vrot.slane %v1685_v19, 4 }
 0x16d   : > { %v1704_v56 = vmax.f32 %v1702_v21, %v1703_v24  ;;  %v1719_v0 = vrot.slane %v1718_v53, 2  ;;  %v1735_v49 = vpack.c.bf16 %v1692_v12, %v1692_v12  ;;  %v1736_v38 = vpack.c.bf16 %v1698_v30, %v1698_v30  ;;  %2312 = vmatpush.bf16.msra.mxu2 %v3774_v29 }
 0x16e   : > { %vm5912_vm3 = vnez %v5866_v48  ;;  %v1709_v23 = vrot.slane %v1708_v45, 1  ;;  %v1714_v37 = vmax.f32 %v1712_v32, %v1713_v51  ;;  %v1724_v5 = vmax.f32 %v1685_v19, %v1723_v15 }
 0x16f   : > { %v1678_v63 = vsel %vm5912_vm3, 0, %v5474_v20  ;;  %v1720_v46 = vmax.f32 %v1718_v53, %v1719_v0  ;;  %v1737_v7 = vpack.c.bf16 %v1704_v56, %v1704_v56  ;;  %v1855_v18 = vperm.slane %v1735_v49, 0 }
 0x170   : > { %v1686_v47 = vunpack.c.l.bf16 %v1678_v63  ;;  %2426 = vmatpush.bf16.msrb.mxu0 %v3814_v14  ;;  %v1710_v55 = vmax.f32 %v1708_v45, %v1709_v23  ;;  %v1715_v31 = vrot.slane %v1714_v37, 1  ;;  %v1725_v44 = vrot.slane %v1724_v5, 2 }
 0x171   : > { %v1856_v60 = vperm.slane %v1736_v38, 0  ;;  %v1721_v21 = vrot.slane %v1720_v46, 1  ;;  %v1857_v10 = vperm.slane %v1737_v7, 0  ;;  %v1863_v12 = vunpack.c.l.b16 %v1855_v18  ;;  %2313 = vmatpush.bf16.msra.mxu2 %v3766_v34  ;;  %v5493_v34 = vpop.f32.mrf.mxu1 }
 0x172   : > { %v1729_v26 = vrot.slane %v1686_v47, 4  ;;  %2533 = vmatmul.bf16.gmra.mxu1 %v2473_v59  ;;  %v1716_v13 = vmax.f32 %v1714_v37, %v1715_v31  ;;  %v1726_v25 = vmax.f32 %v1724_v5, %v1725_v44  ;;  %v1738_v30 = vpack.c.bf16 %v1710_v55, %v1710_v55 }
 0x173   : > { %v1864_v32 = vunpack.c.l.b16 %v1856_v60  ;;  %v1722_v29 = vmax.f32 %v1720_v46, %v1721_v21  ;;  %v1865_v14 = vunpack.c.l.b16 %v1857_v10  ;;  %v1748_v19 = vsel %vm4640_vm4, 1065369472, %v5345_v27 }
 0x174   : > { %v1730_v53 = vmax.f32 %v1686_v47, %v1729_v26  ;;  %v5913_v24 = vor.u32 %v5403_v3, %v5401_v36  ;;  %v1727_v59 = vrot.slane %v1726_v25, 1  ;;  %v1739_v45 = vpack.c.bf16 %v1716_v13, %v1716_v13 }
 0x175   : > { %v1858_v51 = vperm.slane %v1738_v30, 0  ;;  %vm5914_vm13 = vcmask 1041409   ;;  %v1740_v0 = vpack.c.bf16 %v1722_v29, %v1722_v29  ;;  %vm5915_vm0 = vcmask 1042434  }
 0x176   : > { %2427 = vmatpush.bf16.msrb.mxu0 %v5913_v24  ;;  %v1871_v15 = vsel %vm5914_vm13, %v1864_v32, %v1863_v12  ;;  %v1731_v56 = vrot.slane %v1730_v53, 2  ;;  %v1749_v35 = vsel %vm4652_vm5, 1065369472, %v5395_v40  ;;  %v1728_v49 = vmax.f32 %v1726_v25, %v1727_v59  ;;  %vm5926_vm2 = vmmov %vm5914_vm13 }
 0x177   : > { %v1872_v62 = vsel %vm5915_vm0, %v1865_v14, %v1871_v15  ;;  %v1859_v38 = vperm.slane %v1739_v45, 0  ;;  %v1866_v63 = vunpack.c.l.b16 %v1858_v51  ;;  %v1750_v36 = vsel %vm5912_vm3, 1065369472, %v5474_v20  ;;  %vm5927_vm13 = vmmov %vm5915_vm0 }
 0x178   : > { %v5916_v3 = vor.u32 %v5414_v4, %v5412_v57  ;;  %v1732_v23 = vmax.f32 %v1730_v53, %v1731_v56  ;;  %v1860_v37 = vperm.slane %v1740_v0, 0  ;;  %v1756_v5 = vunpack.c.l.bf16 %v1748_v19 }
 0x179   : > { %v1757_v47 = vunpack.c.l.bf16 %v1749_v35  ;;  %v5917_v46 = vor.u32 %v5429_v50, %v5427_v43  ;;  %v1741_v7 = vpack.c.bf16 %v1728_v49, %v1728_v49  ;;  %v1867_v18 = vunpack.c.l.b16 %v1859_v38  ;;  %v1649_v51 = vpop.f32.mrf.mxu1 }
 0x17a   : > { %2314 = vmatpush.bf16.msra.mxu2 %v5916_v3  ;;  %vm5918_vm11 = vcmask 1043459   ;;  %v1758_v31 = vunpack.c.l.bf16 %v1750_v36  ;;  %v1733_v44 = vrot.slane %v1732_v23, 1  ;;  %v1868_v60 = vunpack.c.l.b16 %v1860_v37 }
 0x17b   : > { %2428 = vmatpush.bf16.msrb.mxu0 %v5917_v46  ;;  %v1873_v55 = vsel %vm5918_vm11, %v1866_v63, %v1872_v62  ;;  %v5919_v21 = vrot.slane %v5025_v9, 2  ;;  %v5920_v4 = vrot.slane %v5091_v8, 2  ;;  %v1861_v10 = vperm.slane %v1741_v7, 0  ;;  %vm5928_vm0 = vmmov %vm5918_vm11 }
 0x17c   : > { %vm5921_vm8 = vcmask 1044484   ;;  %v1773_v43 = vrot.slane %v5213_v6, 2  ;;  %v5922_v50 = vrot.slane %v5219_v33, 4  ;;  %v1734_v25 = vmax.f32 %v1732_v23, %v1733_v44 }
 0x17d   : > { %v1762_v57 = vmin.f32 %v5025_v9, %v5919_v21  ;;  %v1768_v26 = vmin.f32 %v5091_v8, %v5920_v4  ;;  %v1874_v12 = vsel %vm5921_vm8, %v1867_v18, %v1873_v55  ;;  %vm5923_vm6 = vcmask 1045509   ;;  %vm5929_vm11 = vmmov %vm5921_vm8 }
 0x17e   : > { %v1778_v13 = vmin.f32 %v5219_v33, %v5922_v50  ;;  %v1875_v30 = vsel %vm5923_vm6, %v1868_v60, %v1874_v12  ;;  %v1869_v53 = vunpack.c.l.b16 %v1861_v10  ;;  %v1774_v9 = vmin.f32 %v5213_v6, %v1773_v43  ;;  %vm5930_vm8 = vmmov %vm5923_vm6 }
 0x17f   : > { %v1763_v32 = vrot.slane %v1762_v57, 1  ;;  %v1769_v29 = vrot.slane %v1768_v26, 1  ;;  %v1783_v8 = vrot.slane %v5245_v17, 4  ;;  %v1742_v19 = vpack.c.bf16 %v1734_v25, %v1734_v25 }
 0x180   : > { %v1779_v14 = vrot.slane %v1778_v13, 2  ;;  %v1789_v45 = vrot.slane %v1756_v5, 4  ;;  %vm5924_vm7 = vcmask 1046534   ;;  %v1775_v56 = vrot.slane %v1774_v9, 1 }
 0x181   : > { %v1764_v24 = vmin.f32 %v1762_v57, %v1763_v32  ;;  %v1770_v59 = vmin.f32 %v1768_v26, %v1769_v29  ;;  %v1876_v15 = vsel %vm5924_vm7, %v1869_v53, %v1875_v30  ;;  %v1784_v0 = vmin.f32 %v5245_v17, %v1783_v8  ;;  %v3749_v30 = vld [vmem:[#allocation5 + $0x40] sm:$0xf]  ;;  %vm5931_vm6 = vmmov %vm5924_vm7 }
 0x182   : > { %v1780_v33 = vmin.f32 %v1778_v13, %v1779_v14  ;;  %v1862_v62 = vperm.slane %v1742_v19, 0  ;;  %v1790_v35 = vmin.f32 %v1756_v5, %v1789_v45  ;;  %v1795_v49 = vrot.slane %v1757_v47, 4  ;;  %v4072_v14 = vld [vmem:[#allocation5 + $0xc4] sm:$0xf0]  ;;  %v4054_v45 = vld [vmem:[#allocation5 + $0x34] sm:$0xf0] }
 0x183   : > { %v1801_v38 = vrot.slane %v1758_v31, 4  ;;  %v1776_v63 = vmin.f32 %v1774_v9, %v1775_v56  ;;  %v1785_v36 = vrot.slane %v1784_v0, 2  ;;  %v1807_v3 = vpack.c.bf16 %v1764_v24, %v1764_v24  ;;  %v3801_v9 = vld [vmem:[#allocation5 + $0xc0] sm:$0xf] }
 0x184   : > { %v1781_v6 = vrot.slane %v1780_v33, 1  ;;  %v1870_v23 = vunpack.c.l.b16 %v1862_v62  ;;  %v1791_v37 = vrot.slane %v1790_v35, 2  ;;  %v1796_v46 = vmin.f32 %v1757_v47, %v1795_v49  ;;  %v4056_v47 = vld [vmem:[#allocation5 + $0x44] sm:$0xf0] }
 0x185   : > { %v1802_v7 = vmin.f32 %v1758_v31, %v1801_v38  ;;  %v1786_v55 = vmin.f32 %v1784_v0, %v1785_v36  ;;  %v1808_v44 = vpack.c.bf16 %v1770_v59, %v1770_v59  ;;  %v1809_v60 = vpack.c.bf16 %v1776_v63, %v1776_v63  ;;  %v5522_v31 = vpop.f32.mrf.mxu1  ;;  %v3741_v59 = vld [vmem:[#allocation5 + $0x30] sm:$0xf]  ;;  %v4070_v63 = vld [vmem:[#allocation5 + $0xb4] sm:$0xf0] }
 0x186   : > { %v1782_v18 = vmin.f32 %v1780_v33, %v1781_v6  ;;  %vm5925_vm9 = vcmask 1047559   ;;  %v1792_v57 = vmin.f32 %v1790_v35, %v1791_v37  ;;  %v1797_v17 = vrot.slane %v1796_v46, 2  ;;  %v3797_v38 = vld [vmem:[#allocation5 + $0xb0] sm:$0xf] }
 0x187   : > { %v1877_v21 = vsel %vm5925_vm9, %v1870_v23, %v1876_v15  ;;  %v1803_v4 = vrot.slane %v1802_v7, 2  ;;  %v1787_v26 = vrot.slane %v1786_v55, 1  ;;  %v2026_v12 = vperm.slane %v1807_v3, 0  ;;  %vm5932_vm7 = vmmov %vm5925_vm9 }
 0x188   : > { %v1878_v5 = vpack.c.b16 %v1877_v21, %v1877_v21  ;;  %v1810_v10 = vpack.c.bf16 %v1782_v18, %v1782_v18  ;;  %v1793_v43 = vrot.slane %v1792_v57, 1  ;;  %v1798_v50 = vmin.f32 %v1796_v46, %v1797_v17  ;;  %v3733_v18 = vld [vmem:[#allocation5 + $0x20] sm:$0xf] }
 0x189   : > { %v1804_v13 = vmin.f32 %v1802_v7, %v1803_v4  ;;  %v2027_v25 = vperm.slane %v1808_v44, 0  ;;  %v1788_v32 = vmin.f32 %v1786_v55, %v1787_v26  ;;  %v2028_v29 = vperm.slane %v1809_v60, 0  ;;  %v4052_v55 = vld [vmem:[#allocation5 + $0x24] sm:$0xf0]  ;;  %v3793_v26 = vld [vmem:[#allocation5 + $0xa0] sm:$0xf] }
 0x18a   : > { %1936 = vmatmul.bf16.vlgmr.msrb.gmra.mxu2 %v1878_v5  ;;  %v2029_v53 = vperm.slane %v1810_v10, 0  ;;  %v1794_v8 = vmin.f32 %v1792_v57, %v1793_v43  ;;  %v1799_v19 = vrot.slane %v1798_v50, 1  ;;  %v2034_v15 = vunpack.c.l.b16 %v2026_v12  ;;  %v4068_v10 = vld [vmem:[#allocation5 + $0xa4] sm:$0xf0] }
 0x18b   : > { %v1805_v24 = vrot.slane %v1804_v13, 1  ;;  %v1811_v51 = vpack.c.bf16 %v1788_v32, %v1788_v32  ;;  %v2035_v56 = vunpack.c.l.b16 %v2027_v25  ;;  %v3750_v33 = vor.u32 %v4056_v47, %v3749_v30  ;;  %v3725_v47 = vld [vmem:[#allocation5 + $0x10] sm:$0xf]  ;;  %v4050_v32 = vld [vmem:[#allocation5 + $0x14] sm:$0xf0] }
 0x18c   : > { %v1800_v0 = vmin.f32 %v1798_v50, %v1799_v19  ;;  %v1812_v35 = vpack.c.bf16 %v1794_v8, %v1794_v8  ;;  %v2036_v49 = vunpack.c.l.b16 %v2028_v29  ;;  %v2037_v36 = vunpack.c.l.b16 %v2029_v53  ;;  %v4066_v8 = vld [vmem:[#allocation5 + $0x94] sm:$0xf0] }
 0x18d   : > { %v1806_v62 = vmin.f32 %v1804_v13, %v1805_v24  ;;  %v2030_v6 = vperm.slane %v1811_v51, 0  ;;  %2315 = vmatpush.bf16.msra.mxu2 %v3750_v33  ;;  %v3802_v3 = vor.u32 %v4072_v14, %v3801_v9  ;;  %v3742_v23 = vor.u32 %v4054_v45, %v3741_v59  ;;  %v2192_v12 = vpop.f32.mrf.mxu1  ;;  %v3789_v14 = vld [vmem:[#allocation5 + $0x90] sm:$0xf]  ;;  %v1567_v33 = vld [vmem:[#allocation2 + $0xe0] sm:$0x1] }
 0x18e   : > { %v1813_v37 = vpack.c.bf16 %v1800_v0, %v1800_v0  ;;  %v2031_v7 = vperm.slane %v1812_v35, 0  ;;  %v2042_v60 = vsel %vm5926_vm2, %v2035_v56, %v2034_v15  ;;  %v3798_v21 = vor.u32 %v4070_v63, %v3797_v38 }
 0x18f   : > { %v1814_v46 = vpack.c.bf16 %v1806_v62, %v1806_v62  ;;  %v2038_v44 = vunpack.c.l.b16 %v2030_v6  ;;  %2429 = vmatpush.bf16.msrb.mxu0 %v3802_v3  ;;  %v2043_v5 = vsel %vm5927_vm13, %v2036_v49, %v2042_v60  ;;  %v3734_v50 = vor.u32 %v4052_v55, %v3733_v18  ;;  %v4087_v60 = vld [vmem:[#allocation2 + $0x320] sm:$0xff] }
 0x190   : > { %v2032_v57 = vperm.slane %v1813_v37, 0  ;;  %v2039_v4 = vunpack.c.l.b16 %v2031_v7  ;;  %v2044_v43 = vsel %vm5928_vm0, %v2037_v36, %v2043_v5  ;;  %v3794_v53 = vor.u32 %v4068_v10, %v3793_v26  ;;  %v4083_v5 = vld [vmem:[#allocation2 + $0x300] sm:$0xff] }
 0x191   : > { %v2033_v17 = vperm.slane %v1814_v46, 0  ;;  %2316 = vmatpush.bf16.msra.mxu2 %v3742_v23  ;;  %v2045_v30 = vsel %vm5929_vm11, %v2038_v44, %v2044_v43  ;;  %v3726_v24 = vor.u32 %v4050_v32, %v3725_v47  ;;  %v3790_v45 = vor.u32 %v4066_v8, %v3789_v14  ;;  %v2539_v47 = vld [vmem:[#allocation2 + $0x1e8] sm:$0x1] }
 0x192   : > { %v2040_v13 = vunpack.c.l.b16 %v2032_v57  ;;  %v2046_v29 = vsel %vm5930_vm8, %v2039_v4, %v2045_v30  ;;  %v2362_v51 = vunpack.c.l.b16 %v5027_v41  ;;  %v2361_v56 = vunpack.c.l.b16 %v4973_v1  ;;  %v4084_v57 = vld [vmem:[#allocation2 + $0x308] sm:$0xff] }
 0x193   : > { %v2041_v25 = vunpack.c.l.b16 %v2033_v17  ;;  %2430 = vmatpush.bf16.msrb.mxu0 %v3798_v21  ;;  %v1568_v62 = vunpack.c.l.bf16 %v1567_v33  ;;  %v2367_v49 = vunpack.c.l.b16 %v5395_v40  ;;  %v2368_v38 = vunpack.c.l.b16 %v5474_v20  ;;  %v4085_v21 = vld [vmem:[#allocation2 + $0x310] sm:$0xff] }
 0x194   : > { %v2047_v9 = vsel %vm5931_vm6, %v2040_v13, %v2046_v29  ;;  %v2369_v0 = vpack.c.b16 %v2362_v51, %v2361_v56  ;;  %v2364_v41 = vunpack.c.l.b16 %v5148_v58  ;;  %v2363_v1 = vunpack.c.l.b16 %v5079_v52  ;;  %v4086_v58 = vld [vmem:[#allocation2 + $0x318] sm:$0xff] }
 0x195   : > { %v2048_v19 = vsel %vm5932_vm7, %v2041_v25, %v2047_v9  ;;  %2317 = vmatpush.bf16.msra.mxu2 %v3734_v50  ;;  %v2372_v36 = vpack.c.b16 %v2368_v38, %v2367_v49  ;;  %v2366_v18 = vunpack.c.l.b16 %v5345_v27  ;;  %v2365_v40 = vunpack.c.l.b16 %v5205_v61  ;;  %v2113_v50 = vld [vmem:[#allocation2 + $0x1e4] sm:$0x1]  ;;  %v4082_v38 = vld [vmem:[#allocation2 + $0x2f8] sm:$0xff] }
 0x196   : > { %v2049_v59 = vpack.c.b16 %v2048_v19, %v2048_v19  ;;  %v2370_v37 = vpack.c.b16 %v2364_v41, %v2363_v1  ;;  %v2114_v30 = vunpack.c.l.bf16 %v2113_v50  ;;  %v2588_v29 = vunpack.c.l.bf16 %v2539_v47 }
 0x197   : > { %2431 = vmatpush.bf16.msrb.mxu0 %v3794_v53  ;;  %v2371_v20 = vpack.c.b16 %v2366_v18, %v2365_v40  ;;  %v2194_v56 = vperm.slane %v5522_v31, 0 }
 0x198   : > { %2107 = vmatmul.bf16.vlgmr.msra.gmra.mxu0 %v2049_v59  ;;  %v2115_v14 = vperm.slane %v2114_v30, 0  ;;  %v5547_v59 = vperm.slane %v2588_v29, 0 }
 0x199   : > { %2318 = vmatpush.bf16.msra.mxu2 %v3726_v24 }
 0x19b   : > { %2432 = vmatpush.bf16.msrb.mxu0 %v3790_v45 }
 0x19c   : > { %2319 = vmatmul.bf16.vlgmr.msra.gmra.mxu2 %v4907_v54 }
 0x19f   : > { %v1562_v15 = vpop.f32.mrf.mxu0 }
 0x1a4   : > { %v1485_v35 = vpop.f32.mrf.mxu3 }
 0x1a5   : > { %v1566_v63 = vadd.f32 %v1562_v15, %v1485_v35 }
 0x1a7   : > { %v1564_v6 = vpop.f32.mrf.mxu0  ;;  %v1569_v3 = vadd.f32 %v1568_v62, %v1566_v63 }
 0x1a8   : > { %2433 = vmatmul.bf16.vlgmr.msrb.gmra.mxu0 %v2369_v0 }
 0x1a9   : > { %v1651_v54 = vadd.f32 %v5493_v34, %v1569_v3  ;;  %v4088_v34 = vld [vmem:[#allocation2 + $0x328] sm:$0xff]  ;;  %v4081_v3 = vld [vmem:[#allocation2 + $0x2f0] sm:$0xff] }
 0x1aa   : > { %3078 = vmatpush.bf16.msrb.mxu3 %v4088_v34 }
 0x1ab   : > { %v1652_v19 = vsub.f32 0.0, %v1651_v54 }
 0x1ac   : > { %v1487_v23 = vpop.f32.mrf.mxu3 }
 0x1ad   : > { %v1653_v33 = vmul.f32 1.442695, %v1652_v19 }
 0x1ae   : > { %3079 = vmatpush.bf16.msrb.mxu3 %v4087_v60 }
 0x1af   : > { %4249 = vpow2.f32 %v1653_v33 }
 0x1b2   : > { %3080 = vmatpush.bf16.msrb.mxu3 %v4086_v58 }
 0x1b4   : > { %v1998_v46 = vpop.f32.mrf.mxu3 }
 0x1b5   : > { %v4250_v23 = vpop.eup %4249 }
 0x1b6   : > { %3081 = vmatpush.bf16.msrb.mxu3 %v4085_v21 }
 0x1b8   : > { %2438 = vmatmul.bf16.gmra.mxu0 %v2370_v37  ;;  %v2519_v12 = vpop.f32.mrf.mxu1 }
 0x1ba   : > { %3082 = vmatpush.bf16.msrb.mxu3 %v4084_v57 }
 0x1bc   : > { %v2000_v7 = vpop.f32.mrf.mxu3 }
 0x1be   : > { %3083 = vmatpush.bf16.msrb.mxu3 %v4083_v5 }
 0x1c0   : > { %v2521_v24 = vpop.f32.mrf.mxu1 }
 0x1c2   : > { %3084 = vmatpush.bf16.msrb.mxu3 %v4082_v38 }
 0x1c6   : > { %3085 = vmatpush.bf16.msrb.mxu3 %v4081_v3 }
 0x1c8   : > { %2443 = vmatmul.bf16.gmra.mxu0 %v2371_v20 }
 0x1ce   : > { %v2524_v7 = vpop.f32.mrf.mxu1 }
 0x1d0   : > { %v5541_v55 = vpop.f32.mrf.mxu3 }
 0x1d8   : > { %2448 = vmatmul.bf16.gmra.mxu0 %v2372_v36  ;;  %v2335_v44 = vpop.f32.mrf.mxu3 }
 0x20d   : > { %v1937_v52 = vpop.f32.mrf.mxu2 }
 0x20e   : > { %v1999_v25 = vadd.f32 %v1998_v46, %v1937_v52  ;;  %v5554_v46 = vadd.f32 1.0, %v4250_v23 }
 0x210   : > { %vm1661_vm13 = vweird.f32 %v5554_v46 }
 0x215   : > { %v1939_v17 = vpop.f32.mrf.mxu2  ;;  %v2108_v27 = vpop.f32.mrf.mxu0 }
 0x216   : > { %v2112_v9 = vadd.f32 %v2108_v27, %v1999_v25  ;;  %v4112_v17 = vld [vmem:[#allocation2 + $0x2e8] sm:$0xff]  ;;  %v2526_v25 = vpop.f32.mrf.mxu1 }
 0x217   : > { %3274 = vmatpush.bf16.msra.mxu3 %v4112_v17 }
 0x218   : > { %v2116_v51 = vadd.f32 %v2115_v14, %v2112_v9 }
 0x21a   : > { %v2195_v0 = vadd.f32 %v2194_v56, %v2116_v51  ;;  %v4110_v56 = vld [vmem:[#allocation2 + $0x2d8] sm:$0xff] }
 0x21c   : > { %v2196_v35 = vsub.f32 0.0, %v2195_v0 }
 0x21d   : > { %v2110_v61 = vpop.f32.mrf.mxu0 }
 0x21e   : > { %v2197_v41 = vmul.f32 1.442695, %v2196_v35 }
 0x21f   : > { %v5543_v4 = vpop.f32.mrf.mxu2 }
 0x220   : > { %v2541_v10 = vrot.slane %v5543_v4, 1  ;;  %v2548_v49 = vperm.slane %v5543_v4, 0  ;;  %v2542_v63 = vrot.slane %v5543_v4, 2  ;;  %v2543_v27 = vrot.slane %v5543_v4, 3 }
 0x222   : > { %v2549_v13 = vperm.slane %v2541_v10, 0  ;;  %v2550_v54 = vperm.slane %v2542_v63, 0  ;;  %v4111_v10 = vld [vmem:[#allocation2 + $0x2e0] sm:$0xff]  ;;  %v2529_v63 = vpop.f32.mrf.mxu1 }
 0x223   : > { %3275 = vmatpush.bf16.msra.mxu3 %v4111_v10 }
 0x225   : > { %v2434_v26 = vpop.f32.mrf.mxu0 }
 0x226   : > { %v2564_v1 = vadd.f32 %v2548_v49, %v2434_v26 }
 0x227   : > { %v2322_v43 = vpop.f32.mrf.mxu2  ;;  %3276 = vmatpush.bf16.msra.mxu3 %v4110_v56 }
 0x228   : > { %v2572_v18 = vadd.f32 %v2564_v1, %v5541_v55  ;;  %v2545_v1 = vrot.slane %v5543_v4, 5 }
 0x22a   : > { %v2580_v34 = vadd.f32 %v2572_v18, %v2519_v12  ;;  %v2551_v12 = vperm.slane %v2543_v27, 0 }
 0x22c   : > { %v2590_v57 = vadd.f32 %v5547_v59, %v2580_v34 }
 0x22d   : > { %v2436_v32 = vpop.f32.mrf.mxu0 }
 0x22e   : > { %v2565_v53 = vadd.f32 %v2549_v13, %v2436_v32  ;;  %v2598_v43 = vsub.f32 0.0, %v2590_v57 }
 0x230   : > { %v2573_v8 = vadd.f32 %v2565_v53, %v5541_v55  ;;  %v2606_v29 = vmul.f32 1.442695, %v2598_v43 }
 0x232   : > { %v2581_v45 = vadd.f32 %v2573_v8, %v2521_v24 }
 0x234   : > { %v2591_v15 = vadd.f32 %v5547_v59, %v2581_v45  ;;  %v2544_v45 = vrot.slane %v5543_v4, 4 }
 0x235   : > { %v2439_v36 = vpop.f32.mrf.mxu0 }
 0x236   : > { %v2599_v62 = vsub.f32 0.0, %v2591_v15  ;;  %v2566_v37 = vadd.f32 %v2550_v54, %v2439_v36 }
 0x238   : > { %v2608_v6 = vmul.f32 1.442695, %v2599_v62  ;;  %v2574_v31 = vadd.f32 %v2566_v37, %v5541_v55  ;;  %v2552_v62 = vperm.slane %v2544_v45, 0 }
 0x23a   : > { %4251 = vpow2.f32 %v2608_v6  ;;  %v2582_v40 = vadd.f32 %v2574_v31, %v2524_v7  ;;  %v4109_v6 = vld [vmem:[#allocation2 + $0x2d0] sm:$0xff] }
 0x23b   : > { %4253 = vpow2.f32 %v2197_v41  ;;  %3277 = vmatpush.bf16.msra.mxu3 %v4109_v6 }
 0x23c   : > { %4255 = vrcp.f32 %v5554_v46  ;;  %v2592_v44 = vadd.f32 %v5547_v59, %v2582_v40 }
 0x23d   : > { %v2441_v26 = vpop.f32.mrf.mxu0 }
 0x23e   : > { %v2600_v60 = vsub.f32 0.0, %v2592_v44  ;;  %v2567_v50 = vadd.f32 %v2551_v12, %v2441_v26  ;;  %v1665_v44 = vand.u32 2147483647, %v5554_v46  ;;  %v2553_v12 = vperm.slane %v2545_v1, 0 }
 0x240   : > { %v4252_v20 = vpop.eup %4251  ;;  %v2610_v21 = vmul.f32 1.442695, %v2600_v60  ;;  %v2575_v30 = vadd.f32 %v2567_v50, %v5541_v55 }
 0x241   : > { %v4254_v58 = vpop.eup %4253  ;;  %v5559_v52 = vadd.f32 1.0, %v4252_v20 }
 0x242   : > { %v5563_v61 = vpop.eup %4255  ;;  %v5565_v5 = vadd.f32 1.0, %v4254_v58  ;;  %4257 = vpow2.f32 %v2610_v21  ;;  %v2583_v9 = vadd.f32 %v2575_v30, %v2526_v25  ;;  %v1667_v21 = vand.u32 2147483648, %v5554_v46  ;;  %v4108_v25 = vld [vmem:[#allocation2 + $0x2c8] sm:$0xff] }
 0x243   : > { %4259 = vrcp.f32 %v5559_v52  ;;  %v1657_v13 = vmul.f32 %v5563_v61, %v5554_v46  ;;  %vm1662_vm9 = vweird.f32 %v5563_v61  ;;  %v2656_v17 = vand.u32 2147483648, %v5559_v52  ;;  %3278 = vmatpush.bf16.msra.mxu3 %v4108_v25 }
 0x244   : > { %4261 = vrcp.f32 %v5565_v5  ;;  %v2593_v24 = vadd.f32 %v5547_v59, %v2583_v9  ;;  %v2211_v41 = vand.u32 2147483648, %v5565_v5  ;;  %v2209_v7 = vand.u32 2147483647, %v5565_v5  ;;  %vm5599_vm11 = vmor %vm1661_vm13, %vm1662_vm9 }
 0x245   : > { %v1658_v14 = vsub.f32 1.0, %v1657_v13  ;;  %v2444_v0 = vpop.f32.mrf.mxu0  ;;  %vm2205_vm0 = vweird.f32 %v5565_v5  ;;  %vm2650_vm9 = vweird.f32 %v5559_v52  ;;  %vm1666_vm13 = vcmp.eq.f32.partialorder %v1665_v44, 8.507059e+37 }
 0x246   : > { %v2601_v15 = vsub.f32 0.0, %v2593_v24  ;;  %v2568_v3 = vadd.f32 %v2552_v62, %v2444_v0  ;;  %v2212_v27 = vor.u32 1.1754944e-38, %v2211_v41  ;;  %vm2210_vm6 = vcmp.eq.f32.partialorder %v2209_v7, 8.507059e+37  ;;  %v2531_v24 = vpop.f32.mrf.mxu1  ;;  %v4106_v7 = vld [vmem:[#allocation2 + $0x2b8] sm:$0xff] }
 0x247   : > { %v1659_v51 = vmul.f32 %v5563_v61, %v1658_v14  ;;  %v2654_v14 = vand.u32 2147483647, %v5559_v52  ;;  %v2546_v62 = vrot.slane %v5543_v4, 6 }
 0x248   : > { %v4258_v47 = vpop.eup %4257  ;;  %v2612_v49 = vmul.f32 1.442695, %v2601_v15  ;;  %v2576_v18 = vadd.f32 %v2568_v3, %v5541_v55 }
 0x249   : > { %v5572_v32 = vpop.eup %4259  ;;  %v5574_v53 = vadd.f32 1.0, %v4258_v47  ;;  %v1660_v54 = vadd.f32 %v5563_v61, %v1659_v51  ;;  %v2554_v1 = vperm.slane %v2546_v62, 0 }
 0x24a   : > { %v4262_v8 = vpop.eup %4261  ;;  %v2646_v19 = vmul.f32 %v5572_v32, %v5559_v52  ;;  %v2584_v60 = vadd.f32 %v2576_v18, %v2529_v63  ;;  %vm2651_vm7 = vweird.f32 %v5572_v32 }
 0x24b   : > { %4263 = vrcp.f32 %v5574_v53  ;;  %v2201_v33 = vmul.f32 %v4262_v8, %v5565_v5  ;;  %vm2206_vm2 = vweird.f32 %v4262_v8  ;;  %v1664_v5 = vsel %vm5599_vm11, %v5563_v61, %v1660_v54 }
 0x24c   : > { %4265 = vpow2.f32 %v2606_v29  ;;  %v2647_v35 = vsub.f32 1.0, %v2646_v19  ;;  %vm2207_vm8 = vmor %vm2205_vm0, %vm2206_vm2  ;;  %v2594_v10 = vadd.f32 %v5547_v59, %v2584_v60  ;;  %v1668_v19 = vor.u32 1.1754944e-38, %v1667_v21 }
 0x24d   : > { %v2202_v36 = vsub.f32 1.0, %v2201_v33  ;;  %4267 = vpow2.f32 %v2612_v49  ;;  %v2446_v30 = vpop.f32.mrf.mxu0  ;;  %vm5622_vm2 = vmor %vm2650_vm9, %vm2651_vm7  ;;  %v2657_v33 = vor.u32 1.1754944e-38, %v2656_v17  ;;  %vm2655_vm11 = vcmp.eq.f32.partialorder %v2654_v14, 8.507059e+37 }
 0x24e   : > { %v2648_v40 = vmul.f32 %v5572_v32, %v2647_v35  ;;  %v2602_v9 = vsub.f32 0.0, %v2594_v10  ;;  %v2569_v61 = vadd.f32 %v2553_v12, %v2446_v30  ;;  %v1669_v56 = vsel %vm1666_vm13, %v1668_v19, %v1664_v5  ;;  %v2534_v17 = vpop.f32.mrf.mxu1 }
 0x24f   : > { %v2203_v31 = vmul.f32 %v4262_v8, %v2202_v36  ;;  %v2671_v35 = vand.u32 2147483648, %v5574_v53  ;;  %v2750_v3 = vpack.c.bf16 %v1669_v56, %v1669_v56  ;;  %v2547_v10 = vrot.slane %v5543_v4, 7 }
 0x250   : > { %v2649_v50 = vadd.f32 %v5572_v32, %v2648_v40  ;;  %v2614_v15 = vmul.f32 1.442695, %v2602_v9  ;;  %v2577_v52 = vadd.f32 %v2569_v61, %v5541_v55 }
 0x251   : > { %v5583_v38 = vpop.eup %4263  ;;  %v2204_v34 = vadd.f32 %v4262_v8, %v2203_v31  ;;  %v2672_v31 = vor.u32 1.1754944e-38, %v2671_v35  ;;  %v3223_v21 = vpack.i.b16 %v2750_v3, %v2750_v3  ;;  %v2555_v61 = vperm.slane %v2547_v10, 0  ;;  %v4096_v3 = vld [vmem:[#allocation2 + $0x368] sm:$0xff] }
 0x252   : > { %v2661_v23 = vmul.f32 %v5583_v38, %v5574_v53  ;;  %v4266_v37 = vpop.eup %4265  ;;  %v2653_v51 = vsel %vm5622_vm2, %v5572_v32, %v2649_v50  ;;  %vm2666_vm0 = vweird.f32 %v5583_v38  ;;  %v2669_v32 = vand.u32 2147483647, %v5574_v53  ;;  %3017 = vmatpush.bf16.msrb.mxu2 %v4096_v3 }
 0x253   : > { %v5604_v57 = vadd.f32 1.0, %v4266_v37  ;;  %v2208_v26 = vsel %vm2207_vm8, %v4262_v8, %v2204_v34  ;;  %v4268_v43 = vpop.eup %4267  ;;  %v4107_v8 = vld [vmem:[#allocation2 + $0x2c0] sm:$0xff]  ;;  %v2658_v49 = vsel %vm2655_vm11, %v2657_v33, %v2653_v51  ;;  %vm2665_vm8 = vweird.f32 %v5574_v53 }
 0x254   : > { %v2662_v20 = vsub.f32 1.0, %v2661_v23  ;;  %v2213_v13 = vsel %vm2210_vm6, %v2212_v27, %v2208_v26  ;;  %v5615_v47 = vadd.f32 1.0, %v4268_v43  ;;  %3279 = vmatpush.bf16.msra.mxu3 %v4107_v8  ;;  %v2585_v63 = vadd.f32 %v2577_v52, %v2531_v24  ;;  %vm5639_vm6 = vmor %vm2665_vm8, %vm2666_vm0 }
 0x255   : > { %v2751_v29 = vpack.c.bf16 %v2213_v13, %v2213_v13  ;;  %4269 = vrcp.f32 %v5604_v57  ;;  %v2753_v37 = vpack.c.bf16 %v2658_v49, %v2658_v49  ;;  %v2449_v18 = vpop.f32.mrf.mxu0  ;;  %vm2670_vm7 = vcmp.eq.f32.partialorder %v2669_v32, 8.507059e+37 }
 0x256   : > { %v2663_v46 = vmul.f32 %v5583_v38, %v2662_v20  ;;  %4271 = vrcp.f32 %v5615_v47  ;;  %v2595_v41 = vadd.f32 %v5547_v59, %v2585_v63  ;;  %v2570_v20 = vadd.f32 %v2554_v1, %v2449_v18 }
 0x257   : > { %3086 = vmatmul.bf16.vlgmr.msrb.gmra.mxu3 %v2751_v29  ;;  %4273 = vpow2.f32 %v2614_v15  ;;  %v2761_v12 = vsel %vm4573_vm12, 0, %v2753_v37  ;;  %v2686_v50 = vand.u32 2147483648, %v5615_v47  ;;  %v2684_v13 = vand.u32 2147483647, %v5615_v47 }
 0x258   : > { %v2664_v0 = vadd.f32 %v5583_v38, %v2663_v46  ;;  %v2603_v40 = vsub.f32 0.0, %v2595_v41  ;;  %3280 = vmatpush.bf16.msra.mxu3 %v4106_v7  ;;  %v2578_v26 = vadd.f32 %v2570_v20, %v5541_v55  ;;  %vm2680_vm2 = vweird.f32 %v5615_v47 }
 0x259   : > { %v2769_v29 = vunpack.c.l.bf16 %v2761_v12  ;;  %v3225_v9 = vperm.slane %v3223_v21, 0  ;;  %v2833_v14 = vsel %vm4573_vm12, 1065369472, %v2753_v37  ;;  %v2687_v19 = vor.u32 1.1754944e-38, %v2686_v50 }
 0x25a   : > { %v2668_v23 = vsel %vm5639_vm6, %v5583_v38, %v2664_v0  ;;  %v4105_v38 = vld [vmem:[#allocation2 + $0x2b0] sm:$0xff]  ;;  %v2616_v5 = vmul.f32 1.442695, %v2603_v40  ;;  %v2586_v30 = vadd.f32 %v2578_v26, %v2534_v17  ;;  %vm2685_vm0 = vcmp.eq.f32.partialorder %v2684_v13, 8.507059e+37 }
 0x25b   : > { %v5637_v6 = vpop.eup %4269  ;;  %v2673_v60 = vsel %vm2670_vm7, %v2672_v31, %v2668_v23  ;;  %v2639_v15 = vand.u32 2147483647, %v5604_v57  ;;  %v2641_v33 = vand.u32 2147483648, %v5604_v57  ;;  %v2782_v0 = vrot.slane %v2769_v29, 4 }
 0x25c   : > { %v4272_v54 = vpop.eup %4271  ;;  %v2631_v34 = vmul.f32 %v5637_v6, %v5604_v57  ;;  %v5657_v46 = vpack.c.bf16 %v2673_v60, %v2673_v60  ;;  %3281 = vmatpush.bf16.msra.mxu3 %v4105_v38  ;;  %v2596_v24 = vadd.f32 %v5547_v59, %v2586_v30  ;;  %v2841_v62 = vunpack.c.l.bf16 %v2833_v14 }
 0x25d   : > { %v2676_v53 = vmul.f32 %v4272_v54, %v5615_v47  ;;  %v4274_v44 = vpop.eup %4273  ;;  %vm2681_vm9 = vweird.f32 %v4272_v54  ;;  %v2451_v45 = vpop.f32.mrf.mxu0  ;;  %vm2635_vm12 = vweird.f32 %v5604_v57  ;;  %vm2636_vm11 = vweird.f32 %v5637_v6  ;;  %v4094_v57 = vld [vmem:[#allocation2 + $0x358] sm:$0xff] }
 0x25e   : > { %v5650_v27 = vadd.f32 1.0, %v4274_v44  ;;  %v2632_v4 = vsub.f32 1.0, %v2631_v34  ;;  %vm2682_vm13 = vmor %vm2680_vm2, %vm2681_vm9  ;;  %v2762_v47 = vsel %vm4585_vm14, 0, %v5657_v46  ;;  %v2571_v51 = vadd.f32 %v2555_v61, %v2451_v45 }
 0x25f   : > { %v2677_v58 = vsub.f32 1.0, %v2676_v53  ;;  %v2604_v56 = vsub.f32 0.0, %v2596_v24  ;;  %v2770_v63 = vunpack.c.l.bf16 %v2762_v47  ;;  %vm5679_vm8 = vcmp.eq.f32.partialorder %v2639_v15, 8.507059e+37  ;;  %v4095_v53 = vld [vmem:[#allocation2 + $0x360] sm:$0xff]  ;;  %vm2637_vm7 = vmor %vm2635_vm12, %vm2636_vm11 }
 0x260   : > { %4275 = vrcp.f32 %v5650_v27  ;;  %v2579_v35 = vadd.f32 %v2571_v51, %v5541_v55  ;;  %v2633_v49 = vmul.f32 %v5637_v6, %v2632_v4  ;;  %v2642_v18 = vor.u32 1.1754944e-38, %v2641_v33  ;;  %3018 = vmatpush.bf16.msrb.mxu2 %v4095_v53 }
 0x261   : > { %v2678_v43 = vmul.f32 %v4272_v54, %v2677_v58  ;;  %4277 = vpow2.f32 %v2616_v5  ;;  %v2618_v1 = vmul.f32 1.442695, %v2604_v56  ;;  %v2699_v40 = vand.u32 2147483647, %v5650_v27 }
 0x262   : > { %v2634_v7 = vadd.f32 %v5637_v6, %v2633_v49  ;;  %v2701_v20 = vand.u32 2147483648, %v5650_v27  ;;  %v2854_v58 = vrot.slane %v2841_v62, 4  ;;  %vm2695_vm9 = vweird.f32 %v5650_v27 }
 0x263   : > { %v2679_v25 = vadd.f32 %v4272_v54, %v2678_v43  ;;  %v2783_v10 = vmax.f32 %v2769_v29, %v2782_v0  ;;  %v2788_v12 = vrot.slane %v2770_v63, 4  ;;  %v4092_v0 = vld [vmem:[#allocation2 + $0x348] sm:$0xff] }
 0x264   : > { %v2638_v60 = vsel %vm2637_vm7, %v5637_v6, %v2634_v7  ;;  %v5705_v29 = vmin.f32 %v2841_v62, %v2854_v58  ;;  %3019 = vmatpush.bf16.msrb.mxu2 %v4094_v57 }
 0x265   : > { %v2683_v8 = vsel %vm2682_vm13, %v4272_v54, %v2679_v25  ;;  %v2536_v54 = vpop.f32.mrf.mxu1  ;;  %v2643_v21 = vsel %vm5679_vm8, %v2642_v18, %v2638_v60  ;;  %vm2700_vm13 = vcmp.eq.f32.partialorder %v2699_v40, 8.507059e+37  ;;  %v2784_v45 = vrot.slane %v2783_v10, 2  ;;  %v4091_v18 = vld [vmem:[#allocation2 + $0x340] sm:$0xff] }
 0x266   : > { %v2688_v52 = vsel %vm2685_vm0, %v2687_v19, %v2683_v8  ;;  %v4276_v11 = vpop.eup %4275  ;;  %v2587_v31 = vadd.f32 %v2579_v35, %v2536_v54  ;;  %v2752_v26 = vpack.c.bf16 %v2643_v21, %v2643_v21  ;;  %v4093_v8 = vld [vmem:[#allocation2 + $0x350] sm:$0xff]  ;;  %v2789_v47 = vmax.f32 %v2770_v63, %v2788_v12 }
 0x267   : > { %3282 = vmatmul.bf16.vlgmr.msra.gmra.mxu3 %v3225_v9  ;;  %v4278_v32 = vpop.eup %4277  ;;  %v2691_v36 = vmul.f32 %v4276_v11, %v5650_v27  ;;  %v5675_v23 = vpack.c.bf16 %v2688_v52, %v2688_v52  ;;  %vm2696_vm6 = vweird.f32 %v4276_v11  ;;  %v2834_v27 = vsel %vm4585_vm14, 1065369472, %v5657_v46 }
 0x268   : > { %v5677_v41 = vadd.f32 1.0, %v4278_v32  ;;  %v2597_v34 = vadd.f32 %v5547_v59, %v2587_v31  ;;  %vm2697_vm2 = vmor %vm2695_vm9, %vm2696_vm6  ;;  %v2702_v59 = vor.u32 1.1754944e-38, %v2701_v20  ;;  %v2760_v13 = vsel %vm4552_vm10, 0, %v2752_v26  ;;  %3020 = vmatpush.bf16.msrb.mxu2 %v4093_v8 }
 0x269   : > { %v2692_v55 = vsub.f32 1.0, %v2691_v36  ;;  %v2763_v38 = vsel %vm4599_vm15, 0, %v5675_v23  ;;  %v2768_v4 = vunpack.c.l.bf16 %v2760_v13  ;;  %v5712_v51 = vunpack.c.l.bf16 %v2834_v27 }
 0x26a   : > { %4279 = vrcp.f32 %v5677_v41  ;;  %v2605_v5 = vsub.f32 0.0, %v2597_v34  ;;  %v2771_v6 = vunpack.c.l.bf16 %v2763_v38  ;;  %v2714_v52 = vand.u32 2147483647, %v5677_v41 }
 0x26b   : > { %v2693_v44 = vmul.f32 %v4276_v11, %v2692_v55  ;;  %4281 = vpow2.f32 %v2618_v1  ;;  %v2776_v24 = vrot.slane %v2768_v4, 4  ;;  %v2716_v56 = vand.u32 2147483648, %v5677_v41 }
 0x26c   : > { %v2620_v50 = vmul.f32 1.442695, %v2605_v5  ;;  %v2794_v15 = vrot.slane %v2771_v6, 4  ;;  %v2832_v33 = vsel %vm4552_vm10, 1065369472, %v2752_v26  ;;  %vm2710_vm0 = vweird.f32 %v5677_v41  ;;  %3021 = vmatpush.bf16.msrb.mxu2 %v4092_v0 }
 0x26d   : > { %v2694_v17 = vadd.f32 %v4276_v11, %v2693_v44  ;;  %v2777_v35 = vmax.f32 %v2768_v4, %v2776_v24  ;;  %v2785_v49 = vmax.f32 %v2783_v10, %v2784_v45  ;;  %v2790_v32 = vrot.slane %v2789_v47, 2 }
 0x26e   : > { %4283 = vpow2.f32 %v2620_v50  ;;  %v2795_v63 = vmax.f32 %v2771_v6, %v2794_v15  ;;  %v2840_v37 = vunpack.c.l.bf16 %v2832_v33  ;;  %v2717_v55 = vor.u32 1.1754944e-38, %v2716_v56  ;;  %v4090_v6 = vld [vmem:[#allocation2 + $0x338] sm:$0xff] }
 0x26f   : > { %v2698_v43 = vsel %vm2697_vm2, %v4276_v11, %v2694_v17  ;;  %v2778_v54 = vrot.slane %v2777_v35, 2  ;;  %v2791_v31 = vmax.f32 %v2789_v47, %v2790_v32  ;;  %vm2715_vm10 = vcmp.eq.f32.partialorder %v2714_v52, 8.507059e+37  ;;  %v4104_v52 = vld [vmem:[#allocation2 + $0x3a8] sm:$0xff] }
 0x270   : > { %v4280_v25 = vpop.eup %4279  ;;  %v2703_v30 = vsel %vm2700_vm13, %v2702_v59, %v2698_v43  ;;  %v2796_v53 = vrot.slane %v2795_v63, 2  ;;  %v2860_v44 = vrot.slane %v5712_v51, 4  ;;  %v2786_v60 = vrot.slane %v2785_v49, 1  ;;  %3022 = vmatpush.bf16.msrb.mxu2 %v4091_v18 }
 0x271   : > { %v4282_v9 = vpop.eup %4281  ;;  %v5707_v61 = vpack.c.bf16 %v2703_v30, %v2703_v30  ;;  %v2706_v14 = vmul.f32 %v4280_v25, %v5677_v41  ;;  %vm2711_vm14 = vweird.f32 %v4280_v25  ;;  %v2779_v40 = vmax.f32 %v2777_v35, %v2778_v54 }
 0x272   : > { %v5710_v19 = vadd.f32 1.0, %v4282_v9  ;;  %vm2712_vm12 = vmor %vm2710_vm0, %vm2711_vm14  ;;  %v2835_v58 = vsel %vm4599_vm15, 1065369472, %v5675_v23  ;;  %v2848_v17 = vrot.slane %v2840_v37, 4  ;;  %v2792_v26 = vrot.slane %v2791_v31, 1 }
 0x273   : > { %v2707_v16 = vsub.f32 1.0, %v2706_v14  ;;  %v2764_v46 = vsel %vm4612_vm1, 0, %v5707_v61  ;;  %v2780_v57 = vrot.slane %v2779_v40, 1  ;;  %v2797_v10 = vmax.f32 %v2795_v63, %v2796_v53 }
 0x274   : > { %4285 = vrcp.f32 %v5710_v19  ;;  %v2772_v62 = vunpack.c.l.bf16 %v2764_v46  ;;  %v4284_v36 = vpop.eup %4283  ;;  %v2729_v5 = vand.u32 2147483647, %v5710_v19  ;;  %v2731_v59 = vand.u32 2147483648, %v5710_v19  ;;  %3023 = vmatpush.bf16.msrb.mxu2 %v4090_v6  ;;  %v4089_v46 = vld [vmem:[#allocation2 + $0x330] sm:$0xff] }
 0x275   : > { %v2708_v11 = vmul.f32 %v4280_v25, %v2707_v16  ;;  %v5723_v2 = vadd.f32 1.0, %v4284_v36  ;;  %v2781_v50 = vmax.f32 %v2779_v40, %v2780_v57  ;;  %v2787_v13 = vmax.f32 %v2785_v49, %v2786_v60 }
 0x276   : > { %v2800_v1 = vrot.slane %v2772_v62, 4  ;;  %v2793_v30 = vmax.f32 %v2791_v31, %v2792_v26  ;;  %vm2725_vm11 = vweird.f32 %v5710_v19  ;;  %vm5739_vm8 = vcmp.eq.f32.partialorder %v2729_v5, 8.507059e+37  ;;  %v4102_v26 = vld [vmem:[#allocation2 + $0x398] sm:$0xff] }
 0x277   : > { %v2709_v3 = vadd.f32 %v4280_v25, %v2708_v11  ;;  %4287 = vrcp.f32 %v5723_v2  ;;  %v2732_v47 = vor.u32 1.1754944e-38, %v2731_v59  ;;  %v2824_v15 = vpack.c.bf16 %v2781_v50, %v2781_v50 }
 0x278   : > { %v2801_v41 = vmax.f32 %v2772_v62, %v2800_v1  ;;  %v2825_v11 = vpack.c.bf16 %v2787_v13, %v2787_v13  ;;  %v5744_v0 = vmin.f32 %v2840_v37, %v2848_v17  ;;  %v2826_v35 = vpack.c.bf16 %v2793_v30, %v2793_v30  ;;  %3024 = vmatpush.bf16.msrb.mxu2 %v4089_v46  ;;  %v4103_v37 = vld [vmem:[#allocation2 + $0x3a0] sm:$0xff] }
 0x279   : > { %v2713_v7 = vsel %vm2712_vm12, %v4280_v25, %v2709_v3  ;;  %v2798_v25 = vrot.slane %v2797_v10, 1  ;;  %v2744_v32 = vand.u32 2147483647, %v5723_v2  ;;  %v2746_v63 = vand.u32 2147483648, %v5723_v2 }
 0x27a   : > { %v4286_v20 = vpop.eup %4285  ;;  %v2718_v34 = vsel %vm2715_vm10, %v2717_v55, %v2713_v7  ;;  %v2802_v23 = vrot.slane %v2801_v41, 2  ;;  %v2944_v55 = vperm.slane %v2824_v15, 0  ;;  %vm2740_vm9 = vweird.f32 %v5723_v2 }
 0x27b   : > { %v5730_v38 = vpack.c.bf16 %v2718_v34, %v2718_v34  ;;  %v2721_v21 = vmul.f32 %v4286_v20, %v5710_v19  ;;  %vm2726_vm15 = vweird.f32 %v4286_v20  ;;  %v2799_v8 = vmax.f32 %v2797_v10, %v2798_v25 }
 0x27c   : > { %v2803_v4 = vmax.f32 %v2801_v41, %v2802_v23  ;;  %vm2727_vm6 = vmor %vm2725_vm11, %vm2726_vm15  ;;  %3188 = vmatpush.bf16.msra.mxu2 %v4104_v52  ;;  %v2945_v7 = vperm.slane %v2825_v11, 0  ;;  %v5753_v41 = vperm.slane %v2826_v35, 0  ;;  %v2843_v34 = vunpack.c.l.bf16 %v2835_v58 }
 0x27d   : > { %v2722_v12 = vsub.f32 1.0, %v2721_v21  ;;  %v2765_v22 = vsel %vm4640_vm4, 0, %v5730_v38  ;;  %v4288_v9 = vpop.eup %4287  ;;  %v2827_v49 = vpack.c.bf16 %v2799_v8, %v2799_v8  ;;  %vm2745_vm13 = vcmp.eq.f32.partialorder %v2744_v32, 8.507059e+37 }
 0x27e   : > { %v2773_v43 = vunpack.c.l.bf16 %v2765_v22  ;;  %v2736_v16 = vmul.f32 %v4288_v9, %v5723_v2  ;;  %v2804_v56 = vrot.slane %v2803_v4, 1  ;;  %vm2741_vm7 = vweird.f32 %v4288_v9 }
 0x27f   : > { %v2723_v27 = vmul.f32 %v4286_v20, %v2722_v12  ;;  %vm2742_vm2 = vmor %vm2740_vm9, %vm2741_vm7  ;;  %v2747_v60 = vor.u32 1.1754944e-38, %v2746_v63  ;;  %v2952_v17 = vunpack.c.l.b16 %v2944_v55  ;;  %v2836_v5 = vsel %vm4612_vm1, 1065369472, %v5707_v61 }
 0x280   : > { %v2806_v24 = vrot.slane %v2773_v43, 4  ;;  %v2737_v62 = vsub.f32 1.0, %v2736_v16  ;;  %v2805_v31 = vmax.f32 %v2803_v4, %v2804_v56  ;;  %v2850_v57 = vrot.slane %v5744_v0, 2  ;;  %3189 = vmatpush.bf16.msra.mxu2 %v4103_v37 }
 0x281   : > { %v2724_v45 = vadd.f32 %v4286_v20, %v2723_v27  ;;  %v2953_v22 = vunpack.c.l.b16 %v2945_v7  ;;  %v2954_v23 = vunpack.c.l.b16 %v5753_v41  ;;  %v2837_v28 = vsel %vm4640_vm4, 1065369472, %v5730_v38 }
 0x282   : > { %v2807_v33 = vmax.f32 %v2773_v43, %v2806_v24  ;;  %v2738_v54 = vmul.f32 %v4288_v9, %v2737_v62  ;;  %v2828_v6 = vpack.c.bf16 %v2805_v31, %v2805_v31  ;;  %v2844_v13 = vunpack.c.l.bf16 %v2836_v5  ;;  %v4100_v62 = vld [vmem:[#allocation2 + $0x388] sm:$0xff] }
 0x283   : > { %v2728_v19 = vsel %vm2727_vm6, %v4286_v20, %v2724_v45  ;;  %v5755_v20 = vperm.slane %v2827_v49, 0  ;;  %v2856_v27 = vrot.slane %v5705_v29, 2  ;;  %v2861_v30 = vmin.f32 %v5712_v51, %v2860_v44 }
 0x284   : > { %v2733_v36 = vsel %vm5739_vm8, %v2732_v47, %v2728_v19  ;;  %v2808_v3 = vrot.slane %v2807_v33, 2  ;;  %v2739_v18 = vadd.f32 %v4288_v9, %v2738_v54  ;;  %v2866_v4 = vrot.slane %v2843_v34, 4  ;;  %3190 = vmatpush.bf16.msra.mxu2 %v4102_v26 }
 0x285   : > { %v2758_v1 = vpack.c.bf16 %v2733_v36, %v2733_v36  ;;  %v2955_v43 = vunpack.c.l.b16 %v5755_v20  ;;  %v5777_v38 = vperm.slane %v2828_v6, 0  ;;  %v2845_v24 = vunpack.c.l.bf16 %v2837_v28 }
 0x286   : > { %v2809_v53 = vmax.f32 %v2807_v33, %v2808_v3  ;;  %v2743_v2 = vsel %vm2742_vm2, %v4288_v9, %v2739_v18  ;;  %v4101_v9 = vld [vmem:[#allocation2 + $0x390] sm:$0xff]  ;;  %v2862_v45 = vrot.slane %v2861_v30, 2  ;;  %v2867_v47 = vmin.f32 %v2843_v34, %v2866_v4 }
 0x287   : > { %v2766_v40 = vsel %vm4652_vm5, 0, %v2758_v1  ;;  %v2748_v10 = vsel %vm2745_vm13, %v2747_v60, %v2743_v2  ;;  %v2838_v61 = vsel %vm4652_vm5, 1065369472, %v2758_v1  ;;  %v2872_v52 = vrot.slane %v2844_v13, 4 }
 0x288   : > { %v2774_v21 = vunpack.c.l.bf16 %v2766_v40  ;;  %v2810_v12 = vrot.slane %v2809_v53, 1  ;;  %v2759_v58 = vpack.c.bf16 %v2748_v10, %v2748_v10  ;;  %v2846_v15 = vunpack.c.l.bf16 %v2838_v61  ;;  %3191 = vmatpush.bf16.msra.mxu2 %v4101_v9  ;;  %v4099_v40 = vld [vmem:[#allocation2 + $0x380] sm:$0xff] }
 0x289   : > { %vm5943_vm1 = vcmask 1041409   ;;  %v2857_v56 = vmin.f32 %v5705_v29, %v2856_v27  ;;  %v2868_v33 = vrot.slane %v2867_v47, 2  ;;  %v2873_v35 = vmin.f32 %v2844_v13, %v2872_v52 }
 0x28a   : > { %v2812_v59 = vrot.slane %v2774_v21, 4  ;;  %v2767_v25 = vsel %vm5912_vm3, 0, %v2759_v58  ;;  %v2811_v8 = vmax.f32 %v2809_v53, %v2810_v12  ;;  %v2839_v42 = vsel %vm5912_vm3, 1065369472, %v2759_v58  ;;  %vm5950_vm10 = vmmov %vm5943_vm1 }
 0x28b   : > { %v2775_v14 = vunpack.c.l.bf16 %v2767_v25  ;;  %v2960_v51 = vsel %vm5943_vm1, %v2953_v22, %v2952_v17  ;;  %v2847_v44 = vunpack.c.l.bf16 %v2839_v42  ;;  %v2851_v49 = vmin.f32 %v5744_v0, %v2850_v57 }
 0x28c   : > { %v2813_v50 = vmax.f32 %v2774_v21, %v2812_v59  ;;  %v2829_v48 = vpack.c.bf16 %v2811_v8, %v2811_v8  ;;  %v2863_v32 = vmin.f32 %v2861_v30, %v2862_v45  ;;  %v2869_v63 = vmin.f32 %v2867_v47, %v2868_v33  ;;  %3192 = vmatpush.bf16.msra.mxu2 %v4100_v62  ;;  %v4097_v47 = vld [vmem:[#allocation2 + $0x370] sm:$0xff] }
 0x28d   : > { %v2818_v46 = vrot.slane %v2775_v14, 4  ;;  %v2878_v36 = vrot.slane %v2845_v24, 4  ;;  %v2874_v1 = vrot.slane %v2873_v35, 2  ;;  %v2884_v55 = vrot.slane %v2846_v15, 4 }
 0x28e   : > { %v2814_v39 = vrot.slane %v2813_v50, 2  ;;  %vm5944_vm4 = vcmask 1042434   ;;  %v2858_v31 = vrot.slane %v2857_v56, 1  ;;  %v2890_v53 = vrot.slane %v2847_v44, 4 }
 0x28f   : > { %v2819_v19 = vmax.f32 %v2775_v14, %v2818_v46  ;;  %v2961_v37 = vsel %vm5944_vm4, %v2954_v23, %v2960_v51  ;;  %v2879_v29 = vmin.f32 %v2845_v24, %v2878_v36  ;;  %v2875_v41 = vmin.f32 %v2873_v35, %v2874_v1  ;;  %v4098_v23 = vld [vmem:[#allocation2 + $0x378] sm:$0xff]  ;;  %vm5951_vm15 = vmmov %vm5944_vm4 }
 0x290   : > { %v2815_v16 = vmax.f32 %v2813_v50, %v2814_v39  ;;  %v2885_v34 = vmin.f32 %v2846_v15, %v2884_v55  ;;  %v2949_v60 = vperm.slane %v2829_v48, 0  ;;  %v2864_v0 = vrot.slane %v2863_v32, 1  ;;  %3193 = vmatpush.bf16.msra.mxu2 %v4099_v40 }
 0x291   : > { %v2820_v54 = vrot.slane %v2819_v19, 2  ;;  %v2880_v21 = vrot.slane %v2879_v29, 2  ;;  %v2891_v2 = vmin.f32 %v2847_v44, %v2890_v53  ;;  %v2852_v5 = vrot.slane %v2851_v49, 1 }
 0x292   : > { %v2816_v11 = vrot.slane %v2815_v16, 1  ;;  %v2870_v57 = vrot.slane %v2869_v63, 1  ;;  %v2886_v26 = vrot.slane %v2885_v34, 2  ;;  %v2876_v12 = vrot.slane %v2875_v41, 1 }
 0x293   : > { %v2821_v7 = vmax.f32 %v2819_v19, %v2820_v54  ;;  %v2881_v59 = vmin.f32 %v2879_v29, %v2880_v21  ;;  %v2892_v6 = vrot.slane %v2891_v2, 2  ;;  %v2956_v22 = vunpack.c.l.b16 %v5777_v38 }
 0x294   : > { %v2817_v3 = vmax.f32 %v2815_v16, %v2816_v11  ;;  %v2859_v50 = vmin.f32 %v2857_v56, %v2858_v31  ;;  %v2887_v28 = vmin.f32 %v2885_v34, %v2886_v26  ;;  %v2957_v61 = vunpack.c.l.b16 %v2949_v60  ;;  %3194 = vmatpush.bf16.msra.mxu2 %v4098_v23  ;;  %v3202_v23 = vld [vmem:[#allocation2 + $0x3b0] sm:$0x1] }
 0x295   : > { %v2822_v17 = vrot.slane %v2821_v7, 1  ;;  %v2865_v13 = vmin.f32 %v2863_v32, %v2864_v0  ;;  %v2882_v25 = vrot.slane %v2881_v59, 1  ;;  %v2893_v27 = vmin.f32 %v2891_v2, %v2892_v6 }
 0x296   : > { %v2830_v18 = vpack.c.bf16 %v2817_v3, %v2817_v3  ;;  %v2853_v4 = vmin.f32 %v2851_v49, %v2852_v5  ;;  %v2871_v9 = vmin.f32 %v2869_v63, %v2870_v57  ;;  %v2888_v14 = vrot.slane %v2887_v28, 1 }
 0x297   : > { %v2823_v58 = vmax.f32 %v2821_v7, %v2822_v17  ;;  %vm5945_vm5 = vcmask 1043459   ;;  %v2877_v42 = vmin.f32 %v2875_v41, %v2876_v12  ;;  %v2894_v24 = vrot.slane %v2893_v27, 1 }
 0x298   : > { %v2950_v10 = vperm.slane %v2830_v18, 0  ;;  %v2962_v39 = vsel %vm5945_vm5, %v2955_v43, %v2961_v37  ;;  %vm5946_vm3 = vcmask 1044484   ;;  %v2883_v16 = vmin.f32 %v2881_v59, %v2882_v25  ;;  %3195 = vmatpush.bf16.msra.mxu2 %v4097_v47  ;;  %vm5952_vm11 = vmmov %vm5945_vm5 }
 0x299   : > { %v2831_v30 = vpack.c.bf16 %v2823_v58, %v2823_v58  ;;  %v2963_v45 = vsel %vm5946_vm3, %v2956_v22, %v2962_v39  ;;  %v2897_v46 = vpack.c.bf16 %v2859_v50, %v2859_v50  ;;  %vm5947_vm14 = vcmask 1045509   ;;  %vm5953_vm8 = vmmov %vm5946_vm3 }
 0x29a   : > { %v2958_v8 = vunpack.c.l.b16 %v2950_v10  ;;  %v2964_v15 = vsel %vm5947_vm14, %v2957_v61, %v2963_v45  ;;  %v2889_v52 = vmin.f32 %v2887_v28, %v2888_v14  ;;  %v2898_v51 = vpack.c.bf16 %v2865_v13, %v2865_v13  ;;  %vm5954_vm6 = vmmov %vm5947_vm14 }
 0x29b   : > { %v2951_v38 = vperm.slane %v2831_v30, 0  ;;  %v2895_v56 = vmin.f32 %v2893_v27, %v2894_v24  ;;  %v2896_v33 = vpack.c.bf16 %v2853_v4, %v2853_v4  ;;  %v2899_v11 = vpack.c.bf16 %v2871_v9, %v2871_v9 }
 0x29c   : > { %vm5948_vm0 = vcmask 1046534   ;;  %v2900_v43 = vpack.c.bf16 %v2877_v42, %v2877_v42  ;;  %vm5949_vm12 = vcmask 1047559   ;;  %v2901_v48 = vpack.c.bf16 %v2883_v16, %v2883_v16 }
 0x29d   : > { %v2959_v44 = vunpack.c.l.b16 %v2951_v38  ;;  %v2965_v20 = vsel %vm5948_vm0, %v2958_v8, %v2964_v15  ;;  %v3116_v62 = vperm.slane %v2897_v46, 0  ;;  %v2902_v49 = vpack.c.bf16 %v2889_v52, %v2889_v52  ;;  %vm5955_vm7 = vmmov %vm5948_vm0 }
 0x29e   : > { %v3117_v32 = vperm.slane %v2898_v51, 0  ;;  %v2903_v63 = vpack.c.bf16 %v2895_v56, %v2895_v56  ;;  %v3115_v36 = vperm.slane %v2896_v33, 0  ;;  %v3118_v3 = vperm.slane %v2899_v11, 0  ;;  %vm5956_vm9 = vmmov %vm5949_vm12 }
 0x29f   : > { %v2966_v19 = vsel %vm5949_vm12, %v2959_v44, %v2965_v20  ;;  %v3119_v54 = vperm.slane %v2900_v43, 0  ;;  %v3120_v1 = vperm.slane %v2901_v48, 0  ;;  %v3124_v55 = vunpack.c.l.b16 %v3116_v62 }
 0x2a0   : > { %v2967_v35 = vpack.c.b16 %v2966_v19, %v2966_v19  ;;  %v3121_v37 = vperm.slane %v2902_v49, 0  ;;  %v3125_v31 = vunpack.c.l.b16 %v3117_v32  ;;  %v3122_v29 = vperm.slane %v2903_v63, 0 }
 0x2a1   : > { %v3123_v53 = vunpack.c.l.b16 %v3115_v36  ;;  %v3126_v7 = vunpack.c.l.b16 %v3118_v3  ;;  %v3127_v18 = vunpack.c.l.b16 %v3119_v54  ;;  %v3128_v40 = vunpack.c.l.b16 %v3120_v1 }
 0x2a2   : > { %3025 = vmatmul.bf16.vlgmr.msrb.gmra.mxu2 %v2967_v35  ;;  %v3129_v34 = vunpack.c.l.b16 %v3121_v37  ;;  %v3130_v0 = vunpack.c.l.b16 %v3122_v29  ;;  %v3203_v50 = vunpack.c.l.bf16 %v3202_v23 }
 0x2a3   : > { %v3131_v41 = vsel %vm5950_vm10, %v3124_v55, %v3123_v53 }
 0x2a4   : > { %v3132_v60 = vsel %vm5951_vm15, %v3125_v31, %v3131_v41  ;;  %v3204_v61 = vperm.slane %v3203_v50, 0 }
 0x2a5   : > { %v3133_v21 = vsel %vm5952_vm11, %v3126_v7, %v3132_v60 }
 0x2a6   : > { %v3134_v2 = vsel %vm5953_vm8, %v3127_v18, %v3133_v21 }
 0x2a7   : > { %v3135_v17 = vsel %vm5954_vm6, %v3128_v40, %v3134_v2 }
 0x2a8   : > { %v3136_v5 = vsel %vm5955_vm7, %v3129_v34, %v3135_v17 }
 0x2a9   : > { %v3137_v57 = vsel %vm5956_vm9, %v3130_v0, %v3136_v5 }
 0x2aa   : > { %v3138_v26 = vpack.c.b16 %v3137_v57, %v3137_v57 }
 0x2b2   : > { %3196 = vmatmul.bf16.vlgmr.msra.gmra.mxu2 %v3138_v26 }
 0x2da   : > { %v3087_v10 = vpop.f32.mrf.mxu3 }
 0x2e2   : > { %v3089_v12 = vpop.f32.mrf.mxu3 }
 0x2ea   : > { %v3283_v59 = vpop.f32.mrf.mxu3 }
 0x2eb   : > { %v3287_v27 = vperm.slane %v3283_v59, 0 }
 0x2f2   : > { %v3285_v6 = vpop.f32.mrf.mxu3 }
 0x325   : > { %v3026_v58 = vpop.f32.mrf.mxu2 }
 0x326   : > { %v3088_v28 = vadd.f32 %v3087_v10, %v3026_v58 }
 0x32d   : > { %v3028_v22 = vpop.f32.mrf.mxu2 }
 0x335   : > { %v3197_v13 = vpop.f32.mrf.mxu2 }
 0x336   : > { %v3201_v25 = vadd.f32 %v3197_v13, %v3088_v28 }
 0x338   : > { %v3205_v30 = vadd.f32 %v3204_v61, %v3201_v25 }
 0x33a   : > { %v3288_v4 = vadd.f32 %v3287_v27, %v3205_v30 }
 0x33c   : > { %v3289_v9 = vsub.f32 0.0, %v3288_v4 }
 0x33d   : > { %v3199_v14 = vpop.f32.mrf.mxu2 }
 0x33e   : > { %v3290_v8 = vmul.f32 1.442695, %v3289_v9 }
 0x340   : > { %4289 = vpow2.f32 %v3290_v8 }
 0x346   : > { %v4290_v39 = vpop.eup %4289 }
 0x347   : > { %v3292_v42 = vadd.f32 1.0, %v4290_v39 }
 0x349   : > { %4291 = vrcp.f32 %v3292_v42  ;;  %v3304_v47 = vand.u32 2147483648, %v3292_v42  ;;  %v3302_v46 = vand.u32 2147483647, %v3292_v42  ;;  %vm3298_vm13 = vweird.f32 %v3292_v42 }
 0x34b   : > { %v3305_v52 = vor.u32 1.1754944e-38, %v3304_v47  ;;  %vm3303_vm4 = vcmp.eq.f32.partialorder %v3302_v46, 8.507059e+37 }
 0x34f   : > { %v4292_v24 = vpop.eup %4291 }
 0x350   : > { %v3294_v38 = vmul.f32 %v4292_v24, %v3292_v42  ;;  %vm3299_vm2 = vweird.f32 %v4292_v24 }
 0x351   : > { %vm3300_vm1 = vmor %vm3298_vm13, %vm3299_vm2 }
 0x352   : > { %v3295_v45 = vsub.f32 1.0, %v3294_v38 }
 0x354   : > { %v3296_v16 = vmul.f32 %v4292_v24, %v3295_v45 }
 0x356   : > { %v3297_v15 = vadd.f32 %v4292_v24, %v3296_v16 }
 0x358   : > { %v3301_v51 = vsel %vm3300_vm1, %v4292_v24, %v3297_v15 }
 0x359   : > { %v3306_v44 = vsel %vm3303_vm4, %v3305_v52, %v3301_v51 }
 0x35a   : > { %3308 = vst [vmem:[%s279_s6] sm:$0xff] %v3306_v44 }
 0x35b   : > { %4380 = shalt.err (!%p4377_p8)
}
 0x35c   : > { %4121 = dma.vmem_to_hbm [thread:$0]  (%p4499_p5), %s3323_s7, 128, %s3325_s8, %s3310_s22  }
 0x35d PF: > { %p4138_p9 = scmp.ge.s32.totalorder %s4423_s21, 2  ;;  %s3336_s16 = sand.u32 1, %s4411_s18  }
 0x35e   : > { %s3337_s17 = scalar_lea.sflag [#allocation4], %s3336_s16 }
 0x35f   : > { %p4131_p10 = pnand %p4138_p9, %p4503_p6 }
 0x361   : > { %p4132_p11 = pneg %p4131_p10 }
 0x363   : > { %4406 = dma.done.wait (%p4132_p11), %s3337_s17, 128  }
 0x364   : > { %4408 = vsyncadd (%p4132_p11), %s3337_s17, 4294967168  ;;  %p17_p12 = scmp.ge.s32.totalorder %s4486_s24, 4   ;;  %s5957_s18 = smov %s4415_s19 }
 0x365   : > { %s5958_s19 = smov %s4419_s20  ;;  %s5959_s20 = smov %s4497_s27 }
 0x366   : > { %s5960_s21 = smov %s4486_s24  ;;  %19 = sbr.rel (!%p17_p12) target bundleno = 5 (0x5), region = 90 }
 0x36b   :  { %3343 = vsyncpa [#allocation3], 1 }
 0x36c   :  { %3345 = vsyncpa [#allocation3 + $0x1], 1 }
 0x36d   :  { %3346 = vsyncpa [#allocation6], 1 }
 0x36e   :  { %3347 = vsyncpa [#allocation4], 1 }
 0x36f   :  { %3349 = vsyncpa [#allocation4 + $0x1], 1 }

</bundles_post_ra>
